<compile_context>
chip_gen: v7x
topology: tpu7x:2x2x1
jax: 0.10.0
libtpu: 0.0.40
codegen_flags: <defaults>
</compile_context>

<pallas_src>
import math
from functools import partial

import jax
import jax.numpy as jnp
from jax import lax
from jax.experimental import pallas as pl
from jax.experimental.pallas import tpu as pltpu

# ----------------------------- model config ---------------------------------
BATCH = 2
SEQ = 8                      # hourly window length
INP_DIM = 5                  # OHLCV
METADATA_DIM = 8
MODEL_DIM = 32               # fusion_model_dim
NUM_HEADS = 4                # fusion_num_heads
NUM_LAYERS = 2               # fusion_num_layers
FF_DIM = 4 * MODEL_DIM
MD_INTER = 4 * METADATA_DIM  # == 32 == MODEL_DIM for this config
S1 = SEQ + 1                 # token + sequence (== self.max_window for the test)


# ----------------------------- small helpers --------------------------------
def _mm(a, b):
    return jnp.dot(a, b, preferred_element_type=jnp.float32)


def _mm_nt(a, b):
    """a @ b.T with f32 accumulation."""
    return lax.dot_general(a, b, (((1,), (1,)), ((), ())),
                           preferred_element_type=jnp.float32)


def _elu(z):
    return jnp.where(z > 0, z, jnp.exp(jnp.minimum(z, 0.0)) - 1.0)


def _sigmoid(z):
    return 1.0 / (1.0 + jnp.exp(-z))        # exact (GLU gates)


def _layernorm(y, g, b, eps=1e-5):
    mu = jnp.mean(y, axis=-1, keepdims=True)
    var = jnp.mean(jnp.square(y - mu), axis=-1, keepdims=True)
    return (y - mu) * lax.rsqrt(var + eps) * g + b


class _SlabPacker:
    """Packs many small 2-D tensors (zero padded to a common lane width) into
    one row-concatenated slab, recording static row offsets."""

    def __init__(self, lanes):
        self.lanes = lanes
        self._parts = []
        self.offsets = {}
        self._rows = 0

    def add(self, name, arr):
        arr = jnp.asarray(arr, jnp.float32)
        r, c = arr.shape
        if c < self.lanes:
            arr = jnp.pad(arr, ((0, 0), (0, self.lanes - c)))
        self.offsets[name] = (self._rows, r)
        self._parts.append(arr)
        self._rows += r
        return self

    def pack(self):
        return jnp.concatenate(self._parts, axis=0)


# ------------------- single fused model kernel (no grid) --------------------
def model_kernel(data_ref, w32_ref, w128_ref, out_ref, loss_ref, xf_s, rep_s, *,
                 d_off, w_off, f_off, batch, seq, num_layers, num_heads):
    D = MODEL_DIM
    s1 = seq + 1
    rows = batch * s1
    dh = D // num_heads
    scale = 1.0 / math.sqrt(dh)

    def dat(name):
        o, r = d_off[name]
        return data_ref[o:o + r, :]

    def w32(name):
        o, r = w_off[name]
        return w32_ref[o:o + r, :]

    def w128(name):
        o, r = f_off[name]
        return w128_ref[o:o + r, :]

    def grn(x_rows, m_contrib, pfx):
        h = _elu(_mm(x_rows, w32(pfx + 'wx')) + m_contrib + w32(pfx + 'b1'))
        h2 = _mm(h, w32(pfx + 'w2')) + w32(pfx + 'b2')
        gate = _sigmoid(_mm(h2, w32(pfx + 'wg')) + w32(pfx + 'bg'))
        val = _mm(h2, w32(pfx + 'wv')) + w32(pfx + 'bv')
        skip = _mm(x_rows, w32(pfx + 'ws')) + w32(pfx + 'bs')
        return _layernorm(skip + gate * val, w32(pfx + 'lng'), w32(pfx + 'lnb'))

    # ---- inputs (rows already zero padded to 32 lanes on the host) ---------
    x_rows = dat('x')                 # [B*S, 32]  lanes >= INP_DIM are zero
    meta_rows = dat('meta')           # [B, 32]    lanes >= MD are zero
    label_rows = dat('label')         # [B, 32]    lane0 = direction

    # directional-bias embedding folded through the metadata GRN Wm at pack
    # time (dir_proj = dir_emb @ Wm_meta); torch trunc-div gather -> select.
    idx = jnp.floor((label_rows[:, 0:1] + 1.0) * 0.5)       # [B,1] in {0,1}
    dproj = w32('dir_proj')                                 # [2, D]
    cond = jnp.broadcast_to(idx > 0.5, (batch, D))
    m_meta = jnp.where(cond,
                       jnp.broadcast_to(dproj[1:2, :], (batch, D)),
                       jnp.broadcast_to(dproj[0:1, :], (batch, D)))

    token = grn(meta_rows, m_meta, 'mg_')                   # [B, D]

    # temporal enricher: metadata projected once per sample, broadcast over
    # the sequence rows (replaces the host-side broadcast + concat).
    mps = _mm(meta_rows, w32('tg_wm'))                      # [B, D]
    m_temp = jnp.broadcast_to(mps[0:1, :], (batch * seq, D))
    if batch > 1:
        rid = lax.broadcasted_iota(jnp.int32, (batch * seq, 1), 0)
        for b in range(1, batch):
            m_temp = jnp.where(
                jnp.broadcast_to(rid >= b * seq, (batch * seq, D)),
                jnp.broadcast_to(mps[b:b + 1, :], (batch * seq, D)),
                m_temp)
    xt = grn(x_rows, m_temp, 'tg_')                         # [B*S, D]

    # ---- assemble [token_b ; x_b] + positional emb, once, for all samples --
    pos = w32('pos')                                        # [S1, D]
    for b in range(batch):
        xf_s[b * s1:b * s1 + 1, :] = token[b:b + 1, :] + pos[0:1, :]
        xf_s[b * s1 + 1:(b + 1) * s1, :] = (xt[b * seq:(b + 1) * seq, :]
                                            + pos[1:, :])
    x = xf_s[...]                                           # [B*S1, D]

    # block-diagonal additive attention mask (per-sample attention), built once
    rs = lax.broadcasted_iota(jnp.int32, (rows, rows), 0)
    cs = lax.broadcasted_iota(jnp.int32, (rows, rows), 1)
    same = None
    for b in range(batch):
        blk = ((rs >= b * s1) & (rs < (b + 1) * s1)
               & (cs >= b * s1) & (cs < (b + 1) * s1))
        same = blk if same is None else (same | blk)
    attn_bias = jnp.where(same, 0.0, -1e30)

    # ---- temporal fusion transformer on the fused [B*S1, D] row block ------
    for l in range(num_layers):
        sfx = f'_{l}'
        wq, bq = w32('wq' + sfx), w32('bq' + sfx)
        wk, bk = w32('wk' + sfx), w32('bk' + sfx)
        wv, bv = w32('wv' + sfx), w32('bv' + sfx)
        wo, bo = w32('wo' + sfx), w32('bo' + sfx)

        q = _mm(x, wq) + bq
        k = _mm(x, wk) + bk
        v = _mm(x, wv) + bv

        attn = bo                                           # broadcasts below
        for h in range(num_heads):
            lo = h * dh
            s = _mm_nt(q[:, lo:lo + dh], k[:, lo:lo + dh]) * scale + attn_bias
            s = s - jnp.max(s, axis=-1, keepdims=True)
            p = jnp.exp(s)
            p = p * pl.reciprocal(jnp.sum(p, axis=-1, keepdims=True),
                                  approx=True)
            ctx = _mm(p, v[:, lo:lo + dh])                  # [rows, dh]
            # output projection folded into the head loop (row slice of Wo)
            attn = attn + _mm(ctx, wo[lo:lo + dh, :])
        x = _layernorm(x + attn, w32('ln1g' + sfx), w32('ln1b' + sfx))

        # GRN feed-forward (identity skip, in_dim == out_dim == D)
        hmid = _elu(_mm(x, w128('w1' + sfx)) + w128('b1' + sfx))   # [rows, FF]
        h2 = _mm(hmid, w32('w2' + sfx)) + w32('b2' + sfx)
        gate = _sigmoid(_mm(h2, w32('wg' + sfx)) + w32('bg' + sfx))
        val = _mm(h2, w32('wvg' + sfx)) + w32('bvg' + sfx)
        x = _layernorm(x + gate * val, w32('ln2g' + sfx), w32('ln2b' + sfx))

    # ---- value head on the metadata-token rows + MSE loss ------------------
    for b in range(batch):
        rep_s[b:b + 1, :] = x[b * s1:b * s1 + 1, :]
    rep = rep_s[...]                                        # [B, D]
    preds = _mm_nt(w32('head_w'), rep) + w32('head_b')[:, :batch]   # [1, B]
    out_ref[...] = preds
    diff = preds - dat('target')[:, :batch]
    loss_ref[...] = jnp.sum(diff * diff, axis=-1, keepdims=True) * (1.0 / batch)


# ----------------------------- parameters ------------------------------------
def _sinusoidal_embeddings(emb_size, max_len):
    pos = jnp.arange(max_len, dtype=jnp.float32)[:, None]
    div = jnp.exp(jnp.arange(0, emb_size, 2, dtype=jnp.float32)
                  * (-math.log(10000.0) / emb_size))
    pe = jnp.zeros((max_len, emb_size), jnp.float32)
    pe = pe.at[:, 0::2].set(jnp.sin(pos * div))
    pe = pe.at[:, 1::2].set(jnp.cos(pos * div))
    return pe


def init_params(key):
    keys = iter(jax.random.split(key, 64))

    def lin(din, dout):
        return (jax.random.normal(next(keys), (din, dout), jnp.float32)
                / math.sqrt(din))

    def grn_dual(dx, dm, inter, dout):
        return dict(
            wx=lin(dx, inter), wm=lin(dm, inter),
            b1=jnp.zeros((1, inter), jnp.float32),
            w2=lin(inter, dout), b2=jnp.zeros((1, dout), jnp.float32),
            wg=lin(dout, dout), bg=jnp.zeros((1, dout), jnp.float32),
            wv=lin(dout, dout), bv=jnp.zeros((1, dout), jnp.float32),
            ws=lin(dx, dout), bs=jnp.zeros((1, dout), jnp.float32),
            lng=jnp.ones((1, dout), jnp.float32),
            lnb=jnp.zeros((1, dout), jnp.float32))

    D, FF = MODEL_DIM, FF_DIM
    layers = []
    for _ in range(NUM_LAYERS):
        layers.append(dict(
            wq=lin(D, D), bq=jnp.zeros((1, D), jnp.float32),
            wk=lin(D, D), bk=jnp.zeros((1, D), jnp.float32),
            wv=lin(D, D), bv=jnp.zeros((1, D), jnp.float32),
            wo=lin(D, D), bo=jnp.zeros((1, D), jnp.float32),
            ln1g=jnp.ones((1, D), jnp.float32), ln1b=jnp.zeros((1, D), jnp.float32),
            w1=lin(D, FF), b1=jnp.zeros((1, FF), jnp.float32),
            w2=lin(FF, D), b2=jnp.zeros((1, D), jnp.float32),
            wg=lin(D, D), bg=jnp.zeros((1, D), jnp.float32),
            wvg=lin(D, D), bvg=jnp.zeros((1, D), jnp.float32),
            ln2g=jnp.ones((1, D), jnp.float32), ln2b=jnp.zeros((1, D), jnp.float32)))

    return dict(
        dir_emb=jax.random.normal(next(keys), (2, METADATA_DIM), jnp.float32) * 0.1,
        meta_grn=grn_dual(METADATA_DIM, METADATA_DIM, MD_INTER, MODEL_DIM),
        temp_grn=grn_dual(INP_DIM, METADATA_DIM, MD_INTER, MODEL_DIM),
        layers=layers,
        head_w=lin(MODEL_DIM, 1).T,               # [1, D] (nn.Linear(D,1).weight)
        head_b=jnp.zeros((1, 1), jnp.float32),
        pos_emb=_sinusoidal_embeddings(MODEL_DIM, S1),
    )


def pack_params(params):
    """Fold + zero pad all parameters into two lane-dense slabs (done once)."""
    D = MODEL_DIM

    def pad_rows(a, rows):
        return jnp.pad(a, ((0, rows - a.shape[0]), (0, 0)))

    p32 = _SlabPacker(D)

    def add_grn(pfx, g):
        # input-facing projections are zero padded on the contraction dim so
        # the kernel can matmul the 32-lane-padded inputs directly.
        p32.add(pfx + 'wx', pad_rows(g['wx'], D))
        p32.add(pfx + 'ws', pad_rows(g['ws'], D))
        for k in ('b1', 'w2', 'b2', 'wg', 'bg', 'wv', 'bv', 'bs', 'lng', 'lnb'):
            p32.add(pfx + k, g[k])

    add_grn('mg_', params['meta_grn'])
    # directional-bias embedding pre-folded through the metadata GRN Wm
    p32.add('dir_proj', params['dir_emb'] @ params['meta_grn']['wm'])
    add_grn('tg_', params['temp_grn'])
    p32.add('tg_wm', pad_rows(params['temp_grn']['wm'], D))
    p32.add('pos', params['pos_emb'])

    for l, lp in enumerate(params['layers']):
        sfx = f'_{l}'
        for k in ('wq', 'bq', 'wk', 'bk', 'wv', 'bv', 'wo', 'bo', 'ln1g', 'ln1b',
                  'w2', 'b2', 'wg', 'bg', 'wvg', 'bvg', 'ln2g', 'ln2b'):
            p32.add(k + sfx, lp[k])
    p32.add('head_w', params['head_w'])
    p32.add('head_b', jnp.broadcast_to(params['head_b'], (1, D)))

    p128 = _SlabPacker(FF_DIM)
    for l, lp in enumerate(params['layers']):
        sfx = f'_{l}'
        p128.add('w1' + sfx, lp['w1'])
        p128.add('b1' + sfx, lp['b1'])

    return p32.pack(), p32.offsets, p128.pack(), p128.offsets


# ----------------------------- forward ---------------------------------------
def make_forward(params):
    """Packs weights once into VMEM slabs; returns a jitted forward(x, md, lbl)."""
    w32_slab, w_off, w128_slab, f_off = pack_params(params)

    def forward(x, metadata, label):
        B, S, F = x.shape
        # single small producer fusion: pack all per-call data into one slab
        dpk = _SlabPacker(MODEL_DIM)
        dpk.add('x', x.reshape(B * S, F))
        dpk.add('meta', metadata)
        dpk.add('label', label)
        dpk.add('target', label[:, 1].reshape(1, B))
        data_slab = dpk.pack()

        kern = partial(model_kernel,
                       d_off=dpk.offsets, w_off=w_off, f_off=f_off,
                       batch=B, seq=S,
                       num_layers=NUM_LAYERS, num_heads=NUM_HEADS)
        vmem = pl.BlockSpec(memory_space=pltpu.MemorySpace.VMEM)
        out_row, loss = pl.pallas_call(
            kern,
            out_shape=(jax.ShapeDtypeStruct((1, B), jnp.float32),
                       jax.ShapeDtypeStruct((1, 1), jnp.float32)),
            in_specs=[vmem, vmem, vmem],
            out_specs=(vmem, vmem),
            scratch_shapes=[pltpu.VMEM((B * (S + 1), MODEL_DIM), jnp.float32),
                            pltpu.VMEM((B, MODEL_DIM), jnp.float32)],
        )(data_slab, w32_slab, w128_slab)
        return out_row.reshape(B), loss.reshape(())

    return jax.jit(forward)


# TODO(synk): the 'lstm' positional_info branch (MetadataEncoder / TemporalEnricherLSTM)
# and the certitude path (value_only=False, HourlySwingCertitudeAwareLoss) are not
# exercised by the default config and are not implemented.

if __name__ == "__main__":
    key = jax.random.PRNGKey(0)
    kx, km, kl, kp = jax.random.split(key, 4)

    x = jax.random.normal(kx, (BATCH, SEQ, INP_DIM), jnp.float32)         # BS*seq*OHLCV
    metadata = jax.random.normal(km, (BATCH, METADATA_DIM), jnp.float32)  # BS*metadata
    label = jnp.stack(
        [jnp.array([1.0, -1.0], jnp.float32),                             # direction
         jax.random.normal(kl, (BATCH,), jnp.float32)],                   # target
        axis=1)                                                           # BS*2

    params = init_params(kp)
    fwd = make_forward(params)
    out_reg, loss = fwd(x, metadata, label)
    jax.block_until_ready((out_reg, loss))
    print("KERNEL_OK")
</pallas_src>

<mosaic_0001>
module attributes {stable_mosaic.version = 11 : i64} {
  func.func @model_kernel(%arg0: memref<21x32xf32, #tpu.memory_space<vmem>>, %arg1: memref<1041x32xf32, #tpu.memory_space<vmem>>, %arg2: memref<66x128xf32, #tpu.memory_space<vmem>>, %arg3: memref<1x2xf32, #tpu.memory_space<vmem>>, %arg4: memref<1x1xf32, #tpu.memory_space<vmem>>, %arg5: memref<18x32xf32, #tpu.memory_space<vmem>>, %arg6: memref<2x32xf32, #tpu.memory_space<vmem>>) attributes {dimension_semantics = [], scalar_prefetch = 0 : i64, scratch_operands = 2 : i64, tpu.core_type = #tpu.core_type<tc>} {
    %c0 = arith.constant 0 : index
    %c0_0 = arith.constant 0 : index
    %0 = vector.load %arg0[%c0, %c0_0] : memref<21x32xf32, #tpu.memory_space<vmem>>, vector<16x32xf32>
    %c16 = arith.constant 16 : index
    %c0_1 = arith.constant 0 : index
    %1 = vector.load %arg0[%c16, %c0_1] : memref<21x32xf32, #tpu.memory_space<vmem>>, vector<2x32xf32>
    %c18 = arith.constant 18 : index
    %c0_2 = arith.constant 0 : index
    %2 = vector.load %arg0[%c18, %c0_2] : memref<21x32xf32, #tpu.memory_space<vmem>>, vector<2x32xf32>
    %3 = vector.extract_strided_slice %2 {offsets = [0, 0], sizes = [2, 1], strides = [1, 1]} : vector<2x32xf32> to vector<2x1xf32>
    %cst = arith.constant 1.000000e+00 : f32
    %4 = vector.broadcast %cst : f32 to vector<2x1xf32>
    %5 = arith.addf %3, %4 : vector<2x1xf32>
    %cst_3 = arith.constant 5.000000e-01 : f32
    %6 = vector.broadcast %cst_3 : f32 to vector<2x1xf32>
    %7 = arith.mulf %5, %6 : vector<2x1xf32>
    %8 = math.floor %7 : vector<2x1xf32>
    %c167 = arith.constant 167 : index
    %c0_4 = arith.constant 0 : index
    %9 = vector.load %arg1[%c167, %c0_4] : memref<1041x32xf32, #tpu.memory_space<vmem>>, vector<2x32xf32>
    %cst_5 = arith.constant 5.000000e-01 : f32
    %10 = vector.broadcast %cst_5 : f32 to vector<2x1xf32>
    %11 = arith.cmpf ogt, %8, %10 : vector<2x1xf32>
    %12 = vector.shape_cast %11 : vector<2x1xi1> to vector<2x1xi1>
    %13 = vector.broadcast %12 : vector<2x1xi1> to vector<2x32xi1>
    %14 = vector.extract_strided_slice %9 {offsets = [1, 0], sizes = [1, 32], strides = [1, 1]} : vector<2x32xf32> to vector<1x32xf32>
    %15 = vector.shape_cast %14 : vector<1x32xf32> to vector<1x32xf32>
    %16 = vector.broadcast %15 : vector<1x32xf32> to vector<2x32xf32>
    %17 = vector.extract_strided_slice %9 {offsets = [0, 0], sizes = [1, 32], strides = [1, 1]} : vector<2x32xf32> to vector<1x32xf32>
    %18 = vector.shape_cast %17 : vector<1x32xf32> to vector<1x32xf32>
    %19 = vector.broadcast %18 : vector<1x32xf32> to vector<2x32xf32>
    %20 = arith.select %13, %16, %19 : vector<2x32xi1>, vector<2x32xf32>
    %c0_6 = arith.constant 0 : index
    %c0_7 = arith.constant 0 : index
    %21 = vector.load %arg1[%c0_6, %c0_7] : memref<1041x32xf32, #tpu.memory_space<vmem>>, vector<32x32xf32>
    %cst_8 = arith.constant dense<0.000000e+00> : vector<2x32xf32>
    %22 = tpu.matmul %1, %21, %cst_8 {dimension_numbers = #tpu.dot_dimension_numbers<[1], [0], [0], [1], [0, 0, 1, 1], [], []>} : vector<2x32xf32>, vector<32x32xf32>, vector<2x32xf32> -> vector<2x32xf32>
    %23 = arith.addf %22, %20 : vector<2x32xf32>
    %c64 = arith.constant 64 : index
    %c0_9 = arith.constant 0 : index
    %24 = vector.load %arg1[%c64, %c0_9] : memref<1041x32xf32, #tpu.memory_space<vmem>>, vector<1x32xf32>
    %25 = vector.broadcast %24 : vector<1x32xf32> to vector<2x32xf32>
    %26 = arith.addf %23, %25 : vector<2x32xf32>
    %cst_10 = arith.constant 0.000000e+00 : f32
    %27 = vector.broadcast %cst_10 : f32 to vector<2x32xf32>
    %28 = arith.cmpf ogt, %26, %27 : vector<2x32xf32>
    %cst_11 = arith.constant 0.000000e+00 : f32
    %29 = vector.broadcast %cst_11 : f32 to vector<2x32xf32>
    %30 = arith.minimumf %26, %29 : vector<2x32xf32>
    %31 = math.exp %30 : vector<2x32xf32>
    %cst_12 = arith.constant 1.000000e+00 : f32
    %32 = vector.broadcast %cst_12 : f32 to vector<2x32xf32>
    %33 = arith.subf %31, %32 : vector<2x32xf32>
    %34 = arith.select %28, %26, %33 : vector<2x32xi1>, vector<2x32xf32>
    %c65 = arith.constant 65 : index
    %c0_13 = arith.constant 0 : index
    %35 = vector.load %arg1[%c65, %c0_13] : memref<1041x32xf32, #tpu.memory_space<vmem>>, vector<32x32xf32>
    %cst_14 = arith.constant dense<0.000000e+00> : vector<2x32xf32>
    %36 = tpu.matmul %34, %35, %cst_14 {dimension_numbers = #tpu.dot_dimension_numbers<[1], [0], [0], [1], [0, 0, 1, 1], [], []>} : vector<2x32xf32>, vector<32x32xf32>, vector<2x32xf32> -> vector<2x32xf32>
    %c97 = arith.constant 97 : index
    %c0_15 = arith.constant 0 : index
    %37 = vector.load %arg1[%c97, %c0_15] : memref<1041x32xf32, #tpu.memory_space<vmem>>, vector<1x32xf32>
    %38 = vector.broadcast %37 : vector<1x32xf32> to vector<2x32xf32>
    %39 = arith.addf %36, %38 : vector<2x32xf32>
    %c98 = arith.constant 98 : index
    %c0_16 = arith.constant 0 : index
    %40 = vector.load %arg1[%c98, %c0_16] : memref<1041x32xf32, #tpu.memory_space<vmem>>, vector<32x32xf32>
    %cst_17 = arith.constant dense<0.000000e+00> : vector<2x32xf32>
    %41 = tpu.matmul %39, %40, %cst_17 {dimension_numbers = #tpu.dot_dimension_numbers<[1], [0], [0], [1], [0, 0, 1, 1], [], []>} : vector<2x32xf32>, vector<32x32xf32>, vector<2x32xf32> -> vector<2x32xf32>
    %c130 = arith.constant 130 : index
    %c0_18 = arith.constant 0 : index
    %42 = vector.load %arg1[%c130, %c0_18] : memref<1041x32xf32, #tpu.memory_space<vmem>>, vector<1x32xf32>
    %43 = vector.broadcast %42 : vector<1x32xf32> to vector<2x32xf32>
    %44 = arith.addf %41, %43 : vector<2x32xf32>
    %cst_19 = arith.constant 0.000000e+00 : f32
    %45 = vector.broadcast %cst_19 : f32 to vector<2x32xf32>
    %46 = arith.subf %45, %44 : vector<2x32xf32>
    %47 = math.exp %46 : vector<2x32xf32>
    %cst_20 = arith.constant 1.000000e+00 : f32
    %48 = vector.broadcast %cst_20 : f32 to vector<2x32xf32>
    %49 = arith.addf %48, %47 : vector<2x32xf32>
    %cst_21 = arith.constant 1.000000e+00 : f32
    %50 = vector.broadcast %cst_21 : f32 to vector<2x32xf32>
    %51 = arith.divf %50, %49 : vector<2x32xf32>
    %c131 = arith.constant 131 : index
    %c0_22 = arith.constant 0 : index
    %52 = vector.load %arg1[%c131, %c0_22] : memref<1041x32xf32, #tpu.memory_space<vmem>>, vector<32x32xf32>
    %cst_23 = arith.constant dense<0.000000e+00> : vector<2x32xf32>
    %53 = tpu.matmul %39, %52, %cst_23 {dimension_numbers = #tpu.dot_dimension_numbers<[1], [0], [0], [1], [0, 0, 1, 1], [], []>} : vector<2x32xf32>, vector<32x32xf32>, vector<2x32xf32> -> vector<2x32xf32>
    %c163 = arith.constant 163 : index
    %c0_24 = arith.constant 0 : index
    %54 = vector.load %arg1[%c163, %c0_24] : memref<1041x32xf32, #tpu.memory_space<vmem>>, vector<1x32xf32>
    %55 = vector.broadcast %54 : vector<1x32xf32> to vector<2x32xf32>
    %56 = arith.addf %53, %55 : vector<2x32xf32>
    %c32 = arith.constant 32 : index
    %c0_25 = arith.constant 0 : index
    %57 = vector.load %arg1[%c32, %c0_25] : memref<1041x32xf32, #tpu.memory_space<vmem>>, vector<32x32xf32>
    %cst_26 = arith.constant dense<0.000000e+00> : vector<2x32xf32>
    %58 = tpu.matmul %1, %57, %cst_26 {dimension_numbers = #tpu.dot_dimension_numbers<[1], [0], [0], [1], [0, 0, 1, 1], [], []>} : vector<2x32xf32>, vector<32x32xf32>, vector<2x32xf32> -> vector<2x32xf32>
    %c164 = arith.constant 164 : index
    %c0_27 = arith.constant 0 : index
    %59 = vector.load %arg1[%c164, %c0_27] : memref<1041x32xf32, #tpu.memory_space<vmem>>, vector<1x32xf32>
    %60 = vector.broadcast %59 : vector<1x32xf32> to vector<2x32xf32>
    %61 = arith.addf %58, %60 : vector<2x32xf32>
    %62 = arith.mulf %51, %56 : vector<2x32xf32>
    %63 = arith.addf %61, %62 : vector<2x32xf32>
    %c165 = arith.constant 165 : index
    %c0_28 = arith.constant 0 : index
    %64 = vector.load %arg1[%c165, %c0_28] : memref<1041x32xf32, #tpu.memory_space<vmem>>, vector<1x32xf32>
    %c166 = arith.constant 166 : index
    %c0_29 = arith.constant 0 : index
    %65 = vector.load %arg1[%c166, %c0_29] : memref<1041x32xf32, #tpu.memory_space<vmem>>, vector<1x32xf32>
    %cst_30 = arith.constant dense<0.000000e+00> : vector<2xf32>
    %66 = vector.multi_reduction <add>, %63, %cst_30 [1] : vector<2x32xf32> to vector<2xf32>
    %67 = vector.shape_cast %66 : vector<2xf32> to vector<2x1xf32>
    %cst_31 = arith.constant 3.200000e+01 : f32
    %68 = vector.broadcast %cst_31 : f32 to vector<2x1xf32>
    %69 = arith.divf %67, %68 : vector<2x1xf32>
    %70 = vector.broadcast %69 : vector<2x1xf32> to vector<2x32xf32>
    %71 = arith.subf %63, %70 : vector<2x32xf32>
    %72 = arith.mulf %71, %71 : vector<2x32xf32>
    %cst_32 = arith.constant dense<0.000000e+00> : vector<2xf32>
    %73 = vector.multi_reduction <add>, %72, %cst_32 [1] : vector<2x32xf32> to vector<2xf32>
    %74 = vector.shape_cast %73 : vector<2xf32> to vector<2x1xf32>
    %cst_33 = arith.constant 3.200000e+01 : f32
    %75 = vector.broadcast %cst_33 : f32 to vector<2x1xf32>
    %76 = arith.divf %74, %75 : vector<2x1xf32>
    %77 = vector.broadcast %69 : vector<2x1xf32> to vector<2x32xf32>
    %78 = arith.subf %63, %77 : vector<2x32xf32>
    %cst_34 = arith.constant 9.99999974E-6 : f32
    %79 = vector.broadcast %cst_34 : f32 to vector<2x1xf32>
    %80 = arith.addf %76, %79 : vector<2x1xf32>
    %81 = math.rsqrt %80 : vector<2x1xf32>
    %82 = vector.broadcast %81 : vector<2x1xf32> to vector<2x32xf32>
    %83 = arith.mulf %78, %82 : vector<2x32xf32>
    %84 = vector.broadcast %64 : vector<1x32xf32> to vector<2x32xf32>
    %85 = arith.mulf %83, %84 : vector<2x32xf32>
    %86 = vector.broadcast %65 : vector<1x32xf32> to vector<2x32xf32>
    %87 = arith.addf %85, %86 : vector<2x32xf32>
    %c336 = arith.constant 336 : index
    %c0_35 = arith.constant 0 : index
    %88 = vector.load %arg1[%c336, %c0_35] : memref<1041x32xf32, #tpu.memory_space<vmem>>, vector<32x32xf32>
    %cst_36 = arith.constant dense<0.000000e+00> : vector<2x32xf32>
    %89 = tpu.matmul %1, %88, %cst_36 {dimension_numbers = #tpu.dot_dimension_numbers<[1], [0], [0], [1], [0, 0, 1, 1], [], []>} : vector<2x32xf32>, vector<32x32xf32>, vector<2x32xf32> -> vector<2x32xf32>
    %90 = vector.extract_strided_slice %89 {offsets = [0, 0], sizes = [1, 32], strides = [1, 1]} : vector<2x32xf32> to vector<1x32xf32>
    %91 = vector.shape_cast %90 : vector<1x32xf32> to vector<1x32xf32>
    %92 = vector.broadcast %91 : vector<1x32xf32> to vector<16x32xf32>
    %93 = tpu.iota {dimensions = array<i32: 0>} : vector<16x1xi32>
    %c8_i32 = arith.constant 8 : i32
    %94 = vector.broadcast %c8_i32 : i32 to vector<16x1xi32>
    %95 = arith.cmpi sge, %93, %94 : vector<16x1xi32>
    %96 = vector.shape_cast %95 : vector<16x1xi1> to vector<16x1xi1>
    %97 = vector.broadcast %96 : vector<16x1xi1> to vector<16x32xi1>
    %98 = vector.extract_strided_slice %89 {offsets = [1, 0], sizes = [1, 32], strides = [1, 1]} : vector<2x32xf32> to vector<1x32xf32>
    %99 = vector.shape_cast %98 : vector<1x32xf32> to vector<1x32xf32>
    %100 = vector.broadcast %99 : vector<1x32xf32> to vector<16x32xf32>
    %101 = arith.select %97, %100, %92 : vector<16x32xi1>, vector<16x32xf32>
    %c169 = arith.constant 169 : index
    %c0_37 = arith.constant 0 : index
    %102 = vector.load %arg1[%c169, %c0_37] : memref<1041x32xf32, #tpu.memory_space<vmem>>, vector<32x32xf32>
    %cst_38 = arith.constant dense<0.000000e+00> : vector<16x32xf32>
    %103 = tpu.matmul %0, %102, %cst_38 {dimension_numbers = #tpu.dot_dimension_numbers<[1], [0], [0], [1], [0, 0, 1, 1], [], []>} : vector<16x32xf32>, vector<32x32xf32>, vector<16x32xf32> -> vector<16x32xf32>
    %104 = arith.addf %103, %101 : vector<16x32xf32>
    %c233 = arith.constant 233 : index
    %c0_39 = arith.constant 0 : index
    %105 = vector.load %arg1[%c233, %c0_39] : memref<1041x32xf32, #tpu.memory_space<vmem>>, vector<1x32xf32>
    %106 = vector.broadcast %105 : vector<1x32xf32> to vector<16x32xf32>
    %107 = arith.addf %104, %106 : vector<16x32xf32>
    %cst_40 = arith.constant 0.000000e+00 : f32
    %108 = vector.broadcast %cst_40 : f32 to vector<16x32xf32>
    %109 = arith.cmpf ogt, %107, %108 : vector<16x32xf32>
    %cst_41 = arith.constant 0.000000e+00 : f32
    %110 = vector.broadcast %cst_41 : f32 to vector<16x32xf32>
    %111 = arith.minimumf %107, %110 : vector<16x32xf32>
    %112 = math.exp %111 : vector<16x32xf32>
    %cst_42 = arith.constant 1.000000e+00 : f32
    %113 = vector.broadcast %cst_42 : f32 to vector<16x32xf32>
    %114 = arith.subf %112, %113 : vector<16x32xf32>
    %115 = arith.select %109, %107, %114 : vector<16x32xi1>, vector<16x32xf32>
    %c234 = arith.constant 234 : index
    %c0_43 = arith.constant 0 : index
    %116 = vector.load %arg1[%c234, %c0_43] : memref<1041x32xf32, #tpu.memory_space<vmem>>, vector<32x32xf32>
    %cst_44 = arith.constant dense<0.000000e+00> : vector<16x32xf32>
    %117 = tpu.matmul %115, %116, %cst_44 {dimension_numbers = #tpu.dot_dimension_numbers<[1], [0], [0], [1], [0, 0, 1, 1], [], []>} : vector<16x32xf32>, vector<32x32xf32>, vector<16x32xf32> -> vector<16x32xf32>
    %c266 = arith.constant 266 : index
    %c0_45 = arith.constant 0 : index
    %118 = vector.load %arg1[%c266, %c0_45] : memref<1041x32xf32, #tpu.memory_space<vmem>>, vector<1x32xf32>
    %119 = vector.broadcast %118 : vector<1x32xf32> to vector<16x32xf32>
    %120 = arith.addf %117, %119 : vector<16x32xf32>
    %c267 = arith.constant 267 : index
    %c0_46 = arith.constant 0 : index
    %121 = vector.load %arg1[%c267, %c0_46] : memref<1041x32xf32, #tpu.memory_space<vmem>>, vector<32x32xf32>
    %cst_47 = arith.constant dense<0.000000e+00> : vector<16x32xf32>
    %122 = tpu.matmul %120, %121, %cst_47 {dimension_numbers = #tpu.dot_dimension_numbers<[1], [0], [0], [1], [0, 0, 1, 1], [], []>} : vector<16x32xf32>, vector<32x32xf32>, vector<16x32xf32> -> vector<16x32xf32>
    %c299 = arith.constant 299 : index
    %c0_48 = arith.constant 0 : index
    %123 = vector.load %arg1[%c299, %c0_48] : memref<1041x32xf32, #tpu.memory_space<vmem>>, vector<1x32xf32>
    %124 = vector.broadcast %123 : vector<1x32xf32> to vector<16x32xf32>
    %125 = arith.addf %122, %124 : vector<16x32xf32>
    %cst_49 = arith.constant 0.000000e+00 : f32
    %126 = vector.broadcast %cst_49 : f32 to vector<16x32xf32>
    %127 = arith.subf %126, %125 : vector<16x32xf32>
    %128 = math.exp %127 : vector<16x32xf32>
    %cst_50 = arith.constant 1.000000e+00 : f32
    %129 = vector.broadcast %cst_50 : f32 to vector<16x32xf32>
    %130 = arith.addf %129, %128 : vector<16x32xf32>
    %cst_51 = arith.constant 1.000000e+00 : f32
    %131 = vector.broadcast %cst_51 : f32 to vector<16x32xf32>
    %132 = arith.divf %131, %130 : vector<16x32xf32>
    %c300 = arith.constant 300 : index
    %c0_52 = arith.constant 0 : index
    %133 = vector.load %arg1[%c300, %c0_52] : memref<1041x32xf32, #tpu.memory_space<vmem>>, vector<32x32xf32>
    %cst_53 = arith.constant dense<0.000000e+00> : vector<16x32xf32>
    %134 = tpu.matmul %120, %133, %cst_53 {dimension_numbers = #tpu.dot_dimension_numbers<[1], [0], [0], [1], [0, 0, 1, 1], [], []>} : vector<16x32xf32>, vector<32x32xf32>, vector<16x32xf32> -> vector<16x32xf32>
    %c332 = arith.constant 332 : index
    %c0_54 = arith.constant 0 : index
    %135 = vector.load %arg1[%c332, %c0_54] : memref<1041x32xf32, #tpu.memory_space<vmem>>, vector<1x32xf32>
    %136 = vector.broadcast %135 : vector<1x32xf32> to vector<16x32xf32>
    %137 = arith.addf %134, %136 : vector<16x32xf32>
    %c201 = arith.constant 201 : index
    %c0_55 = arith.constant 0 : index
    %138 = vector.load %arg1[%c201, %c0_55] : memref<1041x32xf32, #tpu.memory_space<vmem>>, vector<32x32xf32>
    %cst_56 = arith.constant dense<0.000000e+00> : vector<16x32xf32>
    %139 = tpu.matmul %0, %138, %cst_56 {dimension_numbers = #tpu.dot_dimension_numbers<[1], [0], [0], [1], [0, 0, 1, 1], [], []>} : vector<16x32xf32>, vector<32x32xf32>, vector<16x32xf32> -> vector<16x32xf32>
    %c333 = arith.constant 333 : index
    %c0_57 = arith.constant 0 : index
    %140 = vector.load %arg1[%c333, %c0_57] : memref<1041x32xf32, #tpu.memory_space<vmem>>, vector<1x32xf32>
    %141 = vector.broadcast %140 : vector<1x32xf32> to vector<16x32xf32>
    %142 = arith.addf %139, %141 : vector<16x32xf32>
    %143 = arith.mulf %132, %137 : vector<16x32xf32>
    %144 = arith.addf %142, %143 : vector<16x32xf32>
    %c334 = arith.constant 334 : index
    %c0_58 = arith.constant 0 : index
    %145 = vector.load %arg1[%c334, %c0_58] : memref<1041x32xf32, #tpu.memory_space<vmem>>, vector<1x32xf32>
    %c335 = arith.constant 335 : index
    %c0_59 = arith.constant 0 : index
    %146 = vector.load %arg1[%c335, %c0_59] : memref<1041x32xf32, #tpu.memory_space<vmem>>, vector<1x32xf32>
    %cst_60 = arith.constant dense<0.000000e+00> : vector<16xf32>
    %147 = vector.multi_reduction <add>, %144, %cst_60 [1] : vector<16x32xf32> to vector<16xf32>
    %148 = vector.shape_cast %147 : vector<16xf32> to vector<16x1xf32>
    %cst_61 = arith.constant 3.200000e+01 : f32
    %149 = vector.broadcast %cst_61 : f32 to vector<16x1xf32>
    %150 = arith.divf %148, %149 : vector<16x1xf32>
    %151 = vector.broadcast %150 : vector<16x1xf32> to vector<16x32xf32>
    %152 = arith.subf %144, %151 : vector<16x32xf32>
    %153 = arith.mulf %152, %152 : vector<16x32xf32>
    %cst_62 = arith.constant dense<0.000000e+00> : vector<16xf32>
    %154 = vector.multi_reduction <add>, %153, %cst_62 [1] : vector<16x32xf32> to vector<16xf32>
    %155 = vector.shape_cast %154 : vector<16xf32> to vector<16x1xf32>
    %cst_63 = arith.constant 3.200000e+01 : f32
    %156 = vector.broadcast %cst_63 : f32 to vector<16x1xf32>
    %157 = arith.divf %155, %156 : vector<16x1xf32>
    %158 = vector.broadcast %150 : vector<16x1xf32> to vector<16x32xf32>
    %159 = arith.subf %144, %158 : vector<16x32xf32>
    %cst_64 = arith.constant 9.99999974E-6 : f32
    %160 = vector.broadcast %cst_64 : f32 to vector<16x1xf32>
    %161 = arith.addf %157, %160 : vector<16x1xf32>
    %162 = math.rsqrt %161 : vector<16x1xf32>
    %163 = vector.broadcast %162 : vector<16x1xf32> to vector<16x32xf32>
    %164 = arith.mulf %159, %163 : vector<16x32xf32>
    %165 = vector.broadcast %145 : vector<1x32xf32> to vector<16x32xf32>
    %166 = arith.mulf %164, %165 : vector<16x32xf32>
    %167 = vector.broadcast %146 : vector<1x32xf32> to vector<16x32xf32>
    %168 = arith.addf %166, %167 : vector<16x32xf32>
    %c368 = arith.constant 368 : index
    %c0_65 = arith.constant 0 : index
    %169 = vector.load %arg1[%c368, %c0_65] : memref<1041x32xf32, #tpu.memory_space<vmem>>, vector<9x32xf32>
    %170 = vector.extract_strided_slice %87 {offsets = [0, 0], sizes = [1, 32], strides = [1, 1]} : vector<2x32xf32> to vector<1x32xf32>
    %171 = vector.extract_strided_slice %169 {offsets = [0, 0], sizes = [1, 32], strides = [1, 1]} : vector<9x32xf32> to vector<1x32xf32>
    %172 = arith.addf %170, %171 : vector<1x32xf32>
    %c0_66 = arith.constant 0 : index
    %c0_67 = arith.constant 0 : index
    %173 = vector.load %arg5[%c0_66, %c0_67] : memref<18x32xf32, #tpu.memory_space<vmem>>, vector<1x32xf32>
    tpu.vector_store %arg5[%c0_66, %c0_67], %172 {strides = array<i32>} : memref<18x32xf32, #tpu.memory_space<vmem>>, vector<1x32xf32>,
    %174 = vector.extract_strided_slice %168 {offsets = [0, 0], sizes = [8, 32], strides = [1, 1]} : vector<16x32xf32> to vector<8x32xf32>
    %175 = vector.extract_strided_slice %169 {offsets = [1, 0], sizes = [8, 32], strides = [1, 1]} : vector<9x32xf32> to vector<8x32xf32>
    %176 = arith.addf %174, %175 : vector<8x32xf32>
    %c1 = arith.constant 1 : index
    %c0_68 = arith.constant 0 : index
    %177 = vector.load %arg5[%c1, %c0_68] : memref<18x32xf32, #tpu.memory_space<vmem>>, vector<8x32xf32>
    tpu.vector_store %arg5[%c1, %c0_68], %176 {strides = array<i32>} : memref<18x32xf32, #tpu.memory_space<vmem>>, vector<8x32xf32>,
    %178 = vector.extract_strided_slice %87 {offsets = [1, 0], sizes = [1, 32], strides = [1, 1]} : vector<2x32xf32> to vector<1x32xf32>
    %179 = vector.extract_strided_slice %169 {offsets = [0, 0], sizes = [1, 32], strides = [1, 1]} : vector<9x32xf32> to vector<1x32xf32>
    %180 = arith.addf %178, %179 : vector<1x32xf32>
    %c9 = arith.constant 9 : index
    %c0_69 = arith.constant 0 : index
    %181 = vector.load %arg5[%c9, %c0_69] : memref<18x32xf32, #tpu.memory_space<vmem>>, vector<1x32xf32>
    tpu.vector_store %arg5[%c9, %c0_69], %180 {strides = array<i32>} : memref<18x32xf32, #tpu.memory_space<vmem>>, vector<1x32xf32>,
    %182 = vector.extract_strided_slice %168 {offsets = [8, 0], sizes = [8, 32], strides = [1, 1]} : vector<16x32xf32> to vector<8x32xf32>
    %183 = vector.extract_strided_slice %169 {offsets = [1, 0], sizes = [8, 32], strides = [1, 1]} : vector<9x32xf32> to vector<8x32xf32>
    %184 = arith.addf %182, %183 : vector<8x32xf32>
    %c10 = arith.constant 10 : index
    %c0_70 = arith.constant 0 : index
    %185 = vector.load %arg5[%c10, %c0_70] : memref<18x32xf32, #tpu.memory_space<vmem>>, vector<8x32xf32>
    tpu.vector_store %arg5[%c10, %c0_70], %184 {strides = array<i32>} : memref<18x32xf32, #tpu.memory_space<vmem>>, vector<8x32xf32>,
    %c0_71 = arith.constant 0 : index
    %c0_72 = arith.constant 0 : index
    %186 = vector.load %arg5[%c0_71, %c0_72] : memref<18x32xf32, #tpu.memory_space<vmem>>, vector<18x32xf32>
    %187 = tpu.iota {dimensions = array<i32: 0>} : vector<18x18xi32>
    %188 = tpu.iota {dimensions = array<i32: 1>} : vector<18x18xi32>
    %c0_i32 = arith.constant 0 : i32
    %189 = vector.broadcast %c0_i32 : i32 to vector<18x18xi32>
    %190 = arith.cmpi sge, %187, %189 : vector<18x18xi32>
    %c9_i32 = arith.constant 9 : i32
    %191 = vector.broadcast %c9_i32 : i32 to vector<18x18xi32>
    %192 = arith.cmpi slt, %187, %191 : vector<18x18xi32>
    %193 = arith.andi %190, %192 : vector<18x18xi1>
    %c0_i32_73 = arith.constant 0 : i32
    %194 = vector.broadcast %c0_i32_73 : i32 to vector<18x18xi32>
    %195 = arith.cmpi sge, %188, %194 : vector<18x18xi32>
    %196 = arith.andi %193, %195 : vector<18x18xi1>
    %c9_i32_74 = arith.constant 9 : i32
    %197 = vector.broadcast %c9_i32_74 : i32 to vector<18x18xi32>
    %198 = arith.cmpi slt, %188, %197 : vector<18x18xi32>
    %199 = arith.andi %196, %198 : vector<18x18xi1>
    %c9_i32_75 = arith.constant 9 : i32
    %200 = vector.broadcast %c9_i32_75 : i32 to vector<18x18xi32>
    %201 = arith.cmpi sge, %187, %200 : vector<18x18xi32>
    %c18_i32 = arith.constant 18 : i32
    %202 = vector.broadcast %c18_i32 : i32 to vector<18x18xi32>
    %203 = arith.cmpi slt, %187, %202 : vector<18x18xi32>
    %204 = arith.andi %201, %203 : vector<18x18xi1>
    %c9_i32_76 = arith.constant 9 : i32
    %205 = vector.broadcast %c9_i32_76 : i32 to vector<18x18xi32>
    %206 = arith.cmpi sge, %188, %205 : vector<18x18xi32>
    %207 = arith.andi %204, %206 : vector<18x18xi1>
    %c18_i32_77 = arith.constant 18 : i32
    %208 = vector.broadcast %c18_i32_77 : i32 to vector<18x18xi32>
    %209 = arith.cmpi slt, %188, %208 : vector<18x18xi32>
    %210 = arith.andi %207, %209 : vector<18x18xi1>
    %211 = arith.ori %199, %210 : vector<18x18xi1>
    %cst_78 = arith.constant 0.000000e+00 : f32
    %cst_79 = arith.constant -1.000000e+30 : f32
    %212 = vector.broadcast %cst_78 : f32 to vector<18x18xf32>
    %213 = vector.broadcast %cst_79 : f32 to vector<18x18xf32>
    %214 = arith.select %211, %212, %213 : vector<18x18xi1>, vector<18x18xf32>
    %c377 = arith.constant 377 : index
    %c0_80 = arith.constant 0 : index
    %215 = vector.load %arg1[%c377, %c0_80] : memref<1041x32xf32, #tpu.memory_space<vmem>>, vector<32x32xf32>
    %c409 = arith.constant 409 : index
    %c0_81 = arith.constant 0 : index
    %216 = vector.load %arg1[%c409, %c0_81] : memref<1041x32xf32, #tpu.memory_space<vmem>>, vector<1x32xf32>
    %c410 = arith.constant 410 : index
    %c0_82 = arith.constant 0 : index
    %217 = vector.load %arg1[%c410, %c0_82] : memref<1041x32xf32, #tpu.memory_space<vmem>>, vector<32x32xf32>
    %c442 = arith.constant 442 : index
    %c0_83 = arith.constant 0 : index
    %218 = vector.load %arg1[%c442, %c0_83] : memref<1041x32xf32, #tpu.memory_space<vmem>>, vector<1x32xf32>
    %c443 = arith.constant 443 : index
    %c0_84 = arith.constant 0 : index
    %219 = vector.load %arg1[%c443, %c0_84] : memref<1041x32xf32, #tpu.memory_space<vmem>>, vector<32x32xf32>
    %c475 = arith.constant 475 : index
    %c0_85 = arith.constant 0 : index
    %220 = vector.load %arg1[%c475, %c0_85] : memref<1041x32xf32, #tpu.memory_space<vmem>>, vector<1x32xf32>
    %c476 = arith.constant 476 : index
    %c0_86 = arith.constant 0 : index
    %221 = vector.load %arg1[%c476, %c0_86] : memref<1041x32xf32, #tpu.memory_space<vmem>>, vector<32x32xf32>
    %c508 = arith.constant 508 : index
    %c0_87 = arith.constant 0 : index
    %222 = vector.load %arg1[%c508, %c0_87] : memref<1041x32xf32, #tpu.memory_space<vmem>>, vector<1x32xf32>
    %cst_88 = arith.constant dense<0.000000e+00> : vector<18x32xf32>
    %223 = tpu.matmul %186, %215, %cst_88 {dimension_numbers = #tpu.dot_dimension_numbers<[1], [0], [0], [1], [0, 0, 1, 1], [], []>} : vector<18x32xf32>, vector<32x32xf32>, vector<18x32xf32> -> vector<18x32xf32>
    %224 = vector.broadcast %216 : vector<1x32xf32> to vector<18x32xf32>
    %225 = arith.addf %223, %224 : vector<18x32xf32>
    %cst_89 = arith.constant dense<0.000000e+00> : vector<18x32xf32>
    %226 = tpu.matmul %186, %217, %cst_89 {dimension_numbers = #tpu.dot_dimension_numbers<[1], [0], [0], [1], [0, 0, 1, 1], [], []>} : vector<18x32xf32>, vector<32x32xf32>, vector<18x32xf32> -> vector<18x32xf32>
    %227 = vector.broadcast %218 : vector<1x32xf32> to vector<18x32xf32>
    %228 = arith.addf %226, %227 : vector<18x32xf32>
    %cst_90 = arith.constant dense<0.000000e+00> : vector<18x32xf32>
    %229 = tpu.matmul %186, %219, %cst_90 {dimension_numbers = #tpu.dot_dimension_numbers<[1], [0], [0], [1], [0, 0, 1, 1], [], []>} : vector<18x32xf32>, vector<32x32xf32>, vector<18x32xf32> -> vector<18x32xf32>
    %230 = vector.broadcast %220 : vector<1x32xf32> to vector<18x32xf32>
    %231 = arith.addf %229, %230 : vector<18x32xf32>
    %232 = vector.extract_strided_slice %225 {offsets = [0, 0], sizes = [18, 8], strides = [1, 1]} : vector<18x32xf32> to vector<18x8xf32>
    %233 = vector.extract_strided_slice %228 {offsets = [0, 0], sizes = [18, 8], strides = [1, 1]} : vector<18x32xf32> to vector<18x8xf32>
    %cst_91 = arith.constant dense<0.000000e+00> : vector<18x18xf32>
    %234 = tpu.matmul %232, %233, %cst_91 {dimension_numbers = #tpu.dot_dimension_numbers<[1], [1], [0], [0], [0, 0, 1, 0], [], []>} : vector<18x8xf32>, vector<18x8xf32>, vector<18x18xf32> -> vector<18x18xf32>
    %cst_92 = arith.constant 0.353553385 : f32
    %235 = vector.broadcast %cst_92 : f32 to vector<18x18xf32>
    %236 = arith.mulf %234, %235 : vector<18x18xf32>
    %237 = arith.addf %236, %214 : vector<18x18xf32>
    %cst_93 = arith.constant dense<0xFF800000> : vector<18xf32>
    %238 = vector.multi_reduction <maximumf>, %237, %cst_93 [1] : vector<18x18xf32> to vector<18xf32>
    %239 = vector.shape_cast %238 : vector<18xf32> to vector<18x1xf32>
    %240 = vector.broadcast %239 : vector<18x1xf32> to vector<18x18xf32>
    %241 = arith.subf %237, %240 : vector<18x18xf32>
    %242 = math.exp %241 : vector<18x18xf32>
    %cst_94 = arith.constant dense<0.000000e+00> : vector<18xf32>
    %243 = vector.multi_reduction <add>, %242, %cst_94 [1] : vector<18x18xf32> to vector<18xf32>
    %244 = vector.shape_cast %243 : vector<18xf32> to vector<18x1xf32>
    %245 = tpu.reciprocal %244 {approx = true} : vector<18x1xf32> -> vector<18x1xf32>
    %246 = vector.broadcast %245 : vector<18x1xf32> to vector<18x18xf32>
    %247 = arith.mulf %242, %246 : vector<18x18xf32>
    %248 = vector.extract_strided_slice %231 {offsets = [0, 0], sizes = [18, 8], strides = [1, 1]} : vector<18x32xf32> to vector<18x8xf32>
    %cst_95 = arith.constant dense<0.000000e+00> : vector<18x8xf32>
    %249 = tpu.matmul %247, %248, %cst_95 {dimension_numbers = #tpu.dot_dimension_numbers<[1], [0], [0], [1], [0, 0, 1, 1], [], []>} : vector<18x18xf32>, vector<18x8xf32>, vector<18x8xf32> -> vector<18x8xf32>
    %250 = vector.extract_strided_slice %221 {offsets = [0, 0], sizes = [8, 32], strides = [1, 1]} : vector<32x32xf32> to vector<8x32xf32>
    %cst_96 = arith.constant dense<0.000000e+00> : vector<18x32xf32>
    %251 = tpu.matmul %249, %250, %cst_96 {dimension_numbers = #tpu.dot_dimension_numbers<[1], [0], [0], [1], [0, 0, 1, 1], [], []>} : vector<18x8xf32>, vector<8x32xf32>, vector<18x32xf32> -> vector<18x32xf32>
    %252 = vector.broadcast %222 : vector<1x32xf32> to vector<18x32xf32>
    %253 = arith.addf %252, %251 : vector<18x32xf32>
    %254 = vector.extract_strided_slice %225 {offsets = [0, 8], sizes = [18, 8], strides = [1, 1]} : vector<18x32xf32> to vector<18x8xf32>
    %255 = vector.extract_strided_slice %228 {offsets = [0, 8], sizes = [18, 8], strides = [1, 1]} : vector<18x32xf32> to vector<18x8xf32>
    %cst_97 = arith.constant dense<0.000000e+00> : vector<18x18xf32>
    %256 = tpu.matmul %254, %255, %cst_97 {dimension_numbers = #tpu.dot_dimension_numbers<[1], [1], [0], [0], [0, 0, 1, 0], [], []>} : vector<18x8xf32>, vector<18x8xf32>, vector<18x18xf32> -> vector<18x18xf32>
    %cst_98 = arith.constant 0.353553385 : f32
    %257 = vector.broadcast %cst_98 : f32 to vector<18x18xf32>
    %258 = arith.mulf %256, %257 : vector<18x18xf32>
    %259 = arith.addf %258, %214 : vector<18x18xf32>
    %cst_99 = arith.constant dense<0xFF800000> : vector<18xf32>
    %260 = vector.multi_reduction <maximumf>, %259, %cst_99 [1] : vector<18x18xf32> to vector<18xf32>
    %261 = vector.shape_cast %260 : vector<18xf32> to vector<18x1xf32>
    %262 = vector.broadcast %261 : vector<18x1xf32> to vector<18x18xf32>
    %263 = arith.subf %259, %262 : vector<18x18xf32>
    %264 = math.exp %263 : vector<18x18xf32>
    %cst_100 = arith.constant dense<0.000000e+00> : vector<18xf32>
    %265 = vector.multi_reduction <add>, %264, %cst_100 [1] : vector<18x18xf32> to vector<18xf32>
    %266 = vector.shape_cast %265 : vector<18xf32> to vector<18x1xf32>
    %267 = tpu.reciprocal %266 {approx = true} : vector<18x1xf32> -> vector<18x1xf32>
    %268 = vector.broadcast %267 : vector<18x1xf32> to vector<18x18xf32>
    %269 = arith.mulf %264, %268 : vector<18x18xf32>
    %270 = vector.extract_strided_slice %231 {offsets = [0, 8], sizes = [18, 8], strides = [1, 1]} : vector<18x32xf32> to vector<18x8xf32>
    %cst_101 = arith.constant dense<0.000000e+00> : vector<18x8xf32>
    %271 = tpu.matmul %269, %270, %cst_101 {dimension_numbers = #tpu.dot_dimension_numbers<[1], [0], [0], [1], [0, 0, 1, 1], [], []>} : vector<18x18xf32>, vector<18x8xf32>, vector<18x8xf32> -> vector<18x8xf32>
    %272 = vector.extract_strided_slice %221 {offsets = [8, 0], sizes = [8, 32], strides = [1, 1]} : vector<32x32xf32> to vector<8x32xf32>
    %cst_102 = arith.constant dense<0.000000e+00> : vector<18x32xf32>
    %273 = tpu.matmul %271, %272, %cst_102 {dimension_numbers = #tpu.dot_dimension_numbers<[1], [0], [0], [1], [0, 0, 1, 1], [], []>} : vector<18x8xf32>, vector<8x32xf32>, vector<18x32xf32> -> vector<18x32xf32>
    %274 = arith.addf %253, %273 : vector<18x32xf32>
    %275 = vector.extract_strided_slice %225 {offsets = [0, 16], sizes = [18, 8], strides = [1, 1]} : vector<18x32xf32> to vector<18x8xf32>
    %276 = vector.extract_strided_slice %228 {offsets = [0, 16], sizes = [18, 8], strides = [1, 1]} : vector<18x32xf32> to vector<18x8xf32>
    %cst_103 = arith.constant dense<0.000000e+00> : vector<18x18xf32>
    %277 = tpu.matmul %275, %276, %cst_103 {dimension_numbers = #tpu.dot_dimension_numbers<[1], [1], [0], [0], [0, 0, 1, 0], [], []>} : vector<18x8xf32>, vector<18x8xf32>, vector<18x18xf32> -> vector<18x18xf32>
    %cst_104 = arith.constant 0.353553385 : f32
    %278 = vector.broadcast %cst_104 : f32 to vector<18x18xf32>
    %279 = arith.mulf %277, %278 : vector<18x18xf32>
    %280 = arith.addf %279, %214 : vector<18x18xf32>
    %cst_105 = arith.constant dense<0xFF800000> : vector<18xf32>
    %281 = vector.multi_reduction <maximumf>, %280, %cst_105 [1] : vector<18x18xf32> to vector<18xf32>
    %282 = vector.shape_cast %281 : vector<18xf32> to vector<18x1xf32>
    %283 = vector.broadcast %282 : vector<18x1xf32> to vector<18x18xf32>
    %284 = arith.subf %280, %283 : vector<18x18xf32>
    %285 = math.exp %284 : vector<18x18xf32>
    %cst_106 = arith.constant dense<0.000000e+00> : vector<18xf32>
    %286 = vector.multi_reduction <add>, %285, %cst_106 [1] : vector<18x18xf32> to vector<18xf32>
    %287 = vector.shape_cast %286 : vector<18xf32> to vector<18x1xf32>
    %288 = tpu.reciprocal %287 {approx = true} : vector<18x1xf32> -> vector<18x1xf32>
    %289 = vector.broadcast %288 : vector<18x1xf32> to vector<18x18xf32>
    %290 = arith.mulf %285, %289 : vector<18x18xf32>
    %291 = vector.extract_strided_slice %231 {offsets = [0, 16], sizes = [18, 8], strides = [1, 1]} : vector<18x32xf32> to vector<18x8xf32>
    %cst_107 = arith.constant dense<0.000000e+00> : vector<18x8xf32>
    %292 = tpu.matmul %290, %291, %cst_107 {dimension_numbers = #tpu.dot_dimension_numbers<[1], [0], [0], [1], [0, 0, 1, 1], [], []>} : vector<18x18xf32>, vector<18x8xf32>, vector<18x8xf32> -> vector<18x8xf32>
    %293 = vector.extract_strided_slice %221 {offsets = [16, 0], sizes = [8, 32], strides = [1, 1]} : vector<32x32xf32> to vector<8x32xf32>
    %cst_108 = arith.constant dense<0.000000e+00> : vector<18x32xf32>
    %294 = tpu.matmul %292, %293, %cst_108 {dimension_numbers = #tpu.dot_dimension_numbers<[1], [0], [0], [1], [0, 0, 1, 1], [], []>} : vector<18x8xf32>, vector<8x32xf32>, vector<18x32xf32> -> vector<18x32xf32>
    %295 = arith.addf %274, %294 : vector<18x32xf32>
    %296 = vector.extract_strided_slice %225 {offsets = [0, 24], sizes = [18, 8], strides = [1, 1]} : vector<18x32xf32> to vector<18x8xf32>
    %297 = vector.extract_strided_slice %228 {offsets = [0, 24], sizes = [18, 8], strides = [1, 1]} : vector<18x32xf32> to vector<18x8xf32>
    %cst_109 = arith.constant dense<0.000000e+00> : vector<18x18xf32>
    %298 = tpu.matmul %296, %297, %cst_109 {dimension_numbers = #tpu.dot_dimension_numbers<[1], [1], [0], [0], [0, 0, 1, 0], [], []>} : vector<18x8xf32>, vector<18x8xf32>, vector<18x18xf32> -> vector<18x18xf32>
    %cst_110 = arith.constant 0.353553385 : f32
    %299 = vector.broadcast %cst_110 : f32 to vector<18x18xf32>
    %300 = arith.mulf %298, %299 : vector<18x18xf32>
    %301 = arith.addf %300, %214 : vector<18x18xf32>
    %cst_111 = arith.constant dense<0xFF800000> : vector<18xf32>
    %302 = vector.multi_reduction <maximumf>, %301, %cst_111 [1] : vector<18x18xf32> to vector<18xf32>
    %303 = vector.shape_cast %302 : vector<18xf32> to vector<18x1xf32>
    %304 = vector.broadcast %303 : vector<18x1xf32> to vector<18x18xf32>
    %305 = arith.subf %301, %304 : vector<18x18xf32>
    %306 = math.exp %305 : vector<18x18xf32>
    %cst_112 = arith.constant dense<0.000000e+00> : vector<18xf32>
    %307 = vector.multi_reduction <add>, %306, %cst_112 [1] : vector<18x18xf32> to vector<18xf32>
    %308 = vector.shape_cast %307 : vector<18xf32> to vector<18x1xf32>
    %309 = tpu.reciprocal %308 {approx = true} : vector<18x1xf32> -> vector<18x1xf32>
    %310 = vector.broadcast %309 : vector<18x1xf32> to vector<18x18xf32>
    %311 = arith.mulf %306, %310 : vector<18x18xf32>
    %312 = vector.extract_strided_slice %231 {offsets = [0, 24], sizes = [18, 8], strides = [1, 1]} : vector<18x32xf32> to vector<18x8xf32>
    %cst_113 = arith.constant dense<0.000000e+00> : vector<18x8xf32>
    %313 = tpu.matmul %311, %312, %cst_113 {dimension_numbers = #tpu.dot_dimension_numbers<[1], [0], [0], [1], [0, 0, 1, 1], [], []>} : vector<18x18xf32>, vector<18x8xf32>, vector<18x8xf32> -> vector<18x8xf32>
    %314 = vector.extract_strided_slice %221 {offsets = [24, 0], sizes = [8, 32], strides = [1, 1]} : vector<32x32xf32> to vector<8x32xf32>
    %cst_114 = arith.constant dense<0.000000e+00> : vector<18x32xf32>
    %315 = tpu.matmul %313, %314, %cst_114 {dimension_numbers = #tpu.dot_dimension_numbers<[1], [0], [0], [1], [0, 0, 1, 1], [], []>} : vector<18x8xf32>, vector<8x32xf32>, vector<18x32xf32> -> vector<18x32xf32>
    %316 = arith.addf %295, %315 : vector<18x32xf32>
    %317 = arith.addf %186, %316 : vector<18x32xf32>
    %c509 = arith.constant 509 : index
    %c0_115 = arith.constant 0 : index
    %318 = vector.load %arg1[%c509, %c0_115] : memref<1041x32xf32, #tpu.memory_space<vmem>>, vector<1x32xf32>
    %c510 = arith.constant 510 : index
    %c0_116 = arith.constant 0 : index
    %319 = vector.load %arg1[%c510, %c0_116] : memref<1041x32xf32, #tpu.memory_space<vmem>>, vector<1x32xf32>
    %cst_117 = arith.constant dense<0.000000e+00> : vector<18xf32>
    %320 = vector.multi_reduction <add>, %317, %cst_117 [1] : vector<18x32xf32> to vector<18xf32>
    %321 = vector.shape_cast %320 : vector<18xf32> to vector<18x1xf32>
    %cst_118 = arith.constant 3.200000e+01 : f32
    %322 = vector.broadcast %cst_118 : f32 to vector<18x1xf32>
    %323 = arith.divf %321, %322 : vector<18x1xf32>
    %324 = vector.broadcast %323 : vector<18x1xf32> to vector<18x32xf32>
    %325 = arith.subf %317, %324 : vector<18x32xf32>
    %326 = arith.mulf %325, %325 : vector<18x32xf32>
    %cst_119 = arith.constant dense<0.000000e+00> : vector<18xf32>
    %327 = vector.multi_reduction <add>, %326, %cst_119 [1] : vector<18x32xf32> to vector<18xf32>
    %328 = vector.shape_cast %327 : vector<18xf32> to vector<18x1xf32>
    %cst_120 = arith.constant 3.200000e+01 : f32
    %329 = vector.broadcast %cst_120 : f32 to vector<18x1xf32>
    %330 = arith.divf %328, %329 : vector<18x1xf32>
    %331 = vector.broadcast %323 : vector<18x1xf32> to vector<18x32xf32>
    %332 = arith.subf %317, %331 : vector<18x32xf32>
    %cst_121 = arith.constant 9.99999974E-6 : f32
    %333 = vector.broadcast %cst_121 : f32 to vector<18x1xf32>
    %334 = arith.addf %330, %333 : vector<18x1xf32>
    %335 = math.rsqrt %334 : vector<18x1xf32>
    %336 = vector.broadcast %335 : vector<18x1xf32> to vector<18x32xf32>
    %337 = arith.mulf %332, %336 : vector<18x32xf32>
    %338 = vector.broadcast %318 : vector<1x32xf32> to vector<18x32xf32>
    %339 = arith.mulf %337, %338 : vector<18x32xf32>
    %340 = vector.broadcast %319 : vector<1x32xf32> to vector<18x32xf32>
    %341 = arith.addf %339, %340 : vector<18x32xf32>
    %c0_122 = arith.constant 0 : index
    %c0_123 = arith.constant 0 : index
    %342 = vector.load %arg2[%c0_122, %c0_123] : memref<66x128xf32, #tpu.memory_space<vmem>>, vector<32x128xf32>
    %cst_124 = arith.constant dense<0.000000e+00> : vector<18x128xf32>
    %343 = tpu.matmul %341, %342, %cst_124 {dimension_numbers = #tpu.dot_dimension_numbers<[1], [0], [0], [1], [0, 0, 1, 1], [], []>} : vector<18x32xf32>, vector<32x128xf32>, vector<18x128xf32> -> vector<18x128xf32>
    %c32_125 = arith.constant 32 : index
    %c0_126 = arith.constant 0 : index
    %344 = vector.load %arg2[%c32_125, %c0_126] : memref<66x128xf32, #tpu.memory_space<vmem>>, vector<1x128xf32>
    %345 = vector.broadcast %344 : vector<1x128xf32> to vector<18x128xf32>
    %346 = arith.addf %343, %345 : vector<18x128xf32>
    %cst_127 = arith.constant 0.000000e+00 : f32
    %347 = vector.broadcast %cst_127 : f32 to vector<18x128xf32>
    %348 = arith.cmpf ogt, %346, %347 : vector<18x128xf32>
    %cst_128 = arith.constant 0.000000e+00 : f32
    %349 = vector.broadcast %cst_128 : f32 to vector<18x128xf32>
    %350 = arith.minimumf %346, %349 : vector<18x128xf32>
    %351 = math.exp %350 : vector<18x128xf32>
    %cst_129 = arith.constant 1.000000e+00 : f32
    %352 = vector.broadcast %cst_129 : f32 to vector<18x128xf32>
    %353 = arith.subf %351, %352 : vector<18x128xf32>
    %354 = arith.select %348, %346, %353 : vector<18x128xi1>, vector<18x128xf32>
    %c511 = arith.constant 511 : index
    %c0_130 = arith.constant 0 : index
    %355 = vector.load %arg1[%c511, %c0_130] : memref<1041x32xf32, #tpu.memory_space<vmem>>, vector<128x32xf32>
    %cst_131 = arith.constant dense<0.000000e+00> : vector<18x32xf32>
    %356 = tpu.matmul %354, %355, %cst_131 {dimension_numbers = #tpu.dot_dimension_numbers<[1], [0], [0], [1], [0, 0, 1, 1], [], []>} : vector<18x128xf32>, vector<128x32xf32>, vector<18x32xf32> -> vector<18x32xf32>
    %c639 = arith.constant 639 : index
    %c0_132 = arith.constant 0 : index
    %357 = vector.load %arg1[%c639, %c0_132] : memref<1041x32xf32, #tpu.memory_space<vmem>>, vector<1x32xf32>
    %358 = vector.broadcast %357 : vector<1x32xf32> to vector<18x32xf32>
    %359 = arith.addf %356, %358 : vector<18x32xf32>
    %c640 = arith.constant 640 : index
    %c0_133 = arith.constant 0 : index
    %360 = vector.load %arg1[%c640, %c0_133] : memref<1041x32xf32, #tpu.memory_space<vmem>>, vector<32x32xf32>
    %cst_134 = arith.constant dense<0.000000e+00> : vector<18x32xf32>
    %361 = tpu.matmul %359, %360, %cst_134 {dimension_numbers = #tpu.dot_dimension_numbers<[1], [0], [0], [1], [0, 0, 1, 1], [], []>} : vector<18x32xf32>, vector<32x32xf32>, vector<18x32xf32> -> vector<18x32xf32>
    %c672 = arith.constant 672 : index
    %c0_135 = arith.constant 0 : index
    %362 = vector.load %arg1[%c672, %c0_135] : memref<1041x32xf32, #tpu.memory_space<vmem>>, vector<1x32xf32>
    %363 = vector.broadcast %362 : vector<1x32xf32> to vector<18x32xf32>
    %364 = arith.addf %361, %363 : vector<18x32xf32>
    %cst_136 = arith.constant 0.000000e+00 : f32
    %365 = vector.broadcast %cst_136 : f32 to vector<18x32xf32>
    %366 = arith.subf %365, %364 : vector<18x32xf32>
    %367 = math.exp %366 : vector<18x32xf32>
    %cst_137 = arith.constant 1.000000e+00 : f32
    %368 = vector.broadcast %cst_137 : f32 to vector<18x32xf32>
    %369 = arith.addf %368, %367 : vector<18x32xf32>
    %cst_138 = arith.constant 1.000000e+00 : f32
    %370 = vector.broadcast %cst_138 : f32 to vector<18x32xf32>
    %371 = arith.divf %370, %369 : vector<18x32xf32>
    %c673 = arith.constant 673 : index
    %c0_139 = arith.constant 0 : index
    %372 = vector.load %arg1[%c673, %c0_139] : memref<1041x32xf32, #tpu.memory_space<vmem>>, vector<32x32xf32>
    %cst_140 = arith.constant dense<0.000000e+00> : vector<18x32xf32>
    %373 = tpu.matmul %359, %372, %cst_140 {dimension_numbers = #tpu.dot_dimension_numbers<[1], [0], [0], [1], [0, 0, 1, 1], [], []>} : vector<18x32xf32>, vector<32x32xf32>, vector<18x32xf32> -> vector<18x32xf32>
    %c705 = arith.constant 705 : index
    %c0_141 = arith.constant 0 : index
    %374 = vector.load %arg1[%c705, %c0_141] : memref<1041x32xf32, #tpu.memory_space<vmem>>, vector<1x32xf32>
    %375 = vector.broadcast %374 : vector<1x32xf32> to vector<18x32xf32>
    %376 = arith.addf %373, %375 : vector<18x32xf32>
    %377 = arith.mulf %371, %376 : vector<18x32xf32>
    %378 = arith.addf %341, %377 : vector<18x32xf32>
    %c706 = arith.constant 706 : index
    %c0_142 = arith.constant 0 : index
    %379 = vector.load %arg1[%c706, %c0_142] : memref<1041x32xf32, #tpu.memory_space<vmem>>, vector<1x32xf32>
    %c707 = arith.constant 707 : index
    %c0_143 = arith.constant 0 : index
    %380 = vector.load %arg1[%c707, %c0_143] : memref<1041x32xf32, #tpu.memory_space<vmem>>, vector<1x32xf32>
    %cst_144 = arith.constant dense<0.000000e+00> : vector<18xf32>
    %381 = vector.multi_reduction <add>, %378, %cst_144 [1] : vector<18x32xf32> to vector<18xf32>
    %382 = vector.shape_cast %381 : vector<18xf32> to vector<18x1xf32>
    %cst_145 = arith.constant 3.200000e+01 : f32
    %383 = vector.broadcast %cst_145 : f32 to vector<18x1xf32>
    %384 = arith.divf %382, %383 : vector<18x1xf32>
    %385 = vector.broadcast %384 : vector<18x1xf32> to vector<18x32xf32>
    %386 = arith.subf %378, %385 : vector<18x32xf32>
    %387 = arith.mulf %386, %386 : vector<18x32xf32>
    %cst_146 = arith.constant dense<0.000000e+00> : vector<18xf32>
    %388 = vector.multi_reduction <add>, %387, %cst_146 [1] : vector<18x32xf32> to vector<18xf32>
    %389 = vector.shape_cast %388 : vector<18xf32> to vector<18x1xf32>
    %cst_147 = arith.constant 3.200000e+01 : f32
    %390 = vector.broadcast %cst_147 : f32 to vector<18x1xf32>
    %391 = arith.divf %389, %390 : vector<18x1xf32>
    %392 = vector.broadcast %384 : vector<18x1xf32> to vector<18x32xf32>
    %393 = arith.subf %378, %392 : vector<18x32xf32>
    %cst_148 = arith.constant 9.99999974E-6 : f32
    %394 = vector.broadcast %cst_148 : f32 to vector<18x1xf32>
    %395 = arith.addf %391, %394 : vector<18x1xf32>
    %396 = math.rsqrt %395 : vector<18x1xf32>
    %397 = vector.broadcast %396 : vector<18x1xf32> to vector<18x32xf32>
    %398 = arith.mulf %393, %397 : vector<18x32xf32>
    %399 = vector.broadcast %379 : vector<1x32xf32> to vector<18x32xf32>
    %400 = arith.mulf %398, %399 : vector<18x32xf32>
    %401 = vector.broadcast %380 : vector<1x32xf32> to vector<18x32xf32>
    %402 = arith.addf %400, %401 : vector<18x32xf32>
    %c708 = arith.constant 708 : index
    %c0_149 = arith.constant 0 : index
    %403 = vector.load %arg1[%c708, %c0_149] : memref<1041x32xf32, #tpu.memory_space<vmem>>, vector<32x32xf32>
    %c740 = arith.constant 740 : index
    %c0_150 = arith.constant 0 : index
    %404 = vector.load %arg1[%c740, %c0_150] : memref<1041x32xf32, #tpu.memory_space<vmem>>, vector<1x32xf32>
    %c741 = arith.constant 741 : index
    %c0_151 = arith.constant 0 : index
    %405 = vector.load %arg1[%c741, %c0_151] : memref<1041x32xf32, #tpu.memory_space<vmem>>, vector<32x32xf32>
    %c773 = arith.constant 773 : index
    %c0_152 = arith.constant 0 : index
    %406 = vector.load %arg1[%c773, %c0_152] : memref<1041x32xf32, #tpu.memory_space<vmem>>, vector<1x32xf32>
    %c774 = arith.constant 774 : index
    %c0_153 = arith.constant 0 : index
    %407 = vector.load %arg1[%c774, %c0_153] : memref<1041x32xf32, #tpu.memory_space<vmem>>, vector<32x32xf32>
    %c806 = arith.constant 806 : index
    %c0_154 = arith.constant 0 : index
    %408 = vector.load %arg1[%c806, %c0_154] : memref<1041x32xf32, #tpu.memory_space<vmem>>, vector<1x32xf32>
    %c807 = arith.constant 807 : index
    %c0_155 = arith.constant 0 : index
    %409 = vector.load %arg1[%c807, %c0_155] : memref<1041x32xf32, #tpu.memory_space<vmem>>, vector<32x32xf32>
    %c839 = arith.constant 839 : index
    %c0_156 = arith.constant 0 : index
    %410 = vector.load %arg1[%c839, %c0_156] : memref<1041x32xf32, #tpu.memory_space<vmem>>, vector<1x32xf32>
    %cst_157 = arith.constant dense<0.000000e+00> : vector<18x32xf32>
    %411 = tpu.matmul %402, %403, %cst_157 {dimension_numbers = #tpu.dot_dimension_numbers<[1], [0], [0], [1], [0, 0, 1, 1], [], []>} : vector<18x32xf32>, vector<32x32xf32>, vector<18x32xf32> -> vector<18x32xf32>
    %412 = vector.broadcast %404 : vector<1x32xf32> to vector<18x32xf32>
    %413 = arith.addf %411, %412 : vector<18x32xf32>
    %cst_158 = arith.constant dense<0.000000e+00> : vector<18x32xf32>
    %414 = tpu.matmul %402, %405, %cst_158 {dimension_numbers = #tpu.dot_dimension_numbers<[1], [0], [0], [1], [0, 0, 1, 1], [], []>} : vector<18x32xf32>, vector<32x32xf32>, vector<18x32xf32> -> vector<18x32xf32>
    %415 = vector.broadcast %406 : vector<1x32xf32> to vector<18x32xf32>
    %416 = arith.addf %414, %415 : vector<18x32xf32>
    %cst_159 = arith.constant dense<0.000000e+00> : vector<18x32xf32>
    %417 = tpu.matmul %402, %407, %cst_159 {dimension_numbers = #tpu.dot_dimension_numbers<[1], [0], [0], [1], [0, 0, 1, 1], [], []>} : vector<18x32xf32>, vector<32x32xf32>, vector<18x32xf32> -> vector<18x32xf32>
    %418 = vector.broadcast %408 : vector<1x32xf32> to vector<18x32xf32>
    %419 = arith.addf %417, %418 : vector<18x32xf32>
    %420 = vector.extract_strided_slice %413 {offsets = [0, 0], sizes = [18, 8], strides = [1, 1]} : vector<18x32xf32> to vector<18x8xf32>
    %421 = vector.extract_strided_slice %416 {offsets = [0, 0], sizes = [18, 8], strides = [1, 1]} : vector<18x32xf32> to vector<18x8xf32>
    %cst_160 = arith.constant dense<0.000000e+00> : vector<18x18xf32>
    %422 = tpu.matmul %420, %421, %cst_160 {dimension_numbers = #tpu.dot_dimension_numbers<[1], [1], [0], [0], [0, 0, 1, 0], [], []>} : vector<18x8xf32>, vector<18x8xf32>, vector<18x18xf32> -> vector<18x18xf32>
    %cst_161 = arith.constant 0.353553385 : f32
    %423 = vector.broadcast %cst_161 : f32 to vector<18x18xf32>
    %424 = arith.mulf %422, %423 : vector<18x18xf32>
    %425 = arith.addf %424, %214 : vector<18x18xf32>
    %cst_162 = arith.constant dense<0xFF800000> : vector<18xf32>
    %426 = vector.multi_reduction <maximumf>, %425, %cst_162 [1] : vector<18x18xf32> to vector<18xf32>
    %427 = vector.shape_cast %426 : vector<18xf32> to vector<18x1xf32>
    %428 = vector.broadcast %427 : vector<18x1xf32> to vector<18x18xf32>
    %429 = arith.subf %425, %428 : vector<18x18xf32>
    %430 = math.exp %429 : vector<18x18xf32>
    %cst_163 = arith.constant dense<0.000000e+00> : vector<18xf32>
    %431 = vector.multi_reduction <add>, %430, %cst_163 [1] : vector<18x18xf32> to vector<18xf32>
    %432 = vector.shape_cast %431 : vector<18xf32> to vector<18x1xf32>
    %433 = tpu.reciprocal %432 {approx = true} : vector<18x1xf32> -> vector<18x1xf32>
    %434 = vector.broadcast %433 : vector<18x1xf32> to vector<18x18xf32>
    %435 = arith.mulf %430, %434 : vector<18x18xf32>
    %436 = vector.extract_strided_slice %419 {offsets = [0, 0], sizes = [18, 8], strides = [1, 1]} : vector<18x32xf32> to vector<18x8xf32>
    %cst_164 = arith.constant dense<0.000000e+00> : vector<18x8xf32>
    %437 = tpu.matmul %435, %436, %cst_164 {dimension_numbers = #tpu.dot_dimension_numbers<[1], [0], [0], [1], [0, 0, 1, 1], [], []>} : vector<18x18xf32>, vector<18x8xf32>, vector<18x8xf32> -> vector<18x8xf32>
    %438 = vector.extract_strided_slice %409 {offsets = [0, 0], sizes = [8, 32], strides = [1, 1]} : vector<32x32xf32> to vector<8x32xf32>
    %cst_165 = arith.constant dense<0.000000e+00> : vector<18x32xf32>
    %439 = tpu.matmul %437, %438, %cst_165 {dimension_numbers = #tpu.dot_dimension_numbers<[1], [0], [0], [1], [0, 0, 1, 1], [], []>} : vector<18x8xf32>, vector<8x32xf32>, vector<18x32xf32> -> vector<18x32xf32>
    %440 = vector.broadcast %410 : vector<1x32xf32> to vector<18x32xf32>
    %441 = arith.addf %440, %439 : vector<18x32xf32>
    %442 = vector.extract_strided_slice %413 {offsets = [0, 8], sizes = [18, 8], strides = [1, 1]} : vector<18x32xf32> to vector<18x8xf32>
    %443 = vector.extract_strided_slice %416 {offsets = [0, 8], sizes = [18, 8], strides = [1, 1]} : vector<18x32xf32> to vector<18x8xf32>
    %cst_166 = arith.constant dense<0.000000e+00> : vector<18x18xf32>
    %444 = tpu.matmul %442, %443, %cst_166 {dimension_numbers = #tpu.dot_dimension_numbers<[1], [1], [0], [0], [0, 0, 1, 0], [], []>} : vector<18x8xf32>, vector<18x8xf32>, vector<18x18xf32> -> vector<18x18xf32>
    %cst_167 = arith.constant 0.353553385 : f32
    %445 = vector.broadcast %cst_167 : f32 to vector<18x18xf32>
    %446 = arith.mulf %444, %445 : vector<18x18xf32>
    %447 = arith.addf %446, %214 : vector<18x18xf32>
    %cst_168 = arith.constant dense<0xFF800000> : vector<18xf32>
    %448 = vector.multi_reduction <maximumf>, %447, %cst_168 [1] : vector<18x18xf32> to vector<18xf32>
    %449 = vector.shape_cast %448 : vector<18xf32> to vector<18x1xf32>
    %450 = vector.broadcast %449 : vector<18x1xf32> to vector<18x18xf32>
    %451 = arith.subf %447, %450 : vector<18x18xf32>
    %452 = math.exp %451 : vector<18x18xf32>
    %cst_169 = arith.constant dense<0.000000e+00> : vector<18xf32>
    %453 = vector.multi_reduction <add>, %452, %cst_169 [1] : vector<18x18xf32> to vector<18xf32>
    %454 = vector.shape_cast %453 : vector<18xf32> to vector<18x1xf32>
    %455 = tpu.reciprocal %454 {approx = true} : vector<18x1xf32> -> vector<18x1xf32>
    %456 = vector.broadcast %455 : vector<18x1xf32> to vector<18x18xf32>
    %457 = arith.mulf %452, %456 : vector<18x18xf32>
    %458 = vector.extract_strided_slice %419 {offsets = [0, 8], sizes = [18, 8], strides = [1, 1]} : vector<18x32xf32> to vector<18x8xf32>
    %cst_170 = arith.constant dense<0.000000e+00> : vector<18x8xf32>
    %459 = tpu.matmul %457, %458, %cst_170 {dimension_numbers = #tpu.dot_dimension_numbers<[1], [0], [0], [1], [0, 0, 1, 1], [], []>} : vector<18x18xf32>, vector<18x8xf32>, vector<18x8xf32> -> vector<18x8xf32>
    %460 = vector.extract_strided_slice %409 {offsets = [8, 0], sizes = [8, 32], strides = [1, 1]} : vector<32x32xf32> to vector<8x32xf32>
    %cst_171 = arith.constant dense<0.000000e+00> : vector<18x32xf32>
    %461 = tpu.matmul %459, %460, %cst_171 {dimension_numbers = #tpu.dot_dimension_numbers<[1], [0], [0], [1], [0, 0, 1, 1], [], []>} : vector<18x8xf32>, vector<8x32xf32>, vector<18x32xf32> -> vector<18x32xf32>
    %462 = arith.addf %441, %461 : vector<18x32xf32>
    %463 = vector.extract_strided_slice %413 {offsets = [0, 16], sizes = [18, 8], strides = [1, 1]} : vector<18x32xf32> to vector<18x8xf32>
    %464 = vector.extract_strided_slice %416 {offsets = [0, 16], sizes = [18, 8], strides = [1, 1]} : vector<18x32xf32> to vector<18x8xf32>
    %cst_172 = arith.constant dense<0.000000e+00> : vector<18x18xf32>
    %465 = tpu.matmul %463, %464, %cst_172 {dimension_numbers = #tpu.dot_dimension_numbers<[1], [1], [0], [0], [0, 0, 1, 0], [], []>} : vector<18x8xf32>, vector<18x8xf32>, vector<18x18xf32> -> vector<18x18xf32>
    %cst_173 = arith.constant 0.353553385 : f32
    %466 = vector.broadcast %cst_173 : f32 to vector<18x18xf32>
    %467 = arith.mulf %465, %466 : vector<18x18xf32>
    %468 = arith.addf %467, %214 : vector<18x18xf32>
    %cst_174 = arith.constant dense<0xFF800000> : vector<18xf32>
    %469 = vector.multi_reduction <maximumf>, %468, %cst_174 [1] : vector<18x18xf32> to vector<18xf32>
    %470 = vector.shape_cast %469 : vector<18xf32> to vector<18x1xf32>
    %471 = vector.broadcast %470 : vector<18x1xf32> to vector<18x18xf32>
    %472 = arith.subf %468, %471 : vector<18x18xf32>
    %473 = math.exp %472 : vector<18x18xf32>
    %cst_175 = arith.constant dense<0.000000e+00> : vector<18xf32>
    %474 = vector.multi_reduction <add>, %473, %cst_175 [1] : vector<18x18xf32> to vector<18xf32>
    %475 = vector.shape_cast %474 : vector<18xf32> to vector<18x1xf32>
    %476 = tpu.reciprocal %475 {approx = true} : vector<18x1xf32> -> vector<18x1xf32>
    %477 = vector.broadcast %476 : vector<18x1xf32> to vector<18x18xf32>
    %478 = arith.mulf %473, %477 : vector<18x18xf32>
    %479 = vector.extract_strided_slice %419 {offsets = [0, 16], sizes = [18, 8], strides = [1, 1]} : vector<18x32xf32> to vector<18x8xf32>
    %cst_176 = arith.constant dense<0.000000e+00> : vector<18x8xf32>
    %480 = tpu.matmul %478, %479, %cst_176 {dimension_numbers = #tpu.dot_dimension_numbers<[1], [0], [0], [1], [0, 0, 1, 1], [], []>} : vector<18x18xf32>, vector<18x8xf32>, vector<18x8xf32> -> vector<18x8xf32>
    %481 = vector.extract_strided_slice %409 {offsets = [16, 0], sizes = [8, 32], strides = [1, 1]} : vector<32x32xf32> to vector<8x32xf32>
    %cst_177 = arith.constant dense<0.000000e+00> : vector<18x32xf32>
    %482 = tpu.matmul %480, %481, %cst_177 {dimension_numbers = #tpu.dot_dimension_numbers<[1], [0], [0], [1], [0, 0, 1, 1], [], []>} : vector<18x8xf32>, vector<8x32xf32>, vector<18x32xf32> -> vector<18x32xf32>
    %483 = arith.addf %462, %482 : vector<18x32xf32>
    %484 = vector.extract_strided_slice %413 {offsets = [0, 24], sizes = [18, 8], strides = [1, 1]} : vector<18x32xf32> to vector<18x8xf32>
    %485 = vector.extract_strided_slice %416 {offsets = [0, 24], sizes = [18, 8], strides = [1, 1]} : vector<18x32xf32> to vector<18x8xf32>
    %cst_178 = arith.constant dense<0.000000e+00> : vector<18x18xf32>
    %486 = tpu.matmul %484, %485, %cst_178 {dimension_numbers = #tpu.dot_dimension_numbers<[1], [1], [0], [0], [0, 0, 1, 0], [], []>} : vector<18x8xf32>, vector<18x8xf32>, vector<18x18xf32> -> vector<18x18xf32>
    %cst_179 = arith.constant 0.353553385 : f32
    %487 = vector.broadcast %cst_179 : f32 to vector<18x18xf32>
    %488 = arith.mulf %486, %487 : vector<18x18xf32>
    %489 = arith.addf %488, %214 : vector<18x18xf32>
    %cst_180 = arith.constant dense<0xFF800000> : vector<18xf32>
    %490 = vector.multi_reduction <maximumf>, %489, %cst_180 [1] : vector<18x18xf32> to vector<18xf32>
    %491 = vector.shape_cast %490 : vector<18xf32> to vector<18x1xf32>
    %492 = vector.broadcast %491 : vector<18x1xf32> to vector<18x18xf32>
    %493 = arith.subf %489, %492 : vector<18x18xf32>
    %494 = math.exp %493 : vector<18x18xf32>
    %cst_181 = arith.constant dense<0.000000e+00> : vector<18xf32>
    %495 = vector.multi_reduction <add>, %494, %cst_181 [1] : vector<18x18xf32> to vector<18xf32>
    %496 = vector.shape_cast %495 : vector<18xf32> to vector<18x1xf32>
    %497 = tpu.reciprocal %496 {approx = true} : vector<18x1xf32> -> vector<18x1xf32>
    %498 = vector.broadcast %497 : vector<18x1xf32> to vector<18x18xf32>
    %499 = arith.mulf %494, %498 : vector<18x18xf32>
    %500 = vector.extract_strided_slice %419 {offsets = [0, 24], sizes = [18, 8], strides = [1, 1]} : vector<18x32xf32> to vector<18x8xf32>
    %cst_182 = arith.constant dense<0.000000e+00> : vector<18x8xf32>
    %501 = tpu.matmul %499, %500, %cst_182 {dimension_numbers = #tpu.dot_dimension_numbers<[1], [0], [0], [1], [0, 0, 1, 1], [], []>} : vector<18x18xf32>, vector<18x8xf32>, vector<18x8xf32> -> vector<18x8xf32>
    %502 = vector.extract_strided_slice %409 {offsets = [24, 0], sizes = [8, 32], strides = [1, 1]} : vector<32x32xf32> to vector<8x32xf32>
    %cst_183 = arith.constant dense<0.000000e+00> : vector<18x32xf32>
    %503 = tpu.matmul %501, %502, %cst_183 {dimension_numbers = #tpu.dot_dimension_numbers<[1], [0], [0], [1], [0, 0, 1, 1], [], []>} : vector<18x8xf32>, vector<8x32xf32>, vector<18x32xf32> -> vector<18x32xf32>
    %504 = arith.addf %483, %503 : vector<18x32xf32>
    %505 = arith.addf %402, %504 : vector<18x32xf32>
    %c840 = arith.constant 840 : index
    %c0_184 = arith.constant 0 : index
    %506 = vector.load %arg1[%c840, %c0_184] : memref<1041x32xf32, #tpu.memory_space<vmem>>, vector<1x32xf32>
    %c841 = arith.constant 841 : index
    %c0_185 = arith.constant 0 : index
    %507 = vector.load %arg1[%c841, %c0_185] : memref<1041x32xf32, #tpu.memory_space<vmem>>, vector<1x32xf32>
    %cst_186 = arith.constant dense<0.000000e+00> : vector<18xf32>
    %508 = vector.multi_reduction <add>, %505, %cst_186 [1] : vector<18x32xf32> to vector<18xf32>
    %509 = vector.shape_cast %508 : vector<18xf32> to vector<18x1xf32>
    %cst_187 = arith.constant 3.200000e+01 : f32
    %510 = vector.broadcast %cst_187 : f32 to vector<18x1xf32>
    %511 = arith.divf %509, %510 : vector<18x1xf32>
    %512 = vector.broadcast %511 : vector<18x1xf32> to vector<18x32xf32>
    %513 = arith.subf %505, %512 : vector<18x32xf32>
    %514 = arith.mulf %513, %513 : vector<18x32xf32>
    %cst_188 = arith.constant dense<0.000000e+00> : vector<18xf32>
    %515 = vector.multi_reduction <add>, %514, %cst_188 [1] : vector<18x32xf32> to vector<18xf32>
    %516 = vector.shape_cast %515 : vector<18xf32> to vector<18x1xf32>
    %cst_189 = arith.constant 3.200000e+01 : f32
    %517 = vector.broadcast %cst_189 : f32 to vector<18x1xf32>
    %518 = arith.divf %516, %517 : vector<18x1xf32>
    %519 = vector.broadcast %511 : vector<18x1xf32> to vector<18x32xf32>
    %520 = arith.subf %505, %519 : vector<18x32xf32>
    %cst_190 = arith.constant 9.99999974E-6 : f32
    %521 = vector.broadcast %cst_190 : f32 to vector<18x1xf32>
    %522 = arith.addf %518, %521 : vector<18x1xf32>
    %523 = math.rsqrt %522 : vector<18x1xf32>
    %524 = vector.broadcast %523 : vector<18x1xf32> to vector<18x32xf32>
    %525 = arith.mulf %520, %524 : vector<18x32xf32>
    %526 = vector.broadcast %506 : vector<1x32xf32> to vector<18x32xf32>
    %527 = arith.mulf %525, %526 : vector<18x32xf32>
    %528 = vector.broadcast %507 : vector<1x32xf32> to vector<18x32xf32>
    %529 = arith.addf %527, %528 : vector<18x32xf32>
    %c33 = arith.constant 33 : index
    %c0_191 = arith.constant 0 : index
    %530 = vector.load %arg2[%c33, %c0_191] : memref<66x128xf32, #tpu.memory_space<vmem>>, vector<32x128xf32>
    %cst_192 = arith.constant dense<0.000000e+00> : vector<18x128xf32>
    %531 = tpu.matmul %529, %530, %cst_192 {dimension_numbers = #tpu.dot_dimension_numbers<[1], [0], [0], [1], [0, 0, 1, 1], [], []>} : vector<18x32xf32>, vector<32x128xf32>, vector<18x128xf32> -> vector<18x128xf32>
    %c65_193 = arith.constant 65 : index
    %c0_194 = arith.constant 0 : index
    %532 = vector.load %arg2[%c65_193, %c0_194] : memref<66x128xf32, #tpu.memory_space<vmem>>, vector<1x128xf32>
    %533 = vector.broadcast %532 : vector<1x128xf32> to vector<18x128xf32>
    %534 = arith.addf %531, %533 : vector<18x128xf32>
    %cst_195 = arith.constant 0.000000e+00 : f32
    %535 = vector.broadcast %cst_195 : f32 to vector<18x128xf32>
    %536 = arith.cmpf ogt, %534, %535 : vector<18x128xf32>
    %cst_196 = arith.constant 0.000000e+00 : f32
    %537 = vector.broadcast %cst_196 : f32 to vector<18x128xf32>
    %538 = arith.minimumf %534, %537 : vector<18x128xf32>
    %539 = math.exp %538 : vector<18x128xf32>
    %cst_197 = arith.constant 1.000000e+00 : f32
    %540 = vector.broadcast %cst_197 : f32 to vector<18x128xf32>
    %541 = arith.subf %539, %540 : vector<18x128xf32>
    %542 = arith.select %536, %534, %541 : vector<18x128xi1>, vector<18x128xf32>
    %c842 = arith.constant 842 : index
    %c0_198 = arith.constant 0 : index
    %543 = vector.load %arg1[%c842, %c0_198] : memref<1041x32xf32, #tpu.memory_space<vmem>>, vector<128x32xf32>
    %cst_199 = arith.constant dense<0.000000e+00> : vector<18x32xf32>
    %544 = tpu.matmul %542, %543, %cst_199 {dimension_numbers = #tpu.dot_dimension_numbers<[1], [0], [0], [1], [0, 0, 1, 1], [], []>} : vector<18x128xf32>, vector<128x32xf32>, vector<18x32xf32> -> vector<18x32xf32>
    %c970 = arith.constant 970 : index
    %c0_200 = arith.constant 0 : index
    %545 = vector.load %arg1[%c970, %c0_200] : memref<1041x32xf32, #tpu.memory_space<vmem>>, vector<1x32xf32>
    %546 = vector.broadcast %545 : vector<1x32xf32> to vector<18x32xf32>
    %547 = arith.addf %544, %546 : vector<18x32xf32>
    %c971 = arith.constant 971 : index
    %c0_201 = arith.constant 0 : index
    %548 = vector.load %arg1[%c971, %c0_201] : memref<1041x32xf32, #tpu.memory_space<vmem>>, vector<32x32xf32>
    %cst_202 = arith.constant dense<0.000000e+00> : vector<18x32xf32>
    %549 = tpu.matmul %547, %548, %cst_202 {dimension_numbers = #tpu.dot_dimension_numbers<[1], [0], [0], [1], [0, 0, 1, 1], [], []>} : vector<18x32xf32>, vector<32x32xf32>, vector<18x32xf32> -> vector<18x32xf32>
    %c1003 = arith.constant 1003 : index
    %c0_203 = arith.constant 0 : index
    %550 = vector.load %arg1[%c1003, %c0_203] : memref<1041x32xf32, #tpu.memory_space<vmem>>, vector<1x32xf32>
    %551 = vector.broadcast %550 : vector<1x32xf32> to vector<18x32xf32>
    %552 = arith.addf %549, %551 : vector<18x32xf32>
    %cst_204 = arith.constant 0.000000e+00 : f32
    %553 = vector.broadcast %cst_204 : f32 to vector<18x32xf32>
    %554 = arith.subf %553, %552 : vector<18x32xf32>
    %555 = math.exp %554 : vector<18x32xf32>
    %cst_205 = arith.constant 1.000000e+00 : f32
    %556 = vector.broadcast %cst_205 : f32 to vector<18x32xf32>
    %557 = arith.addf %556, %555 : vector<18x32xf32>
    %cst_206 = arith.constant 1.000000e+00 : f32
    %558 = vector.broadcast %cst_206 : f32 to vector<18x32xf32>
    %559 = arith.divf %558, %557 : vector<18x32xf32>
    %c1004 = arith.constant 1004 : index
    %c0_207 = arith.constant 0 : index
    %560 = vector.load %arg1[%c1004, %c0_207] : memref<1041x32xf32, #tpu.memory_space<vmem>>, vector<32x32xf32>
    %cst_208 = arith.constant dense<0.000000e+00> : vector<18x32xf32>
    %561 = tpu.matmul %547, %560, %cst_208 {dimension_numbers = #tpu.dot_dimension_numbers<[1], [0], [0], [1], [0, 0, 1, 1], [], []>} : vector<18x32xf32>, vector<32x32xf32>, vector<18x32xf32> -> vector<18x32xf32>
    %c1036 = arith.constant 1036 : index
    %c0_209 = arith.constant 0 : index
    %562 = vector.load %arg1[%c1036, %c0_209] : memref<1041x32xf32, #tpu.memory_space<vmem>>, vector<1x32xf32>
    %563 = vector.broadcast %562 : vector<1x32xf32> to vector<18x32xf32>
    %564 = arith.addf %561, %563 : vector<18x32xf32>
    %565 = arith.mulf %559, %564 : vector<18x32xf32>
    %566 = arith.addf %529, %565 : vector<18x32xf32>
    %c1037 = arith.constant 1037 : index
    %c0_210 = arith.constant 0 : index
    %567 = vector.load %arg1[%c1037, %c0_210] : memref<1041x32xf32, #tpu.memory_space<vmem>>, vector<1x32xf32>
    %c1038 = arith.constant 1038 : index
    %c0_211 = arith.constant 0 : index
    %568 = vector.load %arg1[%c1038, %c0_211] : memref<1041x32xf32, #tpu.memory_space<vmem>>, vector<1x32xf32>
    %cst_212 = arith.constant dense<0.000000e+00> : vector<18xf32>
    %569 = vector.multi_reduction <add>, %566, %cst_212 [1] : vector<18x32xf32> to vector<18xf32>
    %570 = vector.shape_cast %569 : vector<18xf32> to vector<18x1xf32>
    %cst_213 = arith.constant 3.200000e+01 : f32
    %571 = vector.broadcast %cst_213 : f32 to vector<18x1xf32>
    %572 = arith.divf %570, %571 : vector<18x1xf32>
    %573 = vector.broadcast %572 : vector<18x1xf32> to vector<18x32xf32>
    %574 = arith.subf %566, %573 : vector<18x32xf32>
    %575 = arith.mulf %574, %574 : vector<18x32xf32>
    %cst_214 = arith.constant dense<0.000000e+00> : vector<18xf32>
    %576 = vector.multi_reduction <add>, %575, %cst_214 [1] : vector<18x32xf32> to vector<18xf32>
    %577 = vector.shape_cast %576 : vector<18xf32> to vector<18x1xf32>
    %cst_215 = arith.constant 3.200000e+01 : f32
    %578 = vector.broadcast %cst_215 : f32 to vector<18x1xf32>
    %579 = arith.divf %577, %578 : vector<18x1xf32>
    %580 = vector.broadcast %572 : vector<18x1xf32> to vector<18x32xf32>
    %581 = arith.subf %566, %580 : vector<18x32xf32>
    %cst_216 = arith.constant 9.99999974E-6 : f32
    %582 = vector.broadcast %cst_216 : f32 to vector<18x1xf32>
    %583 = arith.addf %579, %582 : vector<18x1xf32>
    %584 = math.rsqrt %583 : vector<18x1xf32>
    %585 = vector.broadcast %584 : vector<18x1xf32> to vector<18x32xf32>
    %586 = arith.mulf %581, %585 : vector<18x32xf32>
    %587 = vector.broadcast %567 : vector<1x32xf32> to vector<18x32xf32>
    %588 = arith.mulf %586, %587 : vector<18x32xf32>
    %589 = vector.broadcast %568 : vector<1x32xf32> to vector<18x32xf32>
    %590 = arith.addf %588, %589 : vector<18x32xf32>
    %591 = vector.extract_strided_slice %590 {offsets = [0, 0], sizes = [1, 32], strides = [1, 1]} : vector<18x32xf32> to vector<1x32xf32>
    %c0_217 = arith.constant 0 : index
    %c0_218 = arith.constant 0 : index
    %592 = vector.load %arg6[%c0_217, %c0_218] : memref<2x32xf32, #tpu.memory_space<vmem>>, vector<1x32xf32>
    tpu.vector_store %arg6[%c0_217, %c0_218], %591 {strides = array<i32>} : memref<2x32xf32, #tpu.memory_space<vmem>>, vector<1x32xf32>,
    %593 = vector.extract_strided_slice %590 {offsets = [9, 0], sizes = [1, 32], strides = [1, 1]} : vector<18x32xf32> to vector<1x32xf32>
    %c1_219 = arith.constant 1 : index
    %c0_220 = arith.constant 0 : index
    %594 = vector.load %arg6[%c1_219, %c0_220] : memref<2x32xf32, #tpu.memory_space<vmem>>, vector<1x32xf32>
    tpu.vector_store %arg6[%c1_219, %c0_220], %593 {strides = array<i32>} : memref<2x32xf32, #tpu.memory_space<vmem>>, vector<1x32xf32>,
    %c0_221 = arith.constant 0 : index
    %c0_222 = arith.constant 0 : index
    %595 = vector.load %arg6[%c0_221, %c0_222] : memref<2x32xf32, #tpu.memory_space<vmem>>, vector<2x32xf32>
    %c1039 = arith.constant 1039 : index
    %c0_223 = arith.constant 0 : index
    %596 = vector.load %arg1[%c1039, %c0_223] : memref<1041x32xf32, #tpu.memory_space<vmem>>, vector<1x32xf32>
    %cst_224 = arith.constant dense<0.000000e+00> : vector<1x2xf32>
    %597 = tpu.matmul %596, %595, %cst_224 {dimension_numbers = #tpu.dot_dimension_numbers<[1], [1], [0], [0], [0, 0, 1, 0], [], []>} : vector<1x32xf32>, vector<2x32xf32>, vector<1x2xf32> -> vector<1x2xf32>
    %c1040 = arith.constant 1040 : index
    %c0_225 = arith.constant 0 : index
    %598 = vector.load %arg1[%c1040, %c0_225] : memref<1041x32xf32, #tpu.memory_space<vmem>>, vector<1x32xf32>
    %599 = vector.extract_strided_slice %598 {offsets = [0, 0], sizes = [1, 2], strides = [1, 1]} : vector<1x32xf32> to vector<1x2xf32>
    %600 = arith.addf %597, %599 : vector<1x2xf32>
    %c0_226 = arith.constant 0 : index
    %c0_227 = arith.constant 0 : index
    %601 = vector.load %arg3[%c0_226, %c0_227] : memref<1x2xf32, #tpu.memory_space<vmem>>, vector<1x2xf32>
    tpu.vector_store %arg3[%c0_226, %c0_227], %600 {strides = array<i32>} : memref<1x2xf32, #tpu.memory_space<vmem>>, vector<1x2xf32>,
    %c20 = arith.constant 20 : index
    %c0_228 = arith.constant 0 : index
    %602 = vector.load %arg0[%c20, %c0_228] : memref<21x32xf32, #tpu.memory_space<vmem>>, vector<1x32xf32>
    %603 = vector.extract_strided_slice %602 {offsets = [0, 0], sizes = [1, 2], strides = [1, 1]} : vector<1x32xf32> to vector<1x2xf32>
    %604 = arith.subf %600, %603 : vector<1x2xf32>
    %605 = arith.mulf %604, %604 : vector<1x2xf32>
    %cst_229 = arith.constant dense<0.000000e+00> : vector<1xf32>
    %606 = vector.multi_reduction <add>, %605, %cst_229 [1] : vector<1x2xf32> to vector<1xf32>
    %607 = vector.shape_cast %606 : vector<1xf32> to vector<1x1xf32>
    %cst_230 = arith.constant 5.000000e-01 : f32
    %608 = vector.broadcast %cst_230 : f32 to vector<1x1xf32>
    %609 = arith.mulf %607, %608 : vector<1x1xf32>
    %c0_231 = arith.constant 0 : index
    %c0_232 = arith.constant 0 : index
    %610 = vector.load %arg4[%c0_231, %c0_232] : memref<1x1xf32, #tpu.memory_space<vmem>>, vector<1x1xf32>
    tpu.vector_store %arg4[%c0_231, %c0_232], %609 {strides = array<i32>} : memref<1x1xf32, #tpu.memory_space<vmem>>, vector<1x1xf32>,
    return
  }
}

</mosaic_0001>

<bundles_post_ra>
// kernel: forward.1
= control target key start
LH: loop header
LB: loop body
LE: loop exit
PB: predicated region body
PF: predicated region fallthrough
CT: control target
= control target key end

     0   :  { %10 = vsyncpa [#allocation5], 0  ;;  %s8384_s0 = inlined_call_operand.vmem [shape: f32[21,32], index: 0, kind: input, shape index: {}]   ;;  %s8385_s1 = inlined_call_operand.hbm [shape: f32[1041,32], index: 1, kind: input, shape index: {}]   ;;  %s8386_s2 = inlined_call_operand.vmem [shape: f32[66,128], index: 2, kind: input, shape index: {}]   ;;  %s8387_s3 = inlined_call_operand.hbm [shape: f32[1,2], index: 3, kind: output, shape index: {0}]   ;;  %s8388_s4 = inlined_call_operand.hbm [shape: f32[1,1], index: 4, kind: output, shape index: {1}]  }
   0x1   :  { %11 = vsyncpa [#allocation6], 0 }
   0x2   :  { %12 = vsyncpa [#allocation9], 0  ;;  %s7404_s15 = smov [#allocation4]   ;;  %s7332_s19 = scalar_lea.hbm %s8385_s1, 16768 }
   0x3   :  { %s20_s16 = sshll.u32 %s7404_s15, 4  ;;  %p7333_p0 = scmp.ne.s32.totalorder %s8385_s1, %s7332_s19  ;;  %s21_s16 = int_to_ptr.vmem [resolvable:$true] %s20_s16 }
   0x4   :  { %p7336_p1 = scmp.lt.u32.totalorder %s7332_s19, %s8385_s1 }
   0x6   :  { %p7338_p2 = pnand %p7336_p1, %p7333_p0 }
   0x8   :  { %7341 = shalt.err (!%p7338_p2)
}
   0x9   :  { %s7342_s24 = scalar_lea.vmem %s21_s16, 16768  ;;  %p7347_p4 = scmp.lt.s32.totalorder %s21_s16, %s21_s16 }
   0xa   :  { %p7343_p3 = scmp.ne.s32.totalorder %s21_s16, %s7342_s24  ;;  %p7348_p5 = scmp.lt.s32.totalorder %s7342_s24, %s7342_s24 }
   0xc   :  { %p7349_p6 = por %p7348_p5, %p7347_p4 }
   0xe   :  { %p7350_p7 = pnand %p7349_p6, %p7343_p3 }
  0x10   :  { %7353 = shalt.err (!%p7350_p7)
}
  0x11   :  { %s7405_s25 = smov 128   ;;  %s7406_s26 = smov 8  }
  0x12   :  { %26 = dma.hbm_to_vmem [thread:$0]  %s8385_s1, 16768, %s21_s16, [#allocation5], %s7405_s25, %s7405_s25, %s7406_s26  }
  0x13   :  { %7398 = dma.done.wait [#allocation5], 16768  }
  0x14   :  { %7399 = vsyncadd [#allocation5], 4294950528  ;;  %v7407_v0 = vmov 0.0|0.0   ;;  %vm7408_vm0 = vmmov 0   ;;  %v7409_v1 = vmov 0.0   ;;  %v7410_v2 = vmov 0  }
  0x15   :  { %6829 = vmatprep.subr.bf16.mxu0 %v7407_v0  ;;  %6097 = vmatprep.mubr.msk.f32.mxu0 %vm7408_vm0, %v7409_v1  ;;  %v55_v3 = vld [vmem:[#allocation4] sm:$0xff]  ;;  %v56_v4 = vld [vmem:[#allocation4 + $0x8] sm:$0xff]  ;;  %v57_v5 = vld [vmem:[#allocation4 + $0x10] sm:$0xff]  ;;  %vm8392_vm1 = vcmask 261120   ;;  %v46_v27 = vlaneseq  ;;  %vm8391_vm5 = vcmask 254976   ;;  %vm8390_vm8 = vcmask 253952  }
  0x16   :  { %7094 = vset.pattern.permute.xlu0 %v7410_v2  ;;  %6835 = vmatprep.subr.bf16.mxu1 %v7407_v0  ;;  %v6830_v6 = vpack.c.bf16 %v56_v4, %v55_v3  ;;  %v58_v7 = vld [vmem:[#allocation4 + $0x18] sm:$0xff]  ;;  %v7467_v13 = vld [vmem:[%s8384_s0 + $0x10] sm:$0x3]  ;;  %v145_v15 = vld [vmem:[#allocation4 + $0x41] sm:$0xff]  ;;  %vm8389_vm9 = vcmask 254977   ;;  %vm1110_vm10 = vcmask 1046528  }
  0x17   :  { %6108 = vmatprep.mubr.msk.f32.mxu1 %vm7408_vm0, %v7409_v1  ;;  %v35_v8 = vld [vmem:[%s8384_s0 + $0x12] sm:$0x3]  ;;  %v6833_v10 = vpack.c.bf16 %v58_v7, %v57_v5  ;;  %v146_v16 = vld [vmem:[#allocation4 + $0x49] sm:$0xff]  ;;  %v230_v25 = vld [vmem:[#allocation4 + $0x7a] sm:$0xff]  ;;  %v7479_v28 = vshrl.u32 %v46_v27, 7  ;;  %vm1451_vm11 = vcmask 64512  }
  0x18   :  { %v36_v9 = vadd.f32 1.0, %v35_v8  ;;  %6831 = vmatpush3.bf16.msra.mxu0 %v6830_v6  ;;  %v147_v17 = vld [vmem:[#allocation4 + $0x51] sm:$0xff]  ;;  %v6836_v18 = vpack.c.bf16 %v146_v16, %v145_v15  ;;  %v148_v19 = vld [vmem:[#allocation4 + $0x59] sm:$0xff]  ;;  %v227_v21 = vld [vmem:[#allocation4 + $0x62] sm:$0xff]  ;;  %vm1600_vm13 = vcmask 1041408   ;;  %s7412_s10 = smov 120  }
  0x19   :  { %6832 = vmatprep.subr.bf16.mxu0 %v7407_v0  ;;  %v6839_v20 = vpack.c.bf16 %v148_v19, %v147_v17  ;;  %v228_v22 = vld [vmem:[#allocation4 + $0x6a] sm:$0xff]  ;;  %v229_v24 = vld [vmem:[#allocation4 + $0x72] sm:$0xff]  ;;  %v48_v29 = vsub.s32 1, %v7479_v28  ;;  %v52_v30 = vsub.s32 0, %v7479_v28  ;;  %v39_v31 = vld [vmem:[#allocation4 + $0xa7] sm:$0x3] }
  0x1a   :  { %v37_v11 = vmul.f32 0.5, %v36_v9  ;;  %6837 = vmatpush3.bf16.msra.mxu1 %v6836_v18  ;;  %v6842_v23 = vpack.c.bf16 %v228_v22, %v227_v21  ;;  %v6845_v26 = vpack.c.bf16 %v230_v25, %v229_v24  ;;  %v5573_v37 = vld [vmem:[#allocation4 + $0x40] ss:$0 sm:$0xff]  ;;  %v315_v43 = vld [vmem:[#allocation4 + $0x83] sm:$0xff]  ;;  %v316_v44 = vld [vmem:[#allocation4 + $0x8b] sm:$0xff]  ;;  %s7413_s11 = smov 112  }
  0x1b   :  { %6838 = vmatprep.subr.bf16.mxu1 %v7407_v0  ;;  %v49_v33 = vrot.slane %v39_v31, %v48_v29  ;;  %v53_v34 = vrot.slane %v39_v31, %v52_v30  ;;  %v6848_v47 = vpack.c.bf16 %v316_v44, %v315_v43  ;;  %v317_v49 = vld [vmem:[#allocation4 + $0x93] sm:$0xff]  ;;  %v318_v50 = vld [vmem:[#allocation4 + $0x9b] sm:$0xff]  ;;  %v395_v53 = vld [vmem:[#allocation4 + $0x28] sm:$0xff]  ;;  %s7414_s12 = smov 104   ;;  %s7415_s7 = smov [#allocation7]  }
  0x1c   :  { %v38_v12 = vfloor.f32 %v37_v11  ;;  %6834 = vmatpush3.bf16.msra.mxu0 %v6833_v10  ;;  %v6851_v51 = vpack.c.bf16 %v318_v50, %v317_v49  ;;  %v394_v52 = vld [vmem:[#allocation4 + $0x20] sm:$0xff]  ;;  %v502_v55 = vld [vmem:[#allocation4 + $0x150] sm:$0xff]  ;;  %v503_v56 = vld [vmem:[#allocation4 + $0x158] sm:$0xff]  ;;  %s5549_s8 = sshll.u32 %s7415_s7, 4  ;;  %s5550_s8 = int_to_ptr.vmem [resolvable:$true] %s5549_s8 }
  0x1d   :  { %6841 = vmatprep.subr.bf16.mxu0 %v7407_v0  ;;  %v5575_v54 = vld [vmem:[#allocation4 + $0x61] ss:$0 sm:$0xff]  ;;  %v6854_v58 = vpack.c.bf16 %v395_v53, %v394_v52  ;;  %v396_v61 = vld [vmem:[#allocation4 + $0x30] sm:$0xff]  ;;  %v397_v62 = vld [vmem:[#allocation4 + $0x38] sm:$0xff]  ;;  %v6860_v63 = vpack.c.bf16 %v503_v56, %v502_v55  ;;  %s7354_s9 = scalar_lea.vmem %s5550_s8, 16  ;;  %p7359_p9 = scmp.lt.s32.totalorder %s5550_s8, %s5550_s8 }
  0x1e   :  { %vm40_vm2 = vcmp.gt.f32.partialorder %v38_v12, 0.5  ;;  %6840 = vmatpush3.bf16.msra.mxu1 %v6839_v20  ;;  %v596_v3 = vld [vmem:[#allocation4 + $0xb1] sm:$0xff]  ;;  %v504_v4 = vld [vmem:[#allocation4 + $0x160] sm:$0xff]  ;;  %v505_v5 = vld [vmem:[#allocation4 + $0x168] sm:$0xff]  ;;  %v6857_v6 = vpack.c.bf16 %v397_v62, %v396_v61  ;;  %p7355_p8 = scmp.ne.s32.totalorder %s5550_s8, %s7354_s9 }
  0x1f   :  { %v41_v14 = vsel %vm40_vm2, 1, %v7410_v2  ;;  %6098 = vmatmul.mubr.msk.f32.vlgmr.msra.gmra.mrb[0].mxu0 %vm8392_vm1, %v7467_v13  ;;  %6847 = vmatprep.subr.bf16.mxu1 %v7407_v0  ;;  %v595_v2 = vld [vmem:[#allocation4 + $0xa9] sm:$0xff]  ;;  %v6863_v8 = vpack.c.bf16 %v505_v5, %v504_v4  ;;  %v597_v9 = vld [vmem:[#allocation4 + $0xb9] sm:$0xff]  ;;  %v598_v10 = vld [vmem:[#allocation4 + $0xc1] sm:$0xff] }
  0x20   :  { %43 = vperm.xlu0 %7094, %v41_v14   ;;  %6119 = vmatprep.mubr.msk.f32.mxu0 %vm7408_vm0, %v7409_v1  ;;  %v6865_v7 = vpack.c.bf16 %v596_v3, %v595_v2  ;;  %v6869_v11 = vpack.c.bf16 %v598_v10, %v597_v9  ;;  %v7503_v12 = vld [vmem:[%s8384_s0] sm:$0xff]  ;;  %v7514_v14 = vld [vmem:[%s8384_s0 + $0x8] sm:$0xff]  ;;  %v701_v18 = vld [vmem:[#allocation4 + $0xfa] sm:$0xff] }
  0x21   :  { %6843 = vmatpush3.bf16.msra.mxu0 %v6842_v23  ;;  %v699_v15 = vld [vmem:[#allocation4 + $0xea] sm:$0xff]  ;;  %v700_v16 = vld [vmem:[#allocation4 + $0xf2] sm:$0xff]  ;;  %v702_v19 = vld [vmem:[#allocation4 + $0x102] sm:$0xff] }
  0x22   :  { %6844 = vmatprep.subr.bf16.mxu0 %v7407_v0  ;;  %v6873_v17 = vpack.c.bf16 %v700_v16, %v699_v15  ;;  %v6877_v20 = vpack.c.bf16 %v702_v19, %v701_v18  ;;  %v790_v2 = vld [vmem:[#allocation4 + $0x113] sm:$0xff]  ;;  %v893_v9 = vld [vmem:[#allocation4 + $0x13c] sm:$0xff]  ;;  %v975_v16 = vld [vmem:[#allocation4 + $0xc9] sm:$0xff] }
  0x23   :  { %v891_v3 = vld [vmem:[#allocation4 + $0x12c] sm:$0xff]  ;;  %v892_v5 = vld [vmem:[#allocation4 + $0x134] sm:$0xff]  ;;  %v5591_v19 = vld [vmem:[#allocation4 + $0x10a] ss:$0 sm:$0xff] }
  0x24   :  { %vm7592_vm12 = vmpackc.low %vm1451_vm11, %vm1451_vm11 }
  0x25   :  { %6846 = vmatpush3.bf16.msra.mxu0 %v6845_v26 }
  0x26   :  { %6853 = vmatprep.subr.bf16.mxu0 %v7407_v0 }
  0x9f   :  { %v44_v32 = vpop.permute.xlu0 %43 }
  0xa0   :  { %vm45_vm3 = vcmp.eq.s32.totalorder %v44_v32, 1 }
  0xa1   :  { %v54_v35 = vsel %vm45_vm3, %v49_v33, %v53_v34 }
  0xf2   :  { %v129_v36 = vpop.f32.mrb[0].mxu0 }
  0xf3   :  { %v130_v38 = vadd.f32 %v129_v36, %v54_v35  ;;  %v6099_v39 = vpop.f32.mrb[1].mxu0 }
  0xf4   :  { %v5588_v39 = vld [vmem:[#allocation4 + $0xe9] ss:$0 sm:$0xff] }
  0xf5   :  { %v138_v40 = vadd.f32 %v5573_v37, %v130_v38 }
  0xf7   :  { %v140_v41 = vmin.f32 %v138_v40, 0.0  ;;  %vm139_vm4 = vcmp.gt.f32.partialorder %v138_v40, 0.0 }
  0xf9   :  { %v141_v42 = vmul.f32 1.442695, %v140_v41 }
  0xfb   :  { %7155 = vpow2.f32 %v141_v42 }
 0x105   :  { %v7156_v45 = vpop.eup %7155 }
 0x106   :  { %v5574_v46 = vadd.f32 -1.0, %v7156_v45 }
 0x108   :  { %v144_v48 = vsel %vm139_vm4, %v138_v40, %v5574_v46 }
 0x109   :  { %6109 = vmatmul.mubr.msk.f32.vlgmr.msra.gmra.mrb[0].mxu1 %vm8392_vm1, %v144_v48 }
 0x10a   :  { %6849 = vmatpush3.bf16.msra.mxu1 %v6848_v47  ;;  %6130 = vmatprep.mubr.msk.f32.mxu1 %vm7408_vm0, %v7409_v1 }
 0x10b   :  { %6850 = vmatprep.subr.bf16.mxu1 %v7407_v0 }
 0x10e   :  { %6852 = vmatpush3.bf16.msra.mxu1 %v6851_v51  ;;  %v5579_v51 = vld [vmem:[#allocation4 + $0xa3] ss:$0 sm:$0xff] }
 0x10f   :  { %6859 = vmatprep.subr.bf16.mxu1 %v7407_v0 }
 0x1dc   :  { %v223_v57 = vpop.f32.mrb[0].mxu1 }
 0x1dd   :  { %v224_v59 = vadd.f32 %v5575_v54, %v223_v57  ;;  %v6110_v60 = vpop.f32.mrb[1].mxu1 }
 0x1df   :  { %6120 = vmatmul.mubr.msk.f32.vlgmr.msra.gmra.mrb[2].mxu0 %vm8392_vm1, %v224_v59  ;;  %6131 = vmatmul.mubr.msk.f32.vlgmr.msra.gmra.mrb[2].mxu1 %vm8392_vm1, %v224_v59 }
 0x1e0   :  { %6855 = vmatpush3.bf16.msra.mxu0 %v6854_v58  ;;  %6141 = vmatprep.mubr.msk.f32.mxu0 %vm7408_vm0, %v7409_v1 }
 0x1e1   :  { %6856 = vmatprep.subr.bf16.mxu0 %v7407_v0  ;;  %6861 = vmatpush3.bf16.msra.mxu1 %v6860_v63  ;;  %v789_v63 = vld [vmem:[#allocation4 + $0x10b] sm:$0xff] }
 0x1e2   :  { %6862 = vmatprep.subr.bf16.mxu1 %v7407_v0  ;;  %6152 = vmatprep.mubr.msk.f32.mxu1 %vm7408_vm0, %v7409_v1  ;;  %v6881_v4 = vpack.c.bf16 %v790_v2, %v789_v63 }
 0x1e4   :  { %6858 = vmatpush3.bf16.msra.mxu0 %v6857_v6  ;;  %v6889_v6 = vpack.c.bf16 %v892_v5, %v891_v3 }
 0x1e5   :  { %6866 = vmatprep.subr.bf16.mxu0 %v6865_v7  ;;  %6864 = vmatpush3.bf16.msra.mxu1 %v6863_v8  ;;  %v792_v8 = vld [vmem:[#allocation4 + $0x123] sm:$0xff] }
 0x1e6   :  { %6874 = vmatprep.subr.bf16.mxu1 %v6873_v17 }
 0x1e7   :  { %6142 = vmatmul.mubr.msk.f32.vlgmr.msra.gmra.mrb[4].mxu0 %vm8392_vm1, %v7467_v13 }
 0x1e8   :  { %6868 = vmatpush3.bf16.msra.mxu0 %v6865_v7  ;;  %6153 = vmatmul.mubr.msk.f32.vlgmr.msra.gmra.mrb[4].mxu1 %vm8392_vm1, %v7467_v13  ;;  %v5577_v13 = vld [vmem:[#allocation4 + $0x82] ss:$0 sm:$0xff] }
 0x1e9   :  { %6870 = vmatprep.subr.bf16.mxu0 %v6869_v11  ;;  %6163 = vmatprep.mubr.msk.f32.mxu0 %vm8392_vm1, %v7503_v12  ;;  %v791_v7 = vld [vmem:[#allocation4 + $0x11b] sm:$0xff] }
 0x1ea   :  { %6876 = vmatpush3.bf16.msra.mxu1 %v6873_v17  ;;  %v6885_v10 = vpack.c.bf16 %v792_v8, %v791_v7  ;;  %v976_v17 = vld [vmem:[#allocation4 + $0xd1] sm:$0xff] }
 0x1eb   :  { %6878 = vmatprep.subr.bf16.mxu1 %v6877_v20  ;;  %v6897_v18 = vpack.c.bf16 %v976_v17, %v975_v16  ;;  %v5583_v17 = vld [vmem:[#allocation4 + $0xa5] ss:$0 sm:$0xff] }
 0x1ec   :  { %6872 = vmatpush3.bf16.msra.mxu0 %v6869_v11  ;;  %v894_v11 = vld [vmem:[#allocation4 + $0x144] sm:$0xff] }
 0x1ed   :  { %6882 = vmatprep.subr.bf16.mxu0 %v6881_v4  ;;  %v6893_v15 = vpack.c.bf16 %v894_v11, %v893_v9 }
 0x1ee   :  { %6880 = vmatpush3.bf16.msra.mxu1 %v6877_v20 }
 0x1ef   :  { %6164 = vmatmul.mubr.msk.f32.vlgmr.msra.gmra.mrb[6].mxu0 %vm8392_vm1, %v7514_v14  ;;  %6890 = vmatprep.subr.bf16.mxu1 %v6889_v6 }
 0x1f0   :  { %6884 = vmatpush3.bf16.msra.mxu0 %v6881_v4 }
 0x1f1   :  { %6886 = vmatprep.subr.bf16.mxu0 %v6885_v10 }
 0x1f4   :  { %6888 = vmatpush3.bf16.msra.mxu0 %v6885_v10 }
 0x1f5   :  { %6898 = vmatprep.subr.bf16.mxu0 %v6897_v18 }
 0x2b2   :  { %v305_v21 = vpop.f32.mrb[2].mxu0  ;;  %v390_v22 = vpop.f32.mrb[2].mxu1 }
 0x2b3   :  { %v306_v23 = vadd.f32 %v5577_v13, %v305_v21  ;;  %v6121_v24 = vpop.f32.mrb[3].mxu0  ;;  %v6132_v25 = vpop.f32.mrb[3].mxu1  ;;  %v391_v52 = vadd.f32 %v5579_v51, %v390_v22  ;;  %v977_v13 = vld [vmem:[#allocation4 + $0xd9] sm:$0xff]  ;;  %v978_v21 = vld [vmem:[#allocation4 + $0xe1] sm:$0xff] }
 0x2b4   :  { %v6901_v25 = vpack.c.bf16 %v978_v21, %v977_v13 }
 0x2b5   :  { %v309_v26 = vsub.f32 0.0, %v306_v23 }
 0x2b7   :  { %v310_v31 = vmul.f32 1.442695, %v309_v26  ;;  %v5594_v26 = vld [vmem:[#allocation4 + $0x12b] ss:$0 sm:$0xff] }
 0x2b9   :  { %7157 = vpow2.f32 %v310_v31 }
 0x2ba   :  { %v469_v32 = vpop.f32.mrb[4].mxu0 }
 0x2bb   :  { %v6143_v33 = vpop.f32.mrb[5].mxu0  ;;  %v572_v34 = vpop.f32.mrb[4].mxu1 }
 0x2bc   :  { %v6154_v35 = vpop.f32.mrb[5].mxu1  ;;  %v592_v36 = vrot.slane %v572_v34, %v48_v29  ;;  %v579_v37 = vrot.slane %v572_v34, %v52_v30  ;;  %v5581_v29 = vld [vmem:[#allocation4 + $0xa4] ss:$0 sm:$0xff] }
 0x2bd   :  { %v470_v54 = vadd.f32 %v5581_v29, %v469_v32 }
 0x2c2   :  { %v6165_v38 = vpop.f32.mrb[6].mxu0 }
 0x2c3   :  { %v7158_v40 = vpop.eup %7157  ;;  %v677_v41 = vadd.f32 %v6165_v38, %v592_v36  ;;  %v671_v42 = vpop.f32.mrb[7].mxu0 }
 0x2c4   :  { %v312_v43 = vadd.f32 1.0, %v7158_v40  ;;  %v672_v44 = vadd.f32 %v671_v42, %v579_v37 }
 0x2c5   :  { %v686_v45 = vadd.f32 %v5588_v39, %v677_v41 }
 0x2c6   :  { %7159 = vrcp.f32 %v312_v43  ;;  %v685_v46 = vadd.f32 %v5588_v39, %v672_v44 }
 0x2c7   :  { %v690_v47 = vmin.f32 %v686_v45, 0.0  ;;  %vm688_vm7 = vcmp.gt.f32.partialorder %v686_v45, 0.0 }
 0x2c8   :  { %v689_v48 = vmin.f32 %v685_v46, 0.0  ;;  %vm687_vm6 = vcmp.gt.f32.partialorder %v685_v46, 0.0 }
 0x2c9   :  { %v693_v49 = vmul.f32 1.442695, %v690_v47 }
 0x2ca   :  { %v691_v50 = vmul.f32 1.442695, %v689_v48 }
 0x2cb   :  { %7161 = vpow2.f32 %v693_v49 }
 0x2cc   :  { %7163 = vpow2.f32 %v691_v50 }
 0x2d0   :  { %v7160_v30 = vpop.eup %7159 }
 0x2d1   :  { %v473_v53 = vmul.f32 %v7160_v30, %v391_v52 }
 0x2d3   :  { %v7522_v55 = vadd.f32 %v473_v53, %v470_v54 }
 0x2d5   :  { %v7162_v56 = vpop.eup %7161  ;;  %v478_v57 = vsel %vm8391_vm5, %v7522_v55, 0.0 }
 0x2d6   :  { %v7164_v58 = vpop.eup %7163  ;;  %479 = vadd.xlane.f32.xlu0 %v478_v57  ;;  %v5590_v59 = vadd.f32 -1.0, %v7162_v56 }
 0x2d7   :  { %v5589_v60 = vadd.f32 -1.0, %v7164_v58 }
 0x2d8   :  { %v698_v62 = vsel %vm688_vm7, %v686_v45, %v5590_v59  ;;  %v5597_v45 = vld [vmem:[#allocation4 + $0x14c] ss:$0 sm:$0xff] }
 0x2d9   :  { %v697_v61 = vsel %vm687_vm6, %v685_v46, %v5589_v60  ;;  %v5600_v46 = vld [vmem:[#allocation4 + $0x14d] ss:$0 sm:$0xff] }
 0x2da   :  { %6174 = vmatprep.mubr.msk.f32.mxu1 %vm8392_vm1, %v697_v61 }
 0x2db   :  { %6175 = vmatmul.mubr.msk.f32.vlgmr.msra.gmra.mrb[6].mxu1 %vm8392_vm1, %v698_v62 }
 0x2dc   :  { %6892 = vmatpush3.bf16.msra.mxu1 %v6889_v6 }
 0x2dd   :  { %6894 = vmatprep.subr.bf16.mxu1 %v6893_v15 }
 0x2e0   :  { %6896 = vmatpush3.bf16.msra.mxu1 %v6893_v15 }
 0x2e1   :  { %6905 = vmatprep.subr.bf16.mxu1 %v7407_v0 }
 0x363   :  { %v480_v47 = vpop.xlane.xlu0 %479 }
 0x364   :  { %v482_v53 = vmul.f32 0.03125, %v480_v47 }
 0x366   :  { %v483_v58 = vsub.f32 %v7522_v55, %v482_v53 }
 0x368   :  { %v484_v61 = vmul.f32 %v483_v58, %v483_v58 }
 0x36a   :  { %v485_v62 = vsel %vm8391_vm5, %v484_v61, 0.0  ;;  %v1181_v61 = vld [vmem:[#allocation4 + $0x1c3] sm:$0xff]  ;;  %vm1556_vm5 = vcmask 146432  }
 0x3ae   :  { %v6176_v20 = vpop.f32.mrb[6].mxu1 }
 0x3af   :  { %v780_v22 = vpop.f32.mrb[7].mxu1  ;;  %v786_v24 = vadd.f32 %v6176_v20, %v5591_v19  ;;  %v5584_v20 = vld [vmem:[#allocation4 + $0xa6] ss:$0 sm:$0xff] }
 0x3b0   :  { %v781_v23 = vadd.f32 %v5591_v19, %v780_v22 }
 0x3b2   :  { %6185 = vmatprep.mubr.msk.f32.mxu0 %vm8392_vm1, %v781_v23  ;;  %6196 = vmatprep.mubr.msk.f32.mxu1 %vm8392_vm1, %v781_v23 }
 0x3b3   :  { %6186 = vmatmul.mubr.msk.f32.vlgmr.msra.gmra.mrb[8].mxu0 %vm8392_vm1, %v786_v24  ;;  %6197 = vmatmul.mubr.msk.f32.vlgmr.msra.gmra.mrb[8].mxu1 %vm8392_vm1, %v786_v24 }
 0x3b4   :  { %6900 = vmatpush3.bf16.msra.mxu0 %v6897_v18  ;;  %6207 = vmatprep.mubr.msk.f32.mxu0 %vm8392_vm1, %v7503_v12  ;;  %v1103_v18 = vld [vmem:[#allocation4 + $0x170] sm:$0xff] }
 0x3b5   :  { %6902 = vmatprep.subr.bf16.mxu0 %v6901_v25  ;;  %6218 = vmatprep.mubr.msk.f32.mxu1 %vm7408_vm0, %v7409_v1  ;;  %v1117_v13 = vrot.slane %v1103_v18, 7  ;;  %v1111_v47 = vrot.slane %v1103_v18, 1 }
 0x3b8   :  { %6904 = vmatpush3.bf16.msra.mxu0 %v6901_v25  ;;  %v1170_v25 = vld [vmem:[#allocation4 + $0x179] sm:$0xff] }
 0x3b9   :  { %6911 = vmatprep.subr.bf16.mxu0 %v7407_v0 }
 0x3bb   :  { %6208 = vmatmul.mubr.msk.f32.vlgmr.msra.gmra.mrb[10].mxu0 %vm8392_vm1, %v7514_v14 }
 0x3bc   :  { %6235 = vmatprep.mubr.msk.f32.mxu0 %vm7408_vm0, %v7409_v1 }
 0x486   :  { %v6187_v31 = vpop.f32.mrb[8].mxu0  ;;  %v6198_v32 = vpop.f32.mrb[8].mxu1 }
 0x487   :  { %v876_v33 = vadd.f32 %v6187_v31, %v5594_v26  ;;  %v870_v34 = vpop.f32.mrb[9].mxu0  ;;  %v966_v35 = vpop.f32.mrb[9].mxu1  ;;  %v972_v48 = vadd.f32 %v6198_v32, %v5597_v45  ;;  %v1175_v31 = vld [vmem:[#allocation4 + $0x19a] sm:$0xff] }
 0x488   :  { %v871_v12 = vadd.f32 %v5594_v26, %v870_v34  ;;  %v967_v51 = vadd.f32 %v5597_v45, %v966_v35  ;;  %v1171_v26 = vld [vmem:[#allocation4 + $0x181] sm:$0xff]  ;;  %v1172_v35 = vld [vmem:[#allocation4 + $0x189] sm:$0xff]  ;;  %v1104_v45 = vld [vmem:[#allocation4 + $0x178] sm:$0x1] }
 0x489   :  { %v880_v36 = vsub.f32 0.0, %v876_v33  ;;  %v6906_v32 = vpack.c.bf16 %v1171_v26, %v1170_v25  ;;  %v1176_v33 = vld [vmem:[#allocation4 + $0x1a2] sm:$0xff] }
 0x48a   :  { %v879_v37 = vsub.f32 0.0, %v871_v12  ;;  %v6912_v34 = vpack.c.bf16 %v1176_v33, %v1175_v31  ;;  %v1173_v12 = vld [vmem:[#allocation4 + $0x191] sm:$0xff]  ;;  %v5605_v33 = vld [vmem:[#allocation4 + $0x199] ss:$0 sm:$0xff] }
 0x48b   :  { %v883_v38 = vmul.f32 1.442695, %v880_v36  ;;  %6907 = vmatpush3.bf16.msra.mxu1 %v6906_v32  ;;  %v1177_v36 = vld [vmem:[#allocation4 + $0x1aa] sm:$0xff]  ;;  %v5613_v32 = vld [vmem:[#allocation4 + $0x1db] ss:$0 sm:$0xff] }
 0x48c   :  { %v881_v39 = vmul.f32 1.442695, %v879_v37  ;;  %6913 = vmatpush3.bf16.msra.mxu0 %v6912_v34  ;;  %6908 = vmatprep.subr.bf16.mxu1 %v7407_v0  ;;  %v6909_v37 = vpack.c.bf16 %v1173_v12, %v1172_v35 }
 0x48d   :  { %7165 = vpow2.f32 %v883_v38  ;;  %6914 = vmatprep.subr.bf16.mxu0 %v7407_v0  ;;  %v1178_v38 = vld [vmem:[#allocation4 + $0x1b2] sm:$0xff] }
 0x48e   :  { %7167 = vpow2.f32 %v881_v39  ;;  %v6209_v40 = vpop.f32.mrb[10].mxu0  ;;  %v6915_v39 = vpack.c.bf16 %v1178_v38, %v1177_v36 }
 0x48f   :  { %v1050_v41 = vpop.f32.mrb[11].mxu0  ;;  %v1056_v49 = vadd.f32 %v6209_v40, %v5600_v46  ;;  %6910 = vmatpush3.bf16.msra.mxu1 %v6909_v37 }
 0x490   :  { %v1051_v29 = vadd.f32 %v5600_v46, %v1050_v41  ;;  %6916 = vmatpush3.bf16.msra.mxu0 %v6915_v39  ;;  %6917 = vmatprep.subr.bf16.mxu1 %v7407_v0 }
 0x491   :  { %6923 = vmatprep.subr.bf16.mxu0 %v7407_v0 }
 0x497   :  { %v7166_v42 = vpop.eup %7165 }
 0x498   :  { %v7168_v14 = vpop.eup %7167  ;;  %v886_v43 = vadd.f32 1.0, %v7166_v42 }
 0x499   :  { %v885_v44 = vadd.f32 1.0, %v7168_v14 }
 0x49a   :  { %7169 = vrcp.f32 %v886_v43 }
 0x49b   :  { %7171 = vrcp.f32 %v885_v44 }
 0x4a4   :  { %v7170_v50 = vpop.eup %7169 }
 0x4a5   :  { %v7172_v52 = vpop.eup %7171  ;;  %v1060_v30 = vmul.f32 %v7170_v50, %v972_v48  ;;  %v5603_v48 = vld [vmem:[#allocation4 + $0x14e] ss:$0 sm:$0xff] }
 0x4a6   :  { %v1059_v54 = vmul.f32 %v7172_v52, %v967_v51  ;;  %v5604_v51 = vld [vmem:[#allocation4 + $0x14f] ss:$0 sm:$0xff] }
 0x4a7   :  { %v1062_v56 = vadd.f32 %v1060_v30, %v1056_v49  ;;  %v1112_v49 = vrot.slane %v1104_v45, 1  ;;  %v1129_v45 = vand.u32 127, %v46_v27 }
 0x4a8   :  { %v1061_v57 = vadd.f32 %v1059_v54, %v1051_v29 }
 0x4a9   :  { %v1068_v60 = vsel %vm8392_vm1, %v1062_v56, 0.0  ;;  %v1113_v30 = vsel %vm1110_vm10, %v1111_v47, %v1112_v49  ;;  %vm1156_vm15 = vcmp.ge.s32.totalorder %v1129_v45, 9  ;;  %vm1160_vm4 = vcmp.lt.s32.totalorder %v1129_v45, 18 }
 0x4aa   :  { %v1065_v59 = vsel %vm8392_vm1, %v1061_v57, 0.0  ;;  %v1127_v47 = vadd.s32 16, %v7479_v28  ;;  %vm1143_vm6 = vcmp.lt.s32.totalorder %v1129_v45, 9  ;;  %v7411_v49 = vmov -1e+30   ;;  %v1185_v45 = vld [vmem:[#allocation4 + $0x1dc] sm:$0xff] }
 0x4ab   :  { %1066 = vadd.xlane.f32.xlu1 %v1065_v59 }
 0x4af   :  { %1069 = vadd.xlane.f32.xlu1 %v1068_v60  ;;  %v1180_v60 = vld [vmem:[#allocation4 + $0x1bb] sm:$0xff] }
 0x4b3   :  { %486 = vadd.xlane.f32.xlu1 %v485_v62  ;;  %v6918_v62 = vpack.c.bf16 %v1181_v61, %v1180_v60 }
 0x538   :  { %v1067_v63 = vpop.xlane.xlu1 %1066 }
 0x539   :  { %v1071_v2 = vmul.f32 0.03125, %v1067_v63 }
 0x53b   :  { %v1073_v3 = vsub.f32 %v1061_v57, %v1071_v2  ;;  %v1182_v2 = vld [vmem:[#allocation4 + $0x1cb] sm:$0xff] }
 0x53c   :  { %v1070_v4 = vpop.xlane.xlu1 %1069 }
 0x53d   :  { %v1072_v5 = vmul.f32 0.03125, %v1070_v4  ;;  %v1075_v6 = vmul.f32 %v1073_v3, %v1073_v3 }
 0x53f   :  { %v7546_v7 = vsub.f32 %v1062_v56, %v1072_v5  ;;  %v1077_v55 = vsel %vm8392_vm1, %v1075_v6, 0.0 }
 0x540   :  { %1078 = vadd.xlane.f32.xlu1 %v1077_v55  ;;  %v487_v8 = vpop.xlane.xlu1 %486 }
 0x541   :  { %v488_v9 = vmul.f32 0.03125, %v487_v8  ;;  %v1076_v10 = vmul.f32 %v7546_v7, %v7546_v7 }
 0x543   :  { %v489_v11 = vadd.f32 1e-05, %v488_v9  ;;  %v1080_v15 = vsel %vm8392_vm1, %v1076_v10, 0.0  ;;  %v5609_v10 = vld [vmem:[#allocation4 + $0x1ba] ss:$0 sm:$0xff] }
 0x544   :  { %1081 = vadd.xlane.f32.xlu1 %v1080_v15 }
 0x545   :  { %7173 = vrsqrt.f32 %v489_v11 }
 0x54f   :  { %v7174_v16 = vpop.eup %7173 }
 0x550   :  { %v491_v19 = vmul.f32 %v7174_v16, %v483_v58 }
 0x552   :  { %v496_v21 = vmul.f32 %v5583_v17, %v491_v19 }
 0x554   :  { %v501_v22 = vadd.f32 %v5584_v20, %v496_v21 }
 0x556   :  { %v1105_v23 = vadd.f32 %v1103_v18, %v501_v22  ;;  %v1119_v24 = vadd.f32 %v1117_v13, %v501_v22 }
 0x558   :  { %1107 = vst.msk [vmem:[#allocation2] sm:$0x1] %vm8390_vm8, %v1105_v23 }
 0x559   :  { %1121 = vst.msk [vmem:[#allocation2 + $0x8] sm:$0x2] %vm8389_vm9, %v1119_v24  ;;  %vm1152_vm9 = vcmp.lt.s32.totalorder %v1127_v47, 18 }
 0x5cd   :  { %v1079_v40 = vpop.xlane.xlu1 %1078 }
 0x5ce   :  { %v1083_v41 = vmul.f32 0.03125, %v1079_v40 }
 0x5d0   :  { %v1085_v42 = vadd.f32 1e-05, %v1083_v41 }
 0x5d1   :  { %v1082_v14 = vpop.xlane.xlu1 %1081 }
 0x5d2   :  { %7175 = vrsqrt.f32 %v1085_v42  ;;  %v1084_v43 = vmul.f32 0.03125, %v1082_v14 }
 0x5d4   :  { %v1086_v44 = vadd.f32 1e-05, %v1084_v43 }
 0x5d6   :  { %7177 = vrsqrt.f32 %v1086_v44 }
 0x5dc   :  { %v7176_v46 = vpop.eup %7175 }
 0x5dd   :  { %v1089_v50 = vmul.f32 %v7176_v46, %v1073_v3  ;;  %v1183_v3 = vld [vmem:[#allocation4 + $0x1d3] sm:$0xff]  ;;  %v582_v46 = vadd.s32 8, %v7479_v28 }
 0x5de   :  { %v6921_v4 = vpack.c.bf16 %v1183_v3, %v1182_v2 }
 0x5df   :  { %v1095_v29 = vmul.f32 %v5603_v48, %v1089_v50  ;;  %vm1148_vm14 = vcmp.ge.s32.totalorder %v582_v46, 9  ;;  %vm1134_vm2 = vcmp.lt.s32.totalorder %v582_v46, 9  ;;  %v7637_v50 = vsel %vm1143_vm6, 0.0, %v7411_v49 }
 0x5e0   :  { %v7178_v52 = vpop.eup %7177  ;;  %vm1158_vm3 = vmand %vm1148_vm14, %vm1156_vm15 }
 0x5e1   :  { %v1101_v53 = vadd.f32 %v5604_v51, %v1095_v29  ;;  %v1090_v54 = vmul.f32 %v7178_v52, %v7546_v7  ;;  %vm1145_vm7 = vmand %vm1134_vm2, %vm1143_vm6 }
 0x5e2   :  { %vm1162_vm10 = vmand %vm1158_vm3, %vm1160_vm4 }
 0x5e3   :  { %v1115_v56 = vadd.f32 %v1113_v30, %v1101_v53  ;;  %v1096_v57 = vmul.f32 %v5603_v48, %v1090_v54  ;;  %vm1165_vm8 = vmor %vm1145_vm7, %vm1162_vm10 }
 0x5e5   :  { %1116 = vst.msk [vmem:[#allocation2 + $0x1] sm:$0xff] %vm8392_vm1, %v1115_v56  ;;  %v1102_v58 = vadd.f32 %v5604_v51, %v1096_v57 }
 0x5e7   :  { %v1122_v59 = vadd.f32 %v1113_v30, %v1102_v58  ;;  %v7641_v30 = vsel %vm1165_vm8, 0.0, %v7411_v49 }
 0x5e9   :  { %1123 = vst.msk [vmem:[#allocation2 + $0xa] sm:$0xff] %vm8392_vm1, %v1122_v59 }
 0x5ec   :  { %v1124_v63 = vld [vmem:[#allocation2] sm:$0xff] }
 0x5ed   :  { %6219 = vmatmul.mubr.msk.f32.vlgmr.msra.gmra.mrb[10].mxu1 %vm8392_vm1, %v1124_v63  ;;  %6236 = vmatmul.mubr.msk.f32.vlgmr.msra.gmra.mrb[12].mxu0 %vm8392_vm1, %v1124_v63 }
 0x5ee   :  { %6221 = vmatprep.mubr.msk.f32.mxu1 %vm7408_vm0, %v7409_v1  ;;  %6238 = vmatprep.mubr.msk.f32.mxu0 %vm7408_vm0, %v7409_v1 }
 0x5ef   :  { %6919 = vmatpush3.bf16.msra.mxu1 %v6918_v62 }
 0x5f0   :  { %v1125_v5 = vld [vmem:[#allocation2 + $0x8] sm:$0xff]  ;;  %6920 = vmatprep.subr.bf16.mxu1 %v7407_v0  ;;  %v1126_v6 = vld [vmem:[#allocation2 + $0x10] sm:$0x3] }
 0x5f1   :  { %6222 = vmatmul.mubr.msk.f32.gmra.mrb[12].mxu1 %vm8392_vm1, %v1125_v5  ;;  %6239 = vmatmul.mubr.msk.f32.gmra.mrb[14].mxu0 %vm8392_vm1, %v1125_v5 }
 0x5f2   :  { %6224 = vmatprep.mubr.msk.f32.mxu1 %vm7408_vm0, %v7409_v1  ;;  %6241 = vmatprep.mubr.msk.f32.mxu0 %vm7408_vm0, %v7409_v1 }
 0x5f3   :  { %6922 = vmatpush3.bf16.msra.mxu1 %v6921_v4 }
 0x5f4   :  { %6927 = vmatprep.subr.bf16.mxu1 %v7407_v0 }
 0x5f5   :  { %6225 = vmatmul.mubr.msk.f32.gmra.mrb[14].mxu1 %vm8392_vm1, %v1126_v6  ;;  %6242 = vmatmul.mubr.msk.f32.gmra.mrb[16].mxu0 %vm8392_vm1, %v1126_v6 }
 0x5f6   :  { %6252 = vmatprep.mubr.msk.f32.mxu1 %vm7408_vm0, %v7409_v1  ;;  %6267 = vmatprep.mubr.msk.f32.mxu0 %vm7408_vm0, %v7409_v1 }
 0x5f9   :  { %6253 = vmatmul.mubr.msk.f32.vlgmr.msra.gmra.mrb[16].mxu1 %vm8392_vm1, %v1124_v63 }
 0x5fa   :  { %6255 = vmatprep.mubr.msk.f32.mxu1 %vm7408_vm0, %v7409_v1 }
 0x5fd   :  { %6256 = vmatmul.mubr.msk.f32.gmra.mrb[18].mxu1 %vm8392_vm1, %v1125_v5 }
 0x5fe   :  { %6258 = vmatprep.mubr.msk.f32.mxu1 %vm7408_vm0, %v7409_v1 }
 0x601   :  { %6259 = vmatmul.mubr.msk.f32.gmra.mrb[20].mxu1 %vm8392_vm1, %v1126_v6  ;;  %vm1159_vm1 = vmand %vm1152_vm9, %vm1156_vm15  ;;  %vm1563_vm9 = vcmask 140288   ;;  %vm8397_vm15 = vcmask 254976  }
 0x602   :  { %6282 = vmatprep.mubr.msk.f32.mxu1 %vm7408_vm0, %v7409_v1  ;;  %vm1163_vm14 = vmand %vm1159_vm1, %vm1160_vm4  ;;  %vm8395_vm1 = vcmask 261120  }
 0x603   :  { %v7646_v58 = vsel %vm1163_vm14, 0.0, %v7411_v49  ;;  %vm8396_vm8 = vmmov %vm8395_vm1 }
 0x604   :  { %vm8398_vm2 = vmmov %vm8395_vm1 }
 0x605   :  { %vm8399_vm3 = vmmov %vm8395_vm1 }
 0x606   :  { %vm8400_vm4 = vmmov %vm8397_vm15 }
 0x607   :  { %vm8401_vm6 = vmmov %vm8395_vm1 }
 0x608   :  { %vm8402_vm7 = vmmov %vm8395_vm1 }
 0x609   :  { %vm8403_vm10 = vmmov %vm8395_vm1 }
 0x6c0   :  { %v1269_v7 = vpop.f32.mrb[10].mxu1  ;;  %v1353_v55 = vpop.f32.mrb[12].mxu0 }
 0x6c1   :  { %v6220_v8 = vpop.f32.mrb[11].mxu1  ;;  %v6237_v9 = vpop.f32.mrb[13].mxu0  ;;  %v1354_v16 = vadd.f32 %v5609_v10, %v1353_v55  ;;  %v7605_v38 = vadd.f32 %v5605_v33, %v1269_v7 }
 0x6c4   :  { %v1274_v11 = vpop.f32.mrb[12].mxu1  ;;  %v1358_v15 = vpop.f32.mrb[14].mxu0 }
 0x6c5   :  { %v1359_v17 = vadd.f32 %v5609_v10, %v1358_v15  ;;  %v6223_v18 = vpop.f32.mrb[13].mxu1  ;;  %v6240_v19 = vpop.f32.mrb[15].mxu0  ;;  %v7614_v14 = vadd.f32 %v5605_v33, %v1274_v11 }
 0x6c7   :  { %v6924_v13 = vpack.c.bf16 %v1359_v17, %v1354_v16  ;;  %v7596_v21 = vpack.i.bf16 %v1359_v17, %v1354_v16 }
 0x6c8   :  { %v1279_v22 = vpop.f32.mrb[14].mxu1  ;;  %v1363_v23 = vpop.f32.mrb[16].mxu0 }
 0x6c9   :  { %v6226_v24 = vpop.f32.mrb[15].mxu1  ;;  %v6243_v25 = vpop.f32.mrb[17].mxu0  ;;  %6926 = vmatpush3.bf16.xpose.msk.msra.mxu0 %vm7592_vm12, %v6924_v13  ;;  %v7601_v34 = vadd.f32 %v5609_v10, %v1363_v23  ;;  %v7625_v44 = vadd.f32 %v5605_v33, %v1279_v22 }
 0x6ca   :  { %6265 = vmatprep.subr.mxu0 %v7409_v1 }
 0x6cc   :  { %v1437_v26 = vpop.f32.mrb[16].mxu1 }
 0x6cd   :  { %v6254_v31 = vpop.f32.mrb[17].mxu1  ;;  %v1438_v12 = vadd.f32 %v5613_v32, %v1437_v26 }
 0x6d0   :  { %v1442_v35 = vpop.f32.mrb[18].mxu1 }
 0x6d1   :  { %v1443_v36 = vadd.f32 %v5613_v32, %v1442_v35  ;;  %v6257_v37 = vpop.f32.mrb[19].mxu1  ;;  %6266 = vmatpush3.xpose.msk.msra.mxu0 %vm1451_vm11, %v7601_v34 }
 0x6d2   :  { %6291 = vmatprep.subr.mxu0 %v7409_v1 }
 0x6d3   :  { %v6928_v39 = vpack.c.bf16 %v1443_v36, %v1438_v12  ;;  %v7608_v40 = vpack.i.bf16 %v1443_v36, %v1438_v12 }
 0x6d4   :  { %v1447_v41 = vpop.f32.mrb[20].mxu1  ;;  %6268 = vmatmul.mubr.msk.f32.vlgmr.msra.gmra.mrb[18].mxu0 %vm1451_vm11, %v7605_v38 }
 0x6d5   :  { %v6260_v42 = vpop.f32.mrb[21].mxu1  ;;  %6929 = vmatpush3.bf16.msra.mxu1 %v6928_v39  ;;  %6270 = vmatprep.mubr.msk.f32.mxu0 %vm7408_vm0, %v7409_v1  ;;  %v7617_v43 = vadd.f32 %v5613_v32, %v1447_v41 }
 0x6d6   :  { %6280 = vmatprep.subr.mxu1 %v7409_v1  ;;  %6292 = vmatpush3.msra.mxu0 %v1185_v45 }
 0x6d7   :  { %6934 = vmatprep.subr.bf16.mxu0 %v7407_v0 }
 0x6d8   :  { %6271 = vmatmul.mubr.msk.f32.gmra.mrb[20].mxu0 %vm1451_vm11, %v7614_v14 }
 0x6d9   :  { %6281 = vmatpush3.msk.msra.mxu1 %vm1600_vm13, %v7617_v43  ;;  %6273 = vmatprep.mubr.msk.f32.mxu0 %vm7408_vm0, %v7409_v1 }
 0x6da   :  { %6930 = vmatprep.subr.bf16.mxu1 %v7407_v0 }
 0x6dc   :  { %6274 = vmatmul.mubr.msk.f32.gmra.mrb[22].mxu0 %vm1451_vm11, %v7625_v44 }
 0x6dd   :  { %6293 = vmatprep.mubr.msk.f32.mxu0 %vm7408_vm0, %v7409_v1 }
 0x7a7   :  { %v1536_v48 = vpop.f32.mrb[18].mxu0 }
 0x7a8   :  { %v1550_v27 = vmul.f32 0.35355338, %v1536_v48  ;;  %v6269_v51 = vpop.f32.mrb[19].mxu0 }
 0x7aa   :  { %v1553_v29 = vadd.f32 %v1550_v27, %v7637_v50 }
 0x7ab   :  { %v1541_v52 = vpop.f32.mrb[20].mxu0 }
 0x7ac   :  { %v1551_v28 = vmul.f32 0.35355338, %v1541_v52  ;;  %v6272_v53 = vpop.f32.mrb[21].mxu0  ;;  %v1557_v54 = vsel %vm1556_vm5, %v1553_v29, -inf }
 0x7ad   :  { %1558 = vmax.xlane.f32.xlu1 %v1557_v54 }
 0x7ae   :  { %v1554_v56 = vadd.f32 %v1551_v28, %v7641_v30 }
 0x7af   :  { %v1546_v57 = vpop.f32.mrb[22].mxu0 }
 0x7b0   :  { %v1552_v59 = vmul.f32 0.35355338, %v1546_v57  ;;  %v6275_v60 = vpop.f32.mrb[23].mxu0  ;;  %v1560_v61 = vsel %vm1556_vm5, %v1554_v56, -inf }
 0x7b1   :  { %1561 = vmax.xlane.f32.xlu1 %v1560_v61 }
 0x7b2   :  { %v1555_v62 = vadd.f32 %v1552_v59, %v7646_v58 }
 0x7b4   :  { %v1564_v63 = vsel %vm1563_vm9, %v1555_v62, -inf }
 0x7b5   :  { %1565 = vmax.xlane.f32.xlu1 %v1564_v63 }
 0x83a   :  { %v1559_v2 = vpop.xlane.xlu1 %1558 }
 0x83b   :  { %v1567_v3 = vsub.f32 %v1553_v29, %v1559_v2 }
 0x83d   :  { %v1570_v4 = vmul.f32 1.442695, %v1567_v3 }
 0x83e   :  { %v1562_v5 = vpop.xlane.xlu1 %1561 }
 0x83f   :  { %7179 = vpow2.f32 %v1570_v4  ;;  %v1568_v6 = vsub.f32 %v1554_v56, %v1562_v5 }
 0x841   :  { %v1572_v7 = vmul.f32 1.442695, %v1568_v6 }
 0x842   :  { %v1566_v11 = vpop.xlane.xlu1 %1565 }
 0x843   :  { %7181 = vpow2.f32 %v1572_v7  ;;  %v1569_v15 = vsub.f32 %v1555_v62, %v1566_v11 }
 0x845   :  { %v1574_v16 = vmul.f32 1.442695, %v1569_v15 }
 0x847   :  { %7183 = vpow2.f32 %v1574_v16 }
 0x849   :  { %v7180_v55 = vpop.eup %7179 }
 0x84a   :  { %v1576_v8 = vsel %vm1556_vm5, %v7180_v55, 0.0 }
 0x84b   :  { %1577 = vadd.xlane.f32.xlu1 %v1576_v8 }
 0x84d   :  { %v7182_v9 = vpop.eup %7181 }
 0x84e   :  { %v1579_v10 = vsel %vm1556_vm5, %v7182_v9, 0.0 }
 0x84f   :  { %1580 = vadd.xlane.f32.xlu0 %v1579_v10 }
 0x851   :  { %v7184_v17 = vpop.eup %7183 }
 0x852   :  { %v1582_v18 = vsel %vm1563_vm9, %v7184_v17, 0.0 }
 0x85c   :  { %1790 = vrot.lane.b32.xlu1 %v7601_v34, %s7412_s10 }
 0x865   :  { %7096 = vrot.lane.b32.xlu0 %v7596_v21, %s7412_s10 }
 0x869   :  { %1782 = vrot.lane.b32.xlu0 %v7614_v14, %s7412_s10 }
 0x880   :  { %1583 = vadd.xlane.f32.xlu1 %v1582_v18 }
 0x891   :  { %1780 = vrot.lane.b32.xlu1 %v7605_v38, %s7412_s10 }
 0x895   :  { %1784 = vrot.lane.b32.xlu1 %v7625_v44, %s7412_s10 }
 0x8d8   :  { %v1578_v19 = vpop.xlane.xlu1 %1577 }
 0x8d9   :  { %7185 = vrcp.f32 %v1578_v19 }
 0x8dc   :  { %v1581_v13 = vpop.xlane.xlu0 %1580  ;;  %v1791_v35 = vpop.permute.xlu1 %1790 }
 0x8dd   :  { %7187 = vrcp.f32 %v1581_v13 }
 0x8e0   :  { %v7097_v22 = vpop.permute.xlu0 %7096 }
 0x8e1   :  { %v7099_v23 = vunpack.i.h.bf16 %v7097_v22  ;;  %v7098_v24 = vunpack.i.l.bf16 %v7097_v22 }
 0x8e3   :  { %v7186_v25 = vpop.eup %7185  ;;  %v6931_v26 = vpack.c.bf16 %v7099_v23, %v7098_v24 }
 0x8e4   :  { %v1588_v31 = vmul.f32 %v7186_v25, %v7180_v55  ;;  %v1783_v41 = vpop.permute.xlu0 %1782 }
 0x8e6   :  { %6283 = vmatmul.mubr.msk.f32.vlgmr.msra.gmra.mrb[22].mxu1 %vm1556_vm5, %v1588_v31 }
 0x8e7   :  { %v7188_v32 = vpop.eup %7187  ;;  %6933 = vmatpush3.bf16.xpose.msk.msra.mxu1 %vm7592_vm12, %v6931_v26  ;;  %6285 = vmatprep.mubr.msk.f32.mxu1 %vm7408_vm0, %v7409_v1 }
 0x8e8   :  { %v1589_v33 = vmul.f32 %v7188_v32, %v7182_v9  ;;  %6306 = vmatprep.subr.mxu1 %v7409_v1 }
 0x8ea   :  { %6286 = vmatmul.mubr.msk.f32.gmra.mrb[24].mxu1 %vm1556_vm5, %v1589_v33 }
 0x8eb   :  { %6288 = vmatprep.mubr.msk.f32.mxu1 %vm7408_vm0, %v7409_v1 }
 0x8ef   :  { %6307 = vmatpush3.xpose.msk.msra.mxu1 %vm1451_vm11, %v1791_v35 }
 0x8f0   :  { %6332 = vmatprep.subr.mxu1 %v7409_v1 }
 0x90d   :  { %v1584_v12 = vpop.xlane.xlu1 %1583 }
 0x90e   :  { %7189 = vrcp.f32 %v1584_v12 }
 0x911   :  { %v1781_v39 = vpop.permute.xlu1 %1780 }
 0x915   :  { %v1785_v42 = vpop.permute.xlu1 %1784 }
 0x918   :  { %v7190_v36 = vpop.eup %7189 }
 0x919   :  { %v1590_v37 = vmul.f32 %v7190_v36, %v7184_v17 }
 0x91b   :  { %6289 = vmatmul.mubr.msk.f32.gmra.mrb[26].mxu1 %vm1556_vm5, %v1590_v37 }
 0x91c   :  { %6308 = vmatprep.mubr.msk.f32.mxu1 %vm7408_vm0, %v7409_v1 }
 0x91f   :  { %6309 = vmatmul.mubr.msk.f32.vlgmr.msra.gmra.mrb[28].mxu1 %vm1451_vm11, %v1781_v39 }
 0x920   :  { %6311 = vmatprep.mubr.msk.f32.mxu1 %vm7408_vm0, %v7409_v1 }
 0x923   :  { %6312 = vmatmul.mubr.msk.f32.gmra.mrb[30].mxu1 %vm1451_vm11, %v1783_v41 }
 0x924   :  { %6314 = vmatprep.mubr.msk.f32.mxu1 %vm7408_vm0, %v7409_v1 }
 0x927   :  { %6315 = vmatmul.mubr.msk.f32.gmra.mrb[32].mxu1 %vm1451_vm11, %v1785_v42 }
 0x928   :  { %6334 = vmatprep.mubr.msk.f32.mxu1 %vm7408_vm0, %v7409_v1 }
 0x9b9   :  { %v1670_v46 = vpop.f32.mrb[22].mxu1 }
 0x9ba   :  { %v6284_v47 = vpop.f32.mrb[23].mxu1  ;;  %6294 = vmatmul.mubr.msk.f32.vlgmr.msra.gmra.mrb[24].mxu0 %vm1451_vm11, %v1670_v46 }
 0x9bb   :  { %6296 = vmatprep.mubr.msk.f32.mxu0 %vm7408_vm0, %v7409_v1 }
 0x9bd   :  { %v1675_v48 = vpop.f32.mrb[24].mxu1 }
 0x9be   :  { %v6287_v49 = vpop.f32.mrb[25].mxu1  ;;  %6297 = vmatmul.mubr.msk.f32.gmra.mrb[26].mxu0 %vm1451_vm11, %v1675_v48 }
 0x9bf   :  { %6299 = vmatprep.mubr.msk.f32.mxu0 %vm7408_vm0, %v7409_v1 }
 0x9ee   :  { %v1680_v27 = vpop.f32.mrb[26].mxu1 }
 0x9ef   :  { %v6290_v51 = vpop.f32.mrb[27].mxu1  ;;  %6300 = vmatmul.mubr.msk.f32.gmra.mrb[28].mxu0 %vm1451_vm11, %v1680_v27 }
 0x9f0   :  { %6323 = vmatprep.mubr.msk.f32.mxu0 %vm7408_vm0, %v7409_v1 }
 0x9f2   :  { %v1870_v29 = vpop.f32.mrb[28].mxu1 }
 0x9f3   :  { %v1884_v52 = vmul.f32 0.35355338, %v1870_v29  ;;  %v6310_v28 = vpop.f32.mrb[29].mxu1 }
 0x9f5   :  { %v1887_v53 = vadd.f32 %v1884_v52, %v7637_v50 }
 0x9f6   :  { %v1875_v54 = vpop.f32.mrb[30].mxu1 }
 0x9f7   :  { %v1885_v56 = vmul.f32 0.35355338, %v1875_v54  ;;  %v6313_v57 = vpop.f32.mrb[31].mxu1  ;;  %v1890_v59 = vsel %vm1556_vm5, %v1887_v53, -inf }
 0x9f8   :  { %1891 = vmax.xlane.f32.xlu0 %v1890_v59  ;;  %v1186_v59 = vld [vmem:[#allocation4 + $0x1e4] sm:$0xff] }
 0x9f9   :  { %v1888_v60 = vadd.f32 %v1885_v56, %v7641_v30  ;;  %6333 = vmatpush3.msra.mxu1 %v1186_v59 }
 0x9fa   :  { %v1880_v61 = vpop.f32.mrb[32].mxu1  ;;  %6941 = vmatprep.subr.bf16.mxu1 %v7407_v0 }
 0x9fb   :  { %v1886_v62 = vmul.f32 0.35355338, %v1880_v61  ;;  %v6316_v63 = vpop.f32.mrb[33].mxu1  ;;  %v1893_v2 = vsel %vm1556_vm5, %v1888_v60, -inf }
 0x9fc   :  { %1894 = vmax.xlane.f32.xlu1 %v1893_v2 }
 0x9fd   :  { %v1889_v3 = vadd.f32 %v1886_v62, %v7646_v58 }
 0x9ff   :  { %v1896_v4 = vsel %vm1563_vm9, %v1889_v3, -inf }
 0xa00   :  { %1897 = vmax.xlane.f32.xlu0 %v1896_v4 }
 0xa0d   :  { %7101 = vrot.lane.b32.xlu1 %v7608_v40, %s7412_s10 }
 0xa11   :  { %7106 = vrot.lane.b32.xlu1 %v7596_v21, %s7413_s11 }
 0xa85   :  { %v1892_v5 = vpop.xlane.xlu0 %1891 }
 0xa86   :  { %v1899_v6 = vsub.f32 %v1887_v53, %v1892_v5 }
 0xa88   :  { %v1902_v7 = vmul.f32 1.442695, %v1899_v6 }
 0xa89   :  { %v1895_v55 = vpop.xlane.xlu1 %1894 }
 0xa8a   :  { %7191 = vpow2.f32 %v1902_v7  ;;  %v1900_v8 = vsub.f32 %v1888_v60, %v1895_v55 }
 0xa8c   :  { %v1904_v9 = vmul.f32 1.442695, %v1900_v8 }
 0xa8d   :  { %v7707_v10 = vpop.f32.mrb[24].mxu0  ;;  %v7102_v11 = vpop.permute.xlu1 %7101 }
 0xa8e   :  { %7193 = vpow2.f32 %v1904_v9  ;;  %v7104_v15 = vunpack.i.h.bf16 %v7102_v11  ;;  %v7103_v16 = vunpack.i.l.bf16 %v7102_v11  ;;  %v6295_v17 = vpop.f32.mrb[25].mxu0  ;;  %v1898_v26 = vpop.xlane.xlu0 %1897 }
 0xa8f   :  { %v1901_v31 = vsub.f32 %v1889_v3, %v1898_v26 }
 0xa90   :  { %v6935_v18 = vpack.c.bf16 %v7104_v15, %v7103_v16 }
 0xa91   :  { %v7709_v19 = vpop.f32.mrb[26].mxu0  ;;  %v1906_v32 = vmul.f32 1.442695, %v1901_v31  ;;  %v7107_v37 = vpop.permute.xlu1 %7106  ;;  %v5630_v31 = vld [vmem:[#allocation4 + $0x1fc] ss:$0 sm:$0xff] }
 0xa92   :  { %v6298_v13 = vpop.f32.mrb[27].mxu0  ;;  %6936 = vmatpush3.bf16.msra.mxu0 %v6935_v18  ;;  %v7109_v45 = vunpack.i.h.bf16 %v7107_v37  ;;  %v7108_v46 = vunpack.i.l.bf16 %v7107_v37 }
 0xa93   :  { %6321 = vmatprep.subr.mxu0 %v7409_v1  ;;  %7195 = vpow2.f32 %v1906_v32 }
 0xa94   :  { %v7192_v22 = vpop.eup %7191  ;;  %v6938_v49 = vpack.c.bf16 %v7109_v45, %v7108_v46 }
 0xa95   :  { %v1908_v23 = vsel %vm1556_vm5, %v7192_v22, 0.0 }
 0xa96   :  { %1909 = vadd.xlane.f32.xlu0 %v1908_v23 }
 0xa98   :  { %v7194_v24 = vpop.eup %7193 }
 0xa99   :  { %v1911_v25 = vsel %vm1556_vm5, %v7194_v24, 0.0 }
 0xa9a   :  { %1912 = vadd.xlane.f32.xlu1 %v1911_v25 }
 0xa9d   :  { %v7196_v12 = vpop.eup %7195 }
 0xa9e   :  { %v1914_v36 = vsel %vm1563_vm9, %v7196_v12, 0.0 }
 0xaab   :  { %2126 = vrot.lane.b32.xlu1 %v7601_v34, %s7413_s11 }
 0xaac   :  { %1929 = vrot.lane.b32.xlu0 %v7617_v43, %s7412_s10 }
 0xaaf   :  { %2118 = vrot.lane.b32.xlu1 %v7614_v14, %s7413_s11 }
 0xac2   :  { %v7720_v33 = vpop.f32.mrb[28].mxu0 }
 0xac3   :  { %v6301_v35 = vpop.f32.mrb[29].mxu0 }
 0xacb   :  { %1915 = vadd.xlane.f32.xlu0 %v1914_v36 }
 0xae1   :  { %2116 = vrot.lane.b32.xlu0 %v7605_v38, %s7413_s11 }
 0xae5   :  { %2120 = vrot.lane.b32.xlu0 %v7625_v44, %s7413_s11 }
 0xb23   :  { %v1910_v39 = vpop.xlane.xlu0 %1909 }
 0xb24   :  { %7197 = vrcp.f32 %v1910_v39 }
 0xb27   :  { %v1913_v41 = vpop.xlane.xlu1 %1912  ;;  %v1930_v42 = vpop.permute.xlu0 %1929 }
 0xb28   :  { %7199 = vrcp.f32 %v1913_v41  ;;  %6322 = vmatpush3.msk.msra.mxu0 %vm1600_vm13, %v1930_v42  ;;  %v1778_v42 = vadd.f32 %v5630_v31, %v7709_v19 }
 0xb29   :  { %6937 = vmatprep.subr.bf16.mxu0 %v7407_v0 }
 0xb2b   :  { %v2127_v29 = vpop.permute.xlu1 %2126 }
 0xb2e   :  { %v7198_v47 = vpop.eup %7197 }
 0xb2f   :  { %v1920_v48 = vmul.f32 %v7198_v47, %v7192_v22  ;;  %v2119_v56 = vpop.permute.xlu1 %2118 }
 0xb31   :  { %6324 = vmatmul.mubr.msk.f32.vlgmr.msra.gmra.mrb[30].mxu0 %vm1556_vm5, %v1920_v48 }
 0xb32   :  { %v7200_v27 = vpop.eup %7199  ;;  %6940 = vmatpush3.bf16.xpose.msk.msra.mxu0 %vm7592_vm12, %v6938_v49  ;;  %6326 = vmatprep.mubr.msk.f32.mxu0 %vm7408_vm0, %v7409_v1 }
 0xb33   :  { %v1921_v51 = vmul.f32 %v7200_v27, %v7194_v24  ;;  %6347 = vmatprep.subr.mxu0 %v7409_v1 }
 0xb35   :  { %6327 = vmatmul.mubr.msk.f32.gmra.mrb[32].mxu0 %vm1556_vm5, %v1921_v51 }
 0xb36   :  { %6329 = vmatprep.mubr.msk.f32.mxu0 %vm7408_vm0, %v7409_v1 }
 0xb3a   :  { %6348 = vmatpush3.xpose.msk.msra.mxu0 %vm1451_vm11, %v2127_v29 }
 0xb3b   :  { %6373 = vmatprep.subr.mxu0 %v7409_v1 }
 0xb58   :  { %v1916_v52 = vpop.xlane.xlu0 %1915 }
 0xb59   :  { %7201 = vrcp.f32 %v1916_v52  ;;  %v1779_v52 = vadd.f32 %v5630_v31, %v7720_v33 }
 0xb5c   :  { %v2117_v54 = vpop.permute.xlu0 %2116 }
 0xb60   :  { %v2121_v57 = vpop.permute.xlu0 %2120 }
 0xb63   :  { %v7202_v28 = vpop.eup %7201 }
 0xb64   :  { %v1922_v53 = vmul.f32 %v7202_v28, %v7196_v12  ;;  %v1777_v12 = vadd.f32 %v5630_v31, %v7707_v10 }
 0xb66   :  { %6330 = vmatmul.mubr.msk.f32.gmra.mrb[34].mxu0 %vm1556_vm5, %v1922_v53 }
 0xb67   :  { %6349 = vmatprep.mubr.msk.f32.mxu0 %vm7408_vm0, %v7409_v1 }
 0xb6a   :  { %6350 = vmatmul.mubr.msk.f32.vlgmr.msra.gmra.mrb[36].mxu0 %vm1451_vm11, %v2117_v54 }
 0xb6b   :  { %6352 = vmatprep.mubr.msk.f32.mxu0 %vm7408_vm0, %v7409_v1 }
 0xb6e   :  { %6353 = vmatmul.mubr.msk.f32.gmra.mrb[38].mxu0 %vm1451_vm11, %v2119_v56 }
 0xb6f   :  { %6355 = vmatprep.mubr.msk.f32.mxu0 %vm7408_vm0, %v7409_v1 }
 0xb72   :  { %6356 = vmatmul.mubr.msk.f32.gmra.mrb[40].mxu0 %vm1451_vm11, %v2121_v57 }
 0xb73   :  { %6375 = vmatprep.mubr.msk.f32.mxu0 %vm7408_vm0, %v7409_v1 }
 0xc04   :  { %v2010_v60 = vpop.f32.mrb[30].mxu0 }
 0xc05   :  { %v6325_v61 = vpop.f32.mrb[31].mxu0  ;;  %6335 = vmatmul.mubr.msk.f32.vlgmr.msra.gmra.mrb[34].mxu1 %vm1451_vm11, %v2010_v60 }
 0xc06   :  { %6337 = vmatprep.mubr.msk.f32.mxu1 %vm7408_vm0, %v7409_v1 }
 0xc08   :  { %v2015_v62 = vpop.f32.mrb[32].mxu0 }
 0xc09   :  { %v6328_v63 = vpop.f32.mrb[33].mxu0  ;;  %6338 = vmatmul.mubr.msk.f32.gmra.mrb[36].mxu1 %vm1451_vm11, %v2015_v62 }
 0xc0a   :  { %6340 = vmatprep.mubr.msk.f32.mxu1 %vm7408_vm0, %v7409_v1 }
 0xc39   :  { %v2020_v2 = vpop.f32.mrb[34].mxu0 }
 0xc3a   :  { %v6331_v3 = vpop.f32.mrb[35].mxu0  ;;  %6341 = vmatmul.mubr.msk.f32.gmra.mrb[38].mxu1 %vm1451_vm11, %v2020_v2 }
 0xc3b   :  { %6364 = vmatprep.mubr.msk.f32.mxu1 %vm7408_vm0, %v7409_v1 }
 0xc3d   :  { %v2206_v4 = vpop.f32.mrb[36].mxu0 }
 0xc3e   :  { %v2220_v5 = vmul.f32 0.35355338, %v2206_v4  ;;  %v6351_v6 = vpop.f32.mrb[37].mxu0 }
 0xc40   :  { %v2223_v7 = vadd.f32 %v2220_v5, %v7637_v50 }
 0xc41   :  { %v2211_v55 = vpop.f32.mrb[38].mxu0 }
 0xc42   :  { %v2221_v8 = vmul.f32 0.35355338, %v2211_v55  ;;  %v6354_v9 = vpop.f32.mrb[39].mxu0  ;;  %v2226_v11 = vsel %vm1556_vm5, %v2223_v7, -inf }
 0xc43   :  { %2227 = vmax.xlane.f32.xlu1 %v2226_v11 }
 0xc44   :  { %v2224_v15 = vadd.f32 %v2221_v8, %v7641_v30 }
 0xc45   :  { %v2216_v16 = vpop.f32.mrb[40].mxu0 }
 0xc46   :  { %v2222_v17 = vmul.f32 0.35355338, %v2216_v16  ;;  %v6357_v18 = vpop.f32.mrb[41].mxu0  ;;  %v2229_v13 = vsel %vm1556_vm5, %v2224_v15, -inf  ;;  %v1187_v16 = vld [vmem:[#allocation4 + $0x1ec] sm:$0xff] }
 0xc47   :  { %2230 = vmax.xlane.f32.xlu0 %v2229_v13  ;;  %6374 = vmatpush3.msra.mxu0 %v1187_v16 }
 0xc48   :  { %v2225_v22 = vadd.f32 %v2222_v17, %v7646_v58  ;;  %6948 = vmatprep.subr.bf16.mxu0 %v7407_v0 }
 0xc4a   :  { %v2232_v23 = vsel %vm1563_vm9, %v2225_v22, -inf }
 0xc4b   :  { %2233 = vmax.xlane.f32.xlu0 %v2232_v23 }
 0xcd0   :  { %v2228_v24 = vpop.xlane.xlu1 %2227 }
 0xcd1   :  { %v2235_v25 = vsub.f32 %v2223_v7, %v2228_v24 }
 0xcd3   :  { %v2238_v26 = vmul.f32 1.442695, %v2235_v25 }
 0xcd4   :  { %v2231_v32 = vpop.xlane.xlu0 %2230 }
 0xcd5   :  { %7203 = vpow2.f32 %v2238_v26  ;;  %v2236_v35 = vsub.f32 %v2224_v15, %v2231_v32 }
 0xcd7   :  { %v2240_v36 = vmul.f32 1.442695, %v2236_v35 }
 0xcd8   :  { %v2099_v37 = vpop.f32.mrb[34].mxu1  ;;  %v2234_v10 = vpop.xlane.xlu0 %2233 }
 0xcd9   :  { %7205 = vpow2.f32 %v2240_v36  ;;  %v7769_v39 = vadd.f32 %v2099_v37, %v1777_v12  ;;  %v6336_v41 = vpop.f32.mrb[35].mxu1  ;;  %v2237_v19 = vsub.f32 %v2225_v22, %v2234_v10 }
 0xcdb   :  { %v2242_v29 = vmul.f32 1.442695, %v2237_v19 }
 0xcdc   :  { %v2104_v45 = vpop.f32.mrb[36].mxu1 }
 0xcdd   :  { %v7772_v46 = vadd.f32 %v2104_v45, %v1778_v42  ;;  %v6339_v47 = vpop.f32.mrb[37].mxu1  ;;  %7207 = vpow2.f32 %v2242_v29 }
 0xcdf   :  { %v7204_v48 = vpop.eup %7203 }
 0xce0   :  { %v2244_v49 = vsel %vm1556_vm5, %v7204_v48, 0.0 }
 0xce1   :  { %2245 = vadd.xlane.f32.xlu1 %v2244_v49 }
 0xce3   :  { %v7206_v27 = vpop.eup %7205 }
 0xce4   :  { %v2247_v51 = vsel %vm1556_vm5, %v7206_v27, 0.0 }
 0xce5   :  { %2248 = vadd.xlane.f32.xlu0 %v2247_v51 }
 0xcf2   :  { %2263 = vrot.lane.b32.xlu1 %v7617_v43, %s7413_s11 }
 0xcf6   :  { %7116 = vrot.lane.b32.xlu1 %v7596_v21, %s7414_s12  ;;  %v7208_v21 = vpop.eup %7207 }
 0xcf7   :  { %v2250_v56 = vsel %vm1563_vm9, %v7208_v21, 0.0 }
 0xcfb   :  { %7111 = vrot.lane.b32.xlu0 %v7608_v40, %s7413_s11 }
 0xcff   :  { %2460 = vrot.lane.b32.xlu0 %v7601_v34, %s7414_s12 }
 0xd03   :  { %2452 = vrot.lane.b32.xlu0 %v7614_v14, %s7414_s12 }
 0xd0d   :  { %v2109_v28 = vpop.f32.mrb[38].mxu1 }
 0xd0e   :  { %v7787_v53 = vadd.f32 %v2109_v28, %v1779_v52  ;;  %v6342_v54 = vpop.f32.mrb[39].mxu1 }
 0xd1a   :  { %2251 = vadd.xlane.f32.xlu1 %v2250_v56 }
 0xd2b   :  { %2450 = vrot.lane.b32.xlu1 %v7605_v38, %s7414_s12 }
 0xd2f   :  { %2454 = vrot.lane.b32.xlu1 %v7625_v44, %s7414_s12 }
 0xd6e   :  { %v2246_v34 = vpop.xlane.xlu1 %2245 }
 0xd6f   :  { %7209 = vrcp.f32 %v2246_v34 }
 0xd72   :  { %v2249_v14 = vpop.xlane.xlu0 %2248  ;;  %v2264_v57 = vpop.permute.xlu1 %2263 }
 0xd73   :  { %7211 = vrcp.f32 %v2249_v14 }
 0xd76   :  { %v7112_v33 = vpop.permute.xlu0 %7111  ;;  %v7117_v63 = vpop.permute.xlu1 %7116 }
 0xd77   :  { %v7114_v59 = vunpack.i.h.bf16 %v7112_v33  ;;  %v7113_v60 = vunpack.i.l.bf16 %v7112_v33  ;;  %v7119_v38 = vunpack.i.h.bf16 %v7117_v63  ;;  %v7118_v44 = vunpack.i.l.bf16 %v7117_v63 }
 0xd79   :  { %v6942_v61 = vpack.c.bf16 %v7114_v59, %v7113_v60  ;;  %v7210_v62 = vpop.eup %7209  ;;  %v6945_v5 = vpack.c.bf16 %v7119_v38, %v7118_v44 }
 0xd7a   :  { %v2256_v2 = vmul.f32 %v7210_v62, %v7204_v48  ;;  %v2461_v6 = vpop.permute.xlu0 %2460 }
 0xd7b   :  { %6943 = vmatpush3.bf16.msra.mxu1 %v6942_v61 }
 0xd7c   :  { %6362 = vmatprep.subr.mxu1 %v7409_v1 }
 0xd7d   :  { %v7212_v3 = vpop.eup %7211 }
 0xd7e   :  { %v2257_v4 = vmul.f32 %v7212_v3, %v7206_v27  ;;  %v2453_v11 = vpop.permute.xlu0 %2452 }
 0xd7f   :  { %6363 = vmatpush3.msk.msra.mxu1 %vm1600_vm13, %v2264_v57 }
 0xd80   :  { %6365 = vmatmul.mubr.msk.f32.vlgmr.msra.gmra.mrb[40].mxu1 %vm1556_vm5, %v2256_v2  ;;  %6944 = vmatprep.subr.bf16.mxu1 %v7407_v0 }
 0xd81   :  { %6367 = vmatprep.mubr.msk.f32.mxu1 %vm7408_vm0, %v7409_v1 }
 0xd84   :  { %6368 = vmatmul.mubr.msk.f32.gmra.mrb[42].mxu1 %vm1556_vm5, %v2257_v4 }
 0xd85   :  { %6370 = vmatprep.mubr.msk.f32.mxu1 %vm7408_vm0, %v7409_v1 }
 0xd86   :  { %6947 = vmatpush3.bf16.xpose.msk.msra.mxu1 %vm7592_vm12, %v6945_v5 }
 0xd87   :  { %6388 = vmatprep.subr.mxu1 %v7409_v1 }
 0xd8e   :  { %6389 = vmatpush3.xpose.msk.msra.mxu1 %vm1451_vm11, %v2461_v6 }
 0xd8f   :  { %6414 = vmatprep.subr.mxu1 %v7409_v1 }
 0xda7   :  { %v2252_v7 = vpop.xlane.xlu1 %2251 }
 0xda8   :  { %7213 = vrcp.f32 %v2252_v7 }
 0xdab   :  { %v2451_v9 = vpop.permute.xlu1 %2450 }
 0xdaf   :  { %v2455_v15 = vpop.permute.xlu1 %2454 }
 0xdb2   :  { %v7214_v55 = vpop.eup %7213 }
 0xdb3   :  { %v2258_v8 = vmul.f32 %v7214_v55, %v7208_v21 }
 0xdb5   :  { %6371 = vmatmul.mubr.msk.f32.gmra.mrb[44].mxu1 %vm1556_vm5, %v2258_v8 }
 0xdb6   :  { %6390 = vmatprep.mubr.msk.f32.mxu1 %vm7408_vm0, %v7409_v1 }
 0xdb9   :  { %6391 = vmatmul.mubr.msk.f32.vlgmr.msra.gmra.mrb[46].mxu1 %vm1451_vm11, %v2451_v9 }
 0xdba   :  { %6393 = vmatprep.mubr.msk.f32.mxu1 %vm7408_vm0, %v7409_v1 }
 0xdbd   :  { %6394 = vmatmul.mubr.msk.f32.gmra.mrb[48].mxu1 %vm1451_vm11, %v2453_v11 }
 0xdbe   :  { %6396 = vmatprep.mubr.msk.f32.mxu1 %vm7408_vm0, %v7409_v1 }
 0xdc1   :  { %6397 = vmatmul.mubr.msk.f32.gmra.mrb[50].mxu1 %vm1451_vm11, %v2455_v15 }
 0xdc2   :  { %6416 = vmatprep.mubr.msk.f32.mxu1 %vm7408_vm0, %v7409_v1 }
 0xe53   :  { %v2344_v17 = vpop.f32.mrb[40].mxu1 }
 0xe54   :  { %v6366_v18 = vpop.f32.mrb[41].mxu1  ;;  %6376 = vmatmul.mubr.msk.f32.vlgmr.msra.gmra.mrb[42].mxu0 %vm1451_vm11, %v2344_v17 }
 0xe55   :  { %6378 = vmatprep.mubr.msk.f32.mxu0 %vm7408_vm0, %v7409_v1 }
 0xe57   :  { %v2349_v13 = vpop.f32.mrb[42].mxu1 }
 0xe58   :  { %v6369_v22 = vpop.f32.mrb[43].mxu1  ;;  %6379 = vmatmul.mubr.msk.f32.gmra.mrb[44].mxu0 %vm1451_vm11, %v2349_v13 }
 0xe59   :  { %6381 = vmatprep.mubr.msk.f32.mxu0 %vm7408_vm0, %v7409_v1 }
 0xe88   :  { %v2354_v23 = vpop.f32.mrb[44].mxu1 }
 0xe89   :  { %v6372_v24 = vpop.f32.mrb[45].mxu1  ;;  %6382 = vmatmul.mubr.msk.f32.gmra.mrb[46].mxu0 %vm1451_vm11, %v2354_v23 }
 0xe8a   :  { %6405 = vmatprep.mubr.msk.f32.mxu0 %vm7408_vm0, %v7409_v1 }
 0xe8c   :  { %v2540_v25 = vpop.f32.mrb[46].mxu1 }
 0xe8d   :  { %v2554_v26 = vmul.f32 0.35355338, %v2540_v25  ;;  %v6392_v31 = vpop.f32.mrb[47].mxu1 }
 0xe8f   :  { %v2557_v32 = vadd.f32 %v2554_v26, %v7637_v50 }
 0xe90   :  { %v2545_v35 = vpop.f32.mrb[48].mxu1 }
 0xe91   :  { %v2555_v12 = vmul.f32 0.35355338, %v2545_v35  ;;  %v6395_v36 = vpop.f32.mrb[49].mxu1  ;;  %v2560_v37 = vsel %vm1556_vm5, %v2557_v32, -inf }
 0xe92   :  { %2561 = vmax.xlane.f32.xlu0 %v2560_v37 }
 0xe93   :  { %v2558_v41 = vadd.f32 %v2555_v12, %v7641_v30  ;;  %v7329_v12 = vld [vmem:[#allocation2] sm:$0xff] }
 0xe94   :  { %v2550_v42 = vpop.f32.mrb[50].mxu1 }
 0xe95   :  { %v2556_v45 = vmul.f32 0.35355338, %v2550_v42  ;;  %v6398_v47 = vpop.f32.mrb[51].mxu1  ;;  %v2563_v48 = vsel %vm1556_vm5, %v2558_v41, -inf }
 0xe96   :  { %2564 = vmax.xlane.f32.xlu1 %v2563_v48  ;;  %v7330_v47 = vld [vmem:[#allocation2 + $0x8] sm:$0xff] }
 0xe97   :  { %v2559_v49 = vadd.f32 %v2556_v45, %v7646_v58 }
 0xe99   :  { %v2566_v27 = vsel %vm1563_vm9, %v2559_v49, -inf }
 0xe9a   :  { %2567 = vmax.xlane.f32.xlu0 %v2566_v27 }
 0xf1f   :  { %v2562_v51 = vpop.xlane.xlu0 %2561 }
 0xf20   :  { %v2569_v10 = vsub.f32 %v2557_v32, %v2562_v51 }
 0xf22   :  { %v2572_v19 = vmul.f32 1.442695, %v2569_v10 }
 0xf23   :  { %v2565_v29 = vpop.xlane.xlu1 %2564 }
 0xf24   :  { %7215 = vpow2.f32 %v2572_v19  ;;  %v2570_v52 = vsub.f32 %v2558_v41, %v2565_v29  ;;  %v7331_v19 = vld [vmem:[#allocation2 + $0x10] sm:$0x3] }
 0xf26   :  { %v2574_v28 = vmul.f32 1.442695, %v2570_v52 }
 0xf27   :  { %v2433_v54 = vpop.f32.mrb[42].mxu0  ;;  %v2568_v21 = vpop.xlane.xlu0 %2567 }
 0xf28   :  { %7217 = vpow2.f32 %v2574_v28  ;;  %v7837_v56 = vadd.f32 %v2433_v54, %v7769_v39  ;;  %v2571_v34 = vsub.f32 %v2559_v49, %v2568_v21  ;;  %v6377_v14 = vpop.f32.mrb[43].mxu0 }
 0xf2a   :  { %v2576_v33 = vmul.f32 1.442695, %v2571_v34 }
 0xf2b   :  { %v2438_v57 = vpop.f32.mrb[44].mxu0 }
 0xf2c   :  { %7219 = vpow2.f32 %v2576_v33  ;;  %v7840_v59 = vadd.f32 %v2438_v57, %v7772_v46  ;;  %v6380_v60 = vpop.f32.mrb[45].mxu0  ;;  %v1188_v46 = vld [vmem:[#allocation4 + $0x1f4] sm:$0xff] }
 0xf2d   :  { %6415 = vmatpush3.msra.mxu1 %v1188_v46  ;;  %v2843_v46 = vld [vmem:[%s8386_s2 + $0x8] sm:$0xff] }
 0xf2e   :  { %v7216_v61 = vpop.eup %7215  ;;  %6957 = vmatprep.subr.bf16.mxu1 %v7407_v0 }
 0xf2f   :  { %v2578_v62 = vsel %vm1556_vm5, %v7216_v61, 0.0 }
 0xf30   :  { %2579 = vadd.xlane.f32.xlu0 %v2578_v62 }
 0xf32   :  { %v7218_v63 = vpop.eup %7217 }
 0xf33   :  { %v2581_v2 = vsel %vm1556_vm5, %v7218_v63, 0.0 }
 0xf34   :  { %2582 = vadd.xlane.f32.xlu1 %v2581_v2 }
 0xf36   :  { %v7220_v3 = vpop.eup %7219 }
 0xf37   :  { %v2584_v39 = vsel %vm1563_vm9, %v7220_v3, 0.0 }
 0xf38   :  { %2585 = vadd.xlane.f32.xlu0 %v2584_v39  ;;  %v2842_v39 = vld [vmem:[%s8386_s2] sm:$0xff] }
 0xf45   :  { %7121 = vrot.lane.b32.xlu1 %v7608_v40, %s7414_s12 }
 0xf4e   :  { %2597 = vrot.lane.b32.xlu0 %v7617_v43, %s7414_s12 }
 0xf5c   :  { %v2443_v38 = vpop.f32.mrb[46].mxu0 }
 0xf5d   :  { %v2449_v44 = vadd.f32 %v2443_v38, %v7787_v53  ;;  %v6383_v4 = vpop.f32.mrb[47].mxu0  ;;  %v6952_v38 = vpack.c.bf16 %v2843_v46, %v2842_v39 }
 0xf5e   :  { %v2845_v4 = vld [vmem:[%s8386_s2 + $0x18] sm:$0xff] }
 0xfbd   :  { %v2580_v5 = vpop.xlane.xlu0 %2579 }
 0xfbe   :  { %7221 = vrcp.f32 %v2580_v5 }
 0xfc1   :  { %v2583_v6 = vpop.xlane.xlu1 %2582 }
 0xfc2   :  { %7223 = vrcp.f32 %v2583_v6  ;;  %v2958_v6 = vld [vmem:[#allocation4 + $0x1ff] sm:$0xff] }
 0xfc5   :  { %v7122_v7 = vpop.permute.xlu1 %7121  ;;  %v2586_v55 = vpop.xlane.xlu0 %2585 }
 0xfc6   :  { %v7124_v8 = vunpack.i.h.bf16 %v7122_v7  ;;  %v7123_v9 = vunpack.i.l.bf16 %v7122_v7  ;;  %7225 = vrcp.f32 %v2586_v55  ;;  %v2959_v7 = vld [vmem:[#allocation4 + $0x207] sm:$0xff]  ;;  %v2960_v55 = vld [vmem:[#allocation4 + $0x20f] sm:$0xff] }
 0xfc8   :  { %v6949_v40 = vpack.c.bf16 %v7124_v8, %v7123_v9  ;;  %v7222_v11 = vpop.eup %7221  ;;  %v6958_v8 = vpack.c.bf16 %v2959_v7, %v2958_v6  ;;  %v2961_v9 = vld [vmem:[#allocation4 + $0x217] sm:$0xff] }
 0xfc9   :  { %v2590_v43 = vmul.f32 %v7222_v11, %v7216_v61  ;;  %v2598_v15 = vpop.permute.xlu0 %2597  ;;  %v2962_v11 = vld [vmem:[#allocation4 + $0x21f] sm:$0xff] }
 0xfca   :  { %6950 = vmatpush3.bf16.msra.mxu0 %v6949_v40  ;;  %v6961_v40 = vpack.c.bf16 %v2961_v9, %v2960_v55 }
 0xfcb   :  { %6403 = vmatprep.subr.mxu0 %v7409_v1 }
 0xfcc   :  { %v7224_v16 = vpop.eup %7223 }
 0xfcd   :  { %v2591_v53 = vmul.f32 %v7224_v16, %v7218_v63 }
 0xfce   :  { %6404 = vmatpush3.msk.msra.mxu0 %vm1600_vm13, %v2598_v15 }
 0xfcf   :  { %6406 = vmatmul.mubr.msk.f32.vlgmr.msra.gmra.mrb[48].mxu0 %vm1556_vm5, %v2590_v43  ;;  %6951 = vmatprep.subr.bf16.mxu0 %v7407_v0  ;;  %v2963_v43 = vld [vmem:[#allocation4 + $0x227] sm:$0xff] }
 0xfd0   :  { %6408 = vmatprep.mubr.msk.f32.mxu0 %vm7408_vm0, %v7409_v1  ;;  %v7226_v17 = vpop.eup %7225  ;;  %6953 = vmatpush3.bf16.msra.mxu0 %v6952_v38  ;;  %v6964_v15 = vpack.c.bf16 %v2963_v43, %v2962_v11 }
 0xfd1   :  { %v2592_v18 = vmul.f32 %v7226_v17, %v7220_v3  ;;  %6954 = vmatprep.subr.bf16.mxu0 %v7407_v0 }
 0xfd3   :  { %6409 = vmatmul.mubr.msk.f32.gmra.mrb[50].mxu0 %vm1556_vm5, %v2591_v53 }
 0xfd4   :  { %6411 = vmatprep.mubr.msk.f32.mxu0 %vm7408_vm0, %v7409_v1 }
 0xfd7   :  { %6412 = vmatmul.mubr.msk.f32.gmra.mrb[52].mxu0 %vm1556_vm5, %v2592_v18 }
 0xfd8   :  { %6433 = vmatprep.mubr.msk.f32.mxu0 %vm7408_vm0, %v7409_v1 }
0x10a2   :  { %v2678_v13 = vpop.f32.mrb[48].mxu0 }
0x10a3   :  { %v6407_v22 = vpop.f32.mrb[49].mxu0  ;;  %6417 = vmatmul.mubr.msk.f32.vlgmr.msra.gmra.mrb[52].mxu1 %vm1451_vm11, %v2678_v13 }
0x10a4   :  { %6419 = vmatprep.mubr.msk.f32.mxu1 %vm7408_vm0, %v7409_v1  ;;  %6959 = vmatpush3.bf16.msra.mxu1 %v6958_v8 }
0x10a5   :  { %6960 = vmatprep.subr.bf16.mxu1 %v7407_v0 }
0x10a6   :  { %v2683_v23 = vpop.f32.mrb[50].mxu0 }
0x10a7   :  { %v6410_v24 = vpop.f32.mrb[51].mxu0  ;;  %6420 = vmatmul.mubr.msk.f32.gmra.mrb[54].mxu1 %vm1451_vm11, %v2683_v23 }
0x10a8   :  { %6422 = vmatprep.mubr.msk.f32.mxu1 %vm7408_vm0, %v7409_v1  ;;  %6962 = vmatpush3.bf16.msra.mxu1 %v6961_v40 }
0x10a9   :  { %6963 = vmatprep.subr.bf16.mxu1 %v7407_v0 }
0x10aa   :  { %v2688_v25 = vpop.f32.mrb[52].mxu0 }
0x10ab   :  { %v6413_v26 = vpop.f32.mrb[53].mxu0  ;;  %6423 = vmatmul.mubr.msk.f32.gmra.mrb[56].mxu1 %vm1451_vm11, %v2688_v25 }
0x10ac   :  { %6474 = vmatprep.mubr.msk.f32.mxu1 %vm7408_vm0, %v7409_v1  ;;  %6965 = vmatpush3.bf16.msra.mxu1 %v6964_v15 }
0x10ad   :  { %6966 = vmatprep.subr.bf16.mxu1 %v7407_v0 }
0x1176   :  { %v2767_v31 = vpop.f32.mrb[52].mxu1 }
0x1177   :  { %v2781_v32 = vadd.f32 %v2767_v31, %v7837_v56  ;;  %v6418_v35 = vpop.f32.mrb[53].mxu1  ;;  %v5670_v31 = vld [vmem:[#allocation4 + $0x1fd] ss:$0 sm:$0xff] }
0x1178   :  { %v5671_v35 = vld [vmem:[#allocation4 + $0x1fe] ss:$0 sm:$0xff] }
0x1179   :  { %v2784_v36 = vadd.f32 %v7329_v12, %v2781_v32 }
0x117a   :  { %v2772_v37 = vpop.f32.mrb[54].mxu1 }
0x117b   :  { %v2782_v41 = vadd.f32 %v2772_v37, %v7840_v59  ;;  %v6421_v42 = vpop.f32.mrb[55].mxu1  ;;  %v2789_v45 = vsel %vm8395_vm1, %v2784_v36, 0.0 }
0x117c   :  { %2790 = vadd.xlane.f32.xlu1 %v2789_v45 }
0x117d   :  { %v2785_v48 = vadd.f32 %v7330_v47, %v2782_v41 }
0x117e   :  { %v2777_v49 = vpop.f32.mrb[56].mxu1 }
0x117f   :  { %v2783_v27 = vadd.f32 %v2777_v49, %v2449_v44  ;;  %v6424_v51 = vpop.f32.mrb[57].mxu1  ;;  %v2792_v10 = vsel %vm8396_vm8, %v2785_v48, 0.0  ;;  %v2844_v44 = vld [vmem:[%s8386_s2 + $0x10] sm:$0xff] }
0x1180   :  { %2793 = vadd.xlane.f32.xlu0 %v2792_v10  ;;  %v6955_v5 = vpack.c.bf16 %v2845_v4, %v2844_v44  ;;  %v2964_v51 = vld [vmem:[#allocation4 + $0x22f] sm:$0xff]  ;;  %v2965_v10 = vld [vmem:[#allocation4 + $0x237] sm:$0xff] }
0x1181   :  { %v2786_v29 = vadd.f32 %v7331_v19, %v2783_v27  ;;  %v6967_v19 = vpack.c.bf16 %v2965_v10, %v2964_v51 }
0x1182   :  { %6956 = vmatpush3.bf16.msra.mxu0 %v6955_v5 }
0x1183   :  { %v2795_v52 = vsel %vm8397_vm15, %v2786_v29, 0.0  ;;  %6981 = vmatprep.subr.bf16.mxu0 %v7407_v0  ;;  %6968 = vmatpush3.bf16.msra.mxu1 %v6967_v19  ;;  %vm8404_vm15 = vmmov %vm8398_vm2 }
0x1184   :  { %2796 = vadd.xlane.f32.xlu1 %v2795_v52  ;;  %6969 = vmatprep.subr.bf16.mxu1 %v7407_v0  ;;  %v2967_v52 = vld [vmem:[#allocation4 + $0x247] sm:$0xff] }
0x1209   :  { %v2791_v28 = vpop.xlane.xlu1 %2790 }
0x120a   :  { %v2798_v54 = vmul.f32 0.03125, %v2791_v28 }
0x120c   :  { %v2801_v21 = vsub.f32 %v2784_v36, %v2798_v54  ;;  %v2968_v54 = vld [vmem:[#allocation4 + $0x24f] sm:$0xff] }
0x120d   :  { %v2794_v56 = vpop.xlane.xlu0 %2793 }
0x120e   :  { %v2799_v34 = vmul.f32 0.03125, %v2794_v56  ;;  %v2804_v14 = vmul.f32 %v2801_v21, %v2801_v21 }
0x1210   :  { %v2802_v33 = vsub.f32 %v2785_v48, %v2799_v34  ;;  %v2807_v57 = vsel %vm8398_vm2, %v2804_v14, 0.0  ;;  %v2970_v34 = vld [vmem:[#allocation4 + $0x25f] sm:$0xff]  ;;  %v2971_v14 = vld [vmem:[#allocation4 + $0x267] sm:$0xff] }
0x1211   :  { %2808 = vadd.xlane.f32.xlu0 %v2807_v57  ;;  %v2797_v59 = vpop.xlane.xlu1 %2796  ;;  %v2972_v57 = vld [vmem:[#allocation4 + $0x26f] sm:$0xff] }
0x1212   :  { %v2800_v60 = vmul.f32 0.03125, %v2797_v59  ;;  %v2805_v61 = vmul.f32 %v2802_v33, %v2802_v33  ;;  %v2973_v59 = vld [vmem:[#allocation4 + $0x277] sm:$0xff] }
0x1214   :  { %v2803_v62 = vsub.f32 %v2786_v29, %v2800_v60  ;;  %v2810_v63 = vsel %vm8399_vm3, %v2805_v61, 0.0  ;;  %v2966_v29 = vld [vmem:[#allocation4 + $0x23f] sm:$0xff]  ;;  %v6979_v60 = vpack.c.bf16 %v2973_v59, %v2972_v57  ;;  %vm8405_vm3 = vmmov %vm8398_vm2 }
0x1215   :  { %2811 = vadd.xlane.f32.xlu1 %v2810_v63  ;;  %v6970_v28 = vpack.c.bf16 %v2967_v52, %v2966_v29  ;;  %v3059_v61 = vld [vmem:[#allocation4 + $0x280] sm:$0xff] }
0x1216   :  { %v2806_v2 = vmul.f32 %v2803_v62, %v2803_v62 }
0x1217   :  { %6971 = vmatpush3.bf16.msra.mxu1 %v6970_v28 }
0x1218   :  { %v2813_v3 = vsel %vm8400_vm4, %v2806_v2, 0.0  ;;  %6972 = vmatprep.subr.bf16.mxu1 %v7407_v0  ;;  %v5672_v2 = vld [vmem:[%s8386_s2 + $0x20] ss:$0 sm:$0xff]  ;;  %vm8406_vm4 = vmmov %vm8398_vm2 }
0x1219   :  { %2814 = vadd.xlane.f32.xlu0 %v2813_v3 }
0x129e   :  { %v2809_v16 = vpop.xlane.xlu0 %2808 }
0x129f   :  { %v2816_v53 = vmul.f32 0.03125, %v2809_v16 }
0x12a1   :  { %v2819_v17 = vadd.f32 1e-05, %v2816_v53 }
0x12a2   :  { %v2812_v18 = vpop.xlane.xlu1 %2811 }
0x12a3   :  { %7227 = vrsqrt.f32 %v2819_v17  ;;  %v2817_v13 = vmul.f32 0.03125, %v2812_v18 }
0x12a5   :  { %v2820_v22 = vadd.f32 1e-05, %v2817_v13 }
0x12a6   :  { %v2815_v23 = vpop.xlane.xlu0 %2814 }
0x12a7   :  { %7229 = vrsqrt.f32 %v2820_v22  ;;  %v2818_v24 = vmul.f32 0.03125, %v2815_v23 }
0x12a9   :  { %v2821_v25 = vadd.f32 1e-05, %v2818_v24 }
0x12ab   :  { %7231 = vrsqrt.f32 %v2821_v25  ;;  %v3061_v25 = vld [vmem:[#allocation4 + $0x290] sm:$0xff] }
0x12ad   :  { %v7228_v26 = vpop.eup %7227 }
0x12ae   :  { %v2825_v32 = vmul.f32 %v7228_v26, %v2801_v21  ;;  %v2969_v21 = vld [vmem:[#allocation4 + $0x257] sm:$0xff] }
0x12af   :  { %v6973_v56 = vpack.c.bf16 %v2969_v21, %v2968_v54  ;;  %v3062_v26 = vld [vmem:[#allocation4 + $0x298] sm:$0xff]  ;;  %v5680_v21 = vld [vmem:[#allocation4 + $0x2a0] ss:$0 sm:$0xff] }
0x12b0   :  { %v2832_v12 = vmul.f32 %v5670_v31, %v2825_v32  ;;  %v3175_v32 = vld [vmem:[#allocation4 + $0x2a1] sm:$0xff] }
0x12b1   :  { %v7230_v36 = vpop.eup %7229  ;;  %6974 = vmatpush3.bf16.msra.mxu1 %v6973_v56 }
0x12b2   :  { %v7897_v37 = vadd.f32 %v5671_v35, %v2832_v12  ;;  %v2826_v41 = vmul.f32 %v7230_v36, %v2802_v33  ;;  %6975 = vmatprep.subr.bf16.mxu1 %v7407_v0  ;;  %v6976_v33 = vpack.c.bf16 %v2971_v14, %v2970_v34  ;;  %v5679_v12 = vld [vmem:[#allocation4 + $0x27f] ss:$0 sm:$0xff] }
0x12b4   :  { %6434 = vmatmul.mubr.msk.f32.vlgmr.msra.gmra.mrb[54].mxu0 %vm8401_vm6, %v7897_v37  ;;  %v2833_v42 = vmul.f32 %v5670_v31, %v2826_v41  ;;  %vm8407_vm6 = vmmov %vm8398_vm2 }
0x12b5   :  { %v7232_v45 = vpop.eup %7231  ;;  %6436 = vmatprep.mubr.msk.f32.mxu0 %vm7408_vm0, %v7409_v1  ;;  %6977 = vmatpush3.bf16.msra.mxu1 %v6976_v33 }
0x12b6   :  { %v7903_v47 = vadd.f32 %v5671_v35, %v2833_v42  ;;  %v2827_v48 = vmul.f32 %v7232_v45, %v2803_v62  ;;  %6978 = vmatprep.subr.bf16.mxu1 %v7407_v0  ;;  %v3060_v62 = vld [vmem:[#allocation4 + $0x288] sm:$0xff] }
0x12b7   :  { %v6982_v63 = vpack.c.bf16 %v3060_v62, %v3059_v61 }
0x12b8   :  { %6437 = vmatmul.mubr.msk.f32.gmra.mrb[56].mxu0 %vm8402_vm7, %v7903_v47  ;;  %v2834_v49 = vmul.f32 %v5670_v31, %v2827_v48  ;;  %v6985_v31 = vpack.c.bf16 %v3062_v26, %v3061_v25  ;;  %v3177_v48 = vld [vmem:[#allocation4 + $0x2b1] sm:$0xff]  ;;  %vm8408_vm7 = vmmov %vm8398_vm2 }
0x12b9   :  { %6439 = vmatprep.mubr.msk.f32.mxu0 %vm7408_vm0, %v7409_v1  ;;  %6980 = vmatpush3.bf16.msra.mxu1 %v6979_v60 }
0x12ba   :  { %v7909_v27 = vadd.f32 %v5671_v35, %v2834_v49  ;;  %6999 = vmatprep.subr.bf16.mxu1 %v7407_v0  ;;  %6983 = vmatpush3.bf16.msra.mxu0 %v6982_v63  ;;  %v3176_v35 = vld [vmem:[#allocation4 + $0x2a9] sm:$0xff]  ;;  %v3178_v49 = vld [vmem:[#allocation4 + $0x2b9] sm:$0xff] }
0x12bb   :  { %6984 = vmatprep.subr.bf16.mxu0 %v7407_v0  ;;  %v6988_v41 = vpack.c.bf16 %v3176_v35, %v3175_v32  ;;  %v6991_v10 = vpack.c.bf16 %v3178_v49, %v3177_v48 }
0x12bc   :  { %6440 = vmatmul.mubr.msk.f32.gmra.mrb[58].mxu0 %vm8403_vm10, %v7909_v27  ;;  %vm8409_vm10 = vmmov %vm8398_vm2 }
0x12bd   :  { %6491 = vmatprep.mubr.msk.f32.mxu0 %vm7408_vm0, %v7409_v1 }
0x12be   :  { %6986 = vmatpush3.bf16.msra.mxu0 %v6985_v31 }
0x12bf   :  { %6987 = vmatprep.subr.bf16.mxu0 %v7407_v0 }
0x1387   :  { %v2926_v3 = vpop.f32.mrb[54].mxu0 }
0x1388   :  { %v2927_v39 = vadd.f32 %v5672_v2, %v2926_v3  ;;  %v6435_v46 = vpop.f32.mrb[55].mxu0 }
0x138a   :  { %v2943_v38 = vmin.f32 %v2927_v39, 0.0  ;;  %vm2940_vm14 = vcmp.gt.f32.partialorder %v2927_v39, 0.0 }
0x138b   :  { %v2931_v44 = vpop.f32.mrb[56].mxu0 }
0x138c   :  { %v2946_v4 = vmul.f32 1.442695, %v2943_v38  ;;  %v2932_v5 = vadd.f32 %v5672_v2, %v2931_v44  ;;  %v6438_v6 = vpop.f32.mrb[57].mxu0 }
0x138e   :  { %7233 = vpow2.f32 %v2946_v4  ;;  %v2944_v7 = vmin.f32 %v2932_v5, 0.0  ;;  %vm2941_vm1 = vcmp.gt.f32.partialorder %v2932_v5, 0.0 }
0x138f   :  { %v2936_v55 = vpop.f32.mrb[58].mxu0 }
0x1390   :  { %v2948_v8 = vmul.f32 1.442695, %v2944_v7  ;;  %v2937_v9 = vadd.f32 %v5672_v2, %v2936_v55  ;;  %v6441_v40 = vpop.f32.mrb[59].mxu0 }
0x1392   :  { %7235 = vpow2.f32 %v2948_v8  ;;  %v2945_v11 = vmin.f32 %v2937_v9, 0.0  ;;  %vm2942_vm8 = vcmp.gt.f32.partialorder %v2937_v9, 0.0 }
0x1394   :  { %v2950_v43 = vmul.f32 1.442695, %v2945_v11 }
0x1396   :  { %7237 = vpow2.f32 %v2950_v43 }
0x1398   :  { %v7234_v15 = vpop.eup %7233 }
0x1399   :  { %v5676_v16 = vadd.f32 -1.0, %v7234_v15 }
0x139b   :  { %v2955_v53 = vsel %vm2940_vm14, %v2927_v39, %v5676_v16  ;;  %v5684_v16 = vld [vmem:[#allocation4 + $0x2c1] ss:$0 sm:$0xff]  ;;  %vm8410_vm14 = vmmov %vm8398_vm2 }
0x139c   :  { %v7236_v17 = vpop.eup %7235  ;;  %6475 = vmatmul.mubr.f32.vlgmr.msra.gmra.mrb[58].mxu1 %v2955_v53 }
0x139d   :  { %6477 = vmatprep.mubr.msk.f32.mxu1 %vm7408_vm0, %v7409_v1  ;;  %v5677_v18 = vadd.f32 -1.0, %v7236_v17 }
0x139f   :  { %v2956_v13 = vsel %vm2941_vm1, %v2932_v5, %v5677_v18  ;;  %vm8411_vm1 = vcmask 254976  }
0x13a0   :  { %v7238_v22 = vpop.eup %7237  ;;  %6478 = vmatmul.mubr.f32.gmra.mrb[60].mxu1 %v2956_v13 }
0x13a1   :  { %6480 = vmatprep.mubr.msk.f32.mxu1 %vm7408_vm0, %v7409_v1  ;;  %v5678_v23 = vadd.f32 -1.0, %v7238_v22 }
0x13a3   :  { %v2957_v24 = vsel %vm2942_vm8, %v2937_v9, %v5678_v23  ;;  %vm8412_vm8 = vmmov %vm8398_vm2 }
0x13a4   :  { %6481 = vmatmul.mubr.f32.gmra.mrb[62].mxu1 %v2957_v24 }
0x13a5   :  { %6542 = vmatprep.mubr.msk.f32.mxu1 %vm7408_vm0, %v7409_v1 }
0x146f   :  { %v3045_v36 = vpop.f32.mrb[58].mxu1 }
0x1470   :  { %v3046_v42 = vadd.f32 %v5679_v12, %v3045_v36  ;;  %v6476_v45 = vpop.f32.mrb[59].mxu1 }
0x1472   :  { %6492 = vmatmul.mubr.msk.f32.vlgmr.msra.gmra.mrb[60].mxu0 %vm8404_vm15, %v3046_v42  ;;  %vm8413_vm15 = vmmov %vm8398_vm2 }
0x1473   :  { %v3050_v51 = vpop.f32.mrb[60].mxu1  ;;  %6494 = vmatprep.mubr.msk.f32.mxu0 %vm7408_vm0, %v7409_v1  ;;  %6989 = vmatpush3.bf16.msra.mxu0 %v6988_v41 }
0x1474   :  { %v3051_v19 = vadd.f32 %v5679_v12, %v3050_v51  ;;  %v6479_v29 = vpop.f32.mrb[61].mxu1  ;;  %6990 = vmatprep.subr.bf16.mxu0 %v7407_v0 }
0x1476   :  { %6495 = vmatmul.mubr.msk.f32.gmra.mrb[62].mxu0 %vm8398_vm2, %v3051_v19  ;;  %vm8414_vm2 = vmmov %vm8411_vm1 }
0x1477   :  { %v3055_v52 = vpop.f32.mrb[62].mxu1  ;;  %6497 = vmatprep.mubr.msk.f32.mxu0 %vm7408_vm0, %v7409_v1  ;;  %6992 = vmatpush3.bf16.msra.mxu0 %v6991_v10 }
0x1478   :  { %v3056_v28 = vadd.f32 %v5679_v12, %v3055_v52  ;;  %v6482_v54 = vpop.f32.mrb[63].mxu1  ;;  %6993 = vmatprep.subr.bf16.mxu0 %v7407_v0 }
0x147a   :  { %6498 = vmatmul.mubr.msk.f32.gmra.mrb[64].mxu0 %vm8405_vm3, %v3056_v28 }
0x147b   :  { %6508 = vmatprep.mubr.msk.f32.mxu0 %vm7408_vm0, %v7409_v1 }
0x147e   :  { %6509 = vmatmul.mubr.msk.f32.vlgmr.msra.gmra.mrb[66].mxu0 %vm8406_vm4, %v3046_v42  ;;  %vm8415_vm4 = vmmov %vm8405_vm3 }
0x147f   :  { %6511 = vmatprep.mubr.msk.f32.mxu0 %vm7408_vm0, %v7409_v1 }
0x1482   :  { %6512 = vmatmul.mubr.msk.f32.gmra.mrb[68].mxu0 %vm8407_vm6, %v3051_v19  ;;  %vm8416_vm6 = vmmov %vm8405_vm3 }
0x1483   :  { %6514 = vmatprep.mubr.msk.f32.mxu0 %vm7408_vm0, %v7409_v1 }
0x1486   :  { %6515 = vmatmul.mubr.msk.f32.gmra.mrb[70].mxu0 %vm8408_vm7, %v3056_v28  ;;  %vm8417_vm7 = vmmov %vm8405_vm3 }
0x1487   :  { %6525 = vmatprep.mubr.msk.f32.mxu0 %vm7408_vm0, %v7409_v1 }
0x1545   :  { %v3143_v56 = vpop.f32.mrb[60].mxu0 }
0x1546   :  { %v3144_v34 = vadd.f32 %v5680_v21, %v3143_v56  ;;  %v6493_v14 = vpop.f32.mrb[61].mxu0  ;;  %v3325_v56 = vld [vmem:[#allocation4 + $0x2c4] sm:$0xff] }
0x1547   :  { %v3330_v14 = vld [vmem:[#allocation4 + $0x2e5] sm:$0xff] }
0x1548   :  { %v3157_v33 = vsub.f32 0.0, %v3144_v34  ;;  %v3326_v34 = vld [vmem:[#allocation4 + $0x2cc] sm:$0xff] }
0x1549   :  { %v3148_v57 = vpop.f32.mrb[62].mxu0 }
0x154a   :  { %v3160_v59 = vmul.f32 1.442695, %v3157_v33  ;;  %v3149_v60 = vadd.f32 %v5680_v21, %v3148_v57  ;;  %v6496_v61 = vpop.f32.mrb[63].mxu0  ;;  %v6994_v33 = vpack.c.bf16 %v3326_v34, %v3325_v56  ;;  %v3331_v57 = vld [vmem:[#allocation4 + $0x2ed] sm:$0xff] }
0x154b   :  { %v3328_v61 = vld [vmem:[#allocation4 + $0x2dc] sm:$0xff] }
0x154c   :  { %7239 = vpow2.f32 %v3160_v59  ;;  %v3158_v62 = vsub.f32 0.0, %v3149_v60  ;;  %v7000_v59 = vpack.c.bf16 %v3331_v57, %v3330_v14  ;;  %6995 = vmatpush3.bf16.msra.mxu0 %v6994_v33  ;;  %v3327_v60 = vld [vmem:[#allocation4 + $0x2d4] sm:$0xff]  ;;  %v5698_v14 = vld [vmem:[#allocation4 + $0x326] ss:$0 sm:$0xff]  ;;  %v5690_v33 = vld [vmem:[#allocation4 + $0x2e4] ss:$0 sm:$0xff] }
0x154d   :  { %v3153_v63 = vpop.f32.mrb[64].mxu0  ;;  %6996 = vmatprep.subr.bf16.mxu0 %v7407_v0 }
0x154e   :  { %v3162_v2 = vmul.f32 1.442695, %v3158_v62  ;;  %v3154_v3 = vadd.f32 %v5680_v21, %v3153_v63  ;;  %v6499_v39 = vpop.f32.mrb[65].mxu0  ;;  %7001 = vmatpush3.bf16.msra.mxu1 %v7000_v59  ;;  %v3332_v62 = vld [vmem:[#allocation4 + $0x2f5] sm:$0xff]  ;;  %v6997_v63 = vpack.c.bf16 %v3328_v61, %v3327_v60 }
0x154f   :  { %7002 = vmatprep.subr.bf16.mxu1 %v7407_v0 }
0x1550   :  { %7241 = vpow2.f32 %v3162_v2  ;;  %v3159_v46 = vsub.f32 0.0, %v3154_v3  ;;  %v3333_v2 = vld [vmem:[#allocation4 + $0x2fd] sm:$0xff]  ;;  %6998 = vmatpush3.bf16.msra.mxu0 %v6997_v63 }
0x1551   :  { %v3250_v38 = vpop.f32.mrb[66].mxu0  ;;  %v7003_v3 = vpack.c.bf16 %v3333_v2, %v3332_v62  ;;  %7005 = vmatprep.subr.bf16.mxu0 %v7407_v0 }
0x1552   :  { %v3164_v44 = vmul.f32 1.442695, %v3159_v46  ;;  %v6510_v4 = vpop.f32.mrb[67].mxu0  ;;  %v3251_v53 = vadd.f32 %v5684_v16, %v3250_v38 }
0x1553   :  { %7004 = vmatpush3.bf16.msra.mxu1 %v7003_v3 }
0x1554   :  { %7243 = vpow2.f32 %v3164_v44  ;;  %7011 = vmatprep.subr.bf16.mxu1 %v7407_v0 }
0x1555   :  { %v3255_v5 = vpop.f32.mrb[68].mxu0 }
0x1556   :  { %v7240_v6 = vpop.eup %7239  ;;  %v6513_v7 = vpop.f32.mrb[69].mxu0  ;;  %v3256_v13 = vadd.f32 %v5684_v16, %v3255_v5 }
0x1557   :  { %v3166_v55 = vadd.f32 1.0, %v7240_v6 }
0x1559   :  { %7245 = vrcp.f32 %v3166_v55  ;;  %v3260_v8 = vpop.f32.mrb[70].mxu0 }
0x155a   :  { %v7242_v9 = vpop.eup %7241  ;;  %v6516_v40 = vpop.f32.mrb[71].mxu0  ;;  %v3261_v26 = vadd.f32 %v5684_v16, %v3260_v8 }
0x155b   :  { %v3167_v11 = vadd.f32 1.0, %v7242_v9  ;;  %v5688_v9 = vld [vmem:[#allocation4 + $0x2c2] ss:$0 sm:$0xff] }
0x155d   :  { %7247 = vrcp.f32 %v3167_v11  ;;  %v5689_v11 = vld [vmem:[#allocation4 + $0x2c3] ss:$0 sm:$0xff] }
0x155e   :  { %v7244_v43 = vpop.eup %7243 }
0x155f   :  { %v3168_v15 = vadd.f32 1.0, %v7244_v43  ;;  %v3335_v43 = vld [vmem:[#allocation4 + $0x306] sm:$0xff] }
0x1561   :  { %7249 = vrcp.f32 %v3168_v15  ;;  %v3336_v15 = vld [vmem:[#allocation4 + $0x30e] sm:$0xff] }
0x1563   :  { %v7246_v17 = vpop.eup %7245 }
0x1564   :  { %v3264_v18 = vmul.f32 %v7246_v17, %v3251_v53 }
0x1566   :  { %v3267_v22 = vadd.f32 %v3264_v18, %v7897_v37 }
0x1567   :  { %v7248_v23 = vpop.eup %7247 }
0x1568   :  { %v3265_v24 = vmul.f32 %v7248_v23, %v3256_v13  ;;  %v3272_v25 = vsel %vm8409_vm10, %v3267_v22, 0.0  ;;  %v7006_v13 = vpack.c.bf16 %v3336_v15, %v3335_v43  ;;  %v3338_v23 = vld [vmem:[#allocation4 + $0x31e] sm:$0xff]  ;;  %vm8418_vm10 = vmmov %vm8405_vm3 }
0x1569   :  { %3273 = vadd.xlane.f32.xlu1 %v3272_v25 }
0x156a   :  { %v3268_v31 = vadd.f32 %v3265_v24, %v7903_v47 }
0x156b   :  { %v7250_v32 = vpop.eup %7249 }
0x156c   :  { %v3266_v35 = vmul.f32 %v7250_v32, %v3261_v26  ;;  %v3275_v12 = vsel %vm8410_vm14, %v3268_v31, 0.0  ;;  %vm8419_vm14 = vmmov %vm8405_vm3 }
0x156d   :  { %3276 = vadd.xlane.f32.xlu0 %v3275_v12 }
0x156e   :  { %v3269_v36 = vadd.f32 %v3266_v35, %v7909_v27 }
0x1570   :  { %v3278_v41 = vsel %vm8411_vm1, %v3269_v36, 0.0  ;;  %vm8420_vm1 = vmmov %vm8405_vm3 }
0x1571   :  { %3279 = vadd.xlane.f32.xlu1 %v3278_v41 }
0x15f6   :  { %v3274_v42 = vpop.xlane.xlu1 %3273 }
0x15f7   :  { %v3281_v37 = vmul.f32 0.03125, %v3274_v42 }
0x15f9   :  { %v3284_v45 = vsub.f32 %v3267_v22, %v3281_v37  ;;  %v3337_v22 = vld [vmem:[#allocation4 + $0x316] sm:$0xff] }
0x15fa   :  { %v3277_v48 = vpop.xlane.xlu0 %3276  ;;  %v7009_v32 = vpack.c.bf16 %v3338_v23, %v3337_v22 }
0x15fb   :  { %v3282_v49 = vmul.f32 0.03125, %v3277_v48  ;;  %v3287_v51 = vmul.f32 %v3284_v45, %v3284_v45 }
0x15fd   :  { %v3285_v10 = vsub.f32 %v3268_v31, %v3282_v49  ;;  %v3290_v19 = vsel %vm8412_vm8, %v3287_v51, 0.0  ;;  %vm8421_vm8 = vmmov %vm8420_vm1 }
0x15fe   :  { %3291 = vadd.xlane.f32.xlu0 %v3290_v19  ;;  %v3280_v47 = vpop.xlane.xlu1 %3279 }
0x15ff   :  { %v3283_v29 = vmul.f32 0.03125, %v3280_v47  ;;  %v3288_v52 = vmul.f32 %v3285_v10, %v3285_v10 }
0x1601   :  { %v3286_v28 = vsub.f32 %v3269_v36, %v3283_v29  ;;  %v3293_v54 = vsel %vm8413_vm15, %v3288_v52, 0.0  ;;  %vm8422_vm15 = vmmov %vm8420_vm1 }
0x1602   :  { %3294 = vadd.xlane.f32.xlu1 %v3293_v54 }
0x1603   :  { %v3289_v27 = vmul.f32 %v3286_v28, %v3286_v28 }
0x1605   :  { %v3296_v21 = vsel %vm8414_vm2, %v3289_v27, 0.0 }
0x1606   :  { %3297 = vadd.xlane.f32.xlu0 %v3296_v21 }
0x168b   :  { %v3292_v39 = vpop.xlane.xlu0 %3291 }
0x168c   :  { %v3299_v46 = vmul.f32 0.03125, %v3292_v39 }
0x168e   :  { %v3302_v38 = vadd.f32 1e-05, %v3299_v46 }
0x168f   :  { %v3295_v44 = vpop.xlane.xlu1 %3294 }
0x1690   :  { %7251 = vrsqrt.f32 %v3302_v38  ;;  %v3300_v4 = vmul.f32 0.03125, %v3295_v44 }
0x1692   :  { %v3303_v5 = vadd.f32 1e-05, %v3300_v4 }
0x1693   :  { %v3298_v6 = vpop.xlane.xlu0 %3297 }
0x1694   :  { %7253 = vrsqrt.f32 %v3303_v5  ;;  %v3301_v7 = vmul.f32 0.03125, %v3298_v6 }
0x1696   :  { %v3304_v55 = vadd.f32 1e-05, %v3301_v7 }
0x1698   :  { %7255 = vrsqrt.f32 %v3304_v55 }
0x169a   :  { %v7252_v8 = vpop.eup %7251 }
0x169b   :  { %v3308_v40 = vmul.f32 %v7252_v8, %v3284_v45  ;;  %v5694_v45 = vld [vmem:[#allocation4 + $0x305] ss:$0 sm:$0xff] }
0x169d   :  { %v3315_v16 = vmul.f32 %v5688_v9, %v3308_v40 }
0x169e   :  { %v7254_v53 = vpop.eup %7253 }
0x169f   :  { %v7964_v17 = vadd.f32 %v5689_v11, %v3315_v16  ;;  %v3309_v18 = vmul.f32 %v7254_v53, %v3285_v10 }
0x16a1   :  { %6526 = vmatmul.mubr.msk.f32.vlgmr.msra.gmra.mrb[72].mxu0 %vm8405_vm3, %v7964_v17  ;;  %6543 = vmatmul.mubr.msk.f32.vlgmr.msra.gmra.mrb[64].mxu1 %vm8415_vm4, %v7964_v17  ;;  %v3316_v24 = vmul.f32 %v5688_v9, %v3309_v18  ;;  %vm8428_vm3 = vmmov %vm8420_vm1 }
0x16a2   :  { %v7256_v25 = vpop.eup %7255  ;;  %6528 = vmatprep.mubr.msk.f32.mxu0 %vm7408_vm0, %v7409_v1  ;;  %6545 = vmatprep.mubr.msk.f32.mxu1 %vm7408_vm0, %v7409_v1  ;;  %vm8429_vm4 = vmmov %vm8420_vm1 }
0x16a3   :  { %v7974_v26 = vadd.f32 %v5689_v11, %v3316_v24  ;;  %7007 = vmatpush3.bf16.msra.mxu0 %v7006_v13  ;;  %v3310_v31 = vmul.f32 %v7256_v25, %v3286_v28 }
0x16a4   :  { %7008 = vmatprep.subr.bf16.mxu0 %v7407_v0 }
0x16a5   :  { %6529 = vmatmul.mubr.msk.f32.gmra.mrb[74].mxu0 %vm8416_vm6, %v7974_v26  ;;  %6546 = vmatmul.mubr.msk.f32.gmra.mrb[66].mxu1 %vm8417_vm7, %v7974_v26  ;;  %v3317_v35 = vmul.f32 %v5688_v9, %v3310_v31  ;;  %vm8430_vm6 = vmmov %vm8420_vm1 }
0x16a6   :  { %6531 = vmatprep.mubr.msk.f32.mxu0 %vm7408_vm0, %v7409_v1  ;;  %6548 = vmatprep.mubr.msk.f32.mxu1 %vm7408_vm0, %v7409_v1 }
0x16a7   :  { %v7985_v12 = vadd.f32 %v5689_v11, %v3317_v35  ;;  %7010 = vmatpush3.bf16.msra.mxu0 %v7009_v32 }
0x16a8   :  { %7015 = vmatprep.subr.bf16.mxu0 %v7407_v0 }
0x16a9   :  { %6532 = vmatmul.mubr.msk.f32.gmra.mrb[76].mxu0 %vm8418_vm10, %v7985_v12  ;;  %6549 = vmatmul.mubr.msk.f32.gmra.mrb[68].mxu1 %vm8419_vm14, %v7985_v12 }
0x16aa   :  { %6559 = vmatprep.mubr.msk.f32.mxu0 %vm7408_vm0, %v7409_v1  ;;  %6574 = vmatprep.mubr.msk.f32.mxu1 %vm7408_vm0, %v7409_v1 }
0x16ad   :  { %6560 = vmatmul.mubr.msk.f32.vlgmr.msra.gmra.mrb[78].mxu0 %vm8420_vm1, %v7964_v17 }
0x16ae   :  { %6562 = vmatprep.mubr.msk.f32.mxu0 %vm7408_vm0, %v7409_v1 }
0x16b1   :  { %6563 = vmatmul.mubr.msk.f32.gmra.mrb[80].mxu0 %vm8421_vm8, %v7974_v26  ;;  %vm8431_vm8 = vmmov %vm8420_vm1 }
0x16b2   :  { %6565 = vmatprep.mubr.msk.f32.mxu0 %vm7408_vm0, %v7409_v1 }
0x16b5   :  { %6566 = vmatmul.mubr.msk.f32.gmra.mrb[82].mxu0 %vm8422_vm15, %v7985_v12  ;;  %vm8432_vm15 = vmmov %vm8420_vm1 }
0x16b6   :  { %6589 = vmatprep.mubr.msk.f32.mxu0 %vm7408_vm0, %v7409_v1 }
0x1774   :  { %v3424_v36 = vpop.f32.mrb[72].mxu0  ;;  %v3508_v41 = vpop.f32.mrb[64].mxu1 }
0x1775   :  { %v6527_v42 = vpop.f32.mrb[73].mxu0  ;;  %v6544_v37 = vpop.f32.mrb[65].mxu1  ;;  %v3509_v51 = vadd.f32 %v5694_v45, %v3508_v41  ;;  %v8017_v63 = vadd.f32 %v5690_v33, %v3424_v36 }
0x1778   :  { %v3429_v48 = vpop.f32.mrb[74].mxu0  ;;  %v3513_v49 = vpop.f32.mrb[66].mxu1 }
0x1779   :  { %v3514_v10 = vadd.f32 %v5694_v45, %v3513_v49  ;;  %v6530_v19 = vpop.f32.mrb[75].mxu0  ;;  %v6547_v47 = vpop.f32.mrb[67].mxu1  ;;  %v8026_v38 = vadd.f32 %v5690_v33, %v3429_v48 }
0x177b   :  { %v7012_v29 = vpack.c.bf16 %v3514_v10, %v3509_v51  ;;  %v8008_v52 = vpack.i.bf16 %v3514_v10, %v3509_v51 }
0x177c   :  { %v3434_v28 = vpop.f32.mrb[76].mxu0  ;;  %v3518_v54 = vpop.f32.mrb[68].mxu1 }
0x177d   :  { %v6533_v27 = vpop.f32.mrb[77].mxu0  ;;  %v6550_v21 = vpop.f32.mrb[69].mxu1  ;;  %7014 = vmatpush3.bf16.xpose.msk.msra.mxu1 %vm7592_vm12, %v7012_v29  ;;  %v8013_v57 = vadd.f32 %v5694_v45, %v3518_v54  ;;  %v8037_v4 = vadd.f32 %v5690_v33, %v3434_v28 }
0x177e   :  { %6572 = vmatprep.subr.mxu1 %v7409_v1 }
0x1780   :  { %v3592_v56 = vpop.f32.mrb[78].mxu0 }
0x1781   :  { %v6561_v34 = vpop.f32.mrb[79].mxu0  ;;  %v3593_v60 = vadd.f32 %v5698_v14, %v3592_v56 }
0x1784   :  { %v3597_v59 = vpop.f32.mrb[80].mxu0 }
0x1785   :  { %v3598_v61 = vadd.f32 %v5698_v14, %v3597_v59  ;;  %v6564_v62 = vpop.f32.mrb[81].mxu0  ;;  %6573 = vmatpush3.xpose.msk.msra.mxu1 %vm1451_vm11, %v8013_v57 }
0x1786   :  { %6598 = vmatprep.subr.mxu1 %v7409_v1 }
0x1787   :  { %v7016_v2 = vpack.c.bf16 %v3598_v61, %v3593_v60  ;;  %v8020_v3 = vpack.i.bf16 %v3598_v61, %v3593_v60 }
0x1788   :  { %v3602_v39 = vpop.f32.mrb[82].mxu0  ;;  %6575 = vmatmul.mubr.msk.f32.vlgmr.msra.gmra.mrb[70].mxu1 %vm1451_vm11, %v8017_v63 }
0x1789   :  { %v6567_v46 = vpop.f32.mrb[83].mxu0  ;;  %7017 = vmatpush3.bf16.msra.mxu0 %v7016_v2  ;;  %6577 = vmatprep.mubr.msk.f32.mxu1 %vm7408_vm0, %v7409_v1  ;;  %v8029_v44 = vadd.f32 %v5698_v14, %v3602_v39 }
0x178a   :  { %6587 = vmatprep.subr.mxu0 %v7409_v1  ;;  %v3340_v46 = vld [vmem:[#allocation4 + $0x327] sm:$0xff] }
0x178b   :  { %6599 = vmatpush3.msra.mxu1 %v3340_v46 }
0x178c   :  { %6578 = vmatmul.mubr.msk.f32.gmra.mrb[72].mxu1 %vm1451_vm11, %v8026_v38  ;;  %7022 = vmatprep.subr.bf16.mxu1 %v7407_v0 }
0x178d   :  { %6588 = vmatpush3.msk.msra.mxu0 %vm1600_vm13, %v8029_v44  ;;  %6580 = vmatprep.mubr.msk.f32.mxu1 %vm7408_vm0, %v7409_v1 }
0x178e   :  { %7018 = vmatprep.subr.bf16.mxu0 %v7407_v0 }
0x1790   :  { %6581 = vmatmul.mubr.msk.f32.gmra.mrb[74].mxu1 %vm1451_vm11, %v8037_v4 }
0x1791   :  { %6600 = vmatprep.mubr.msk.f32.mxu1 %vm7408_vm0, %v7409_v1 }
0x185b   :  { %v3690_v5 = vpop.f32.mrb[70].mxu1 }
0x185c   :  { %v3704_v6 = vmul.f32 0.35355338, %v3690_v5  ;;  %v6576_v7 = vpop.f32.mrb[71].mxu1 }
0x185e   :  { %v3707_v55 = vadd.f32 %v3704_v6, %v7637_v50 }
0x185f   :  { %v3695_v8 = vpop.f32.mrb[72].mxu1 }
0x1860   :  { %v3705_v9 = vmul.f32 0.35355338, %v3695_v8  ;;  %v6579_v40 = vpop.f32.mrb[73].mxu1  ;;  %v3710_v11 = vsel %vm1556_vm5, %v3707_v55, -inf }
0x1861   :  { %3711 = vmax.xlane.f32.xlu1 %v3710_v11 }
0x1862   :  { %v3708_v43 = vadd.f32 %v3705_v9, %v7641_v30 }
0x1863   :  { %v3700_v15 = vpop.f32.mrb[74].mxu1 }
0x1864   :  { %v3706_v16 = vmul.f32 0.35355338, %v3700_v15  ;;  %v6582_v53 = vpop.f32.mrb[75].mxu1  ;;  %v3713_v18 = vsel %vm1556_vm5, %v3708_v43, -inf }
0x1865   :  { %3714 = vmax.xlane.f32.xlu0 %v3713_v18 }
0x1866   :  { %v3709_v13 = vadd.f32 %v3706_v16, %v7646_v58 }
0x1868   :  { %v3716_v22 = vsel %vm1563_vm9, %v3709_v13, -inf }
0x1869   :  { %3717 = vmax.xlane.f32.xlu1 %v3716_v22 }
0x187a   :  { %7126 = vrot.lane.b32.xlu1 %v8008_v52, %s7412_s10 }
0x18ee   :  { %v3712_v23 = vpop.xlane.xlu1 %3711 }
0x18ef   :  { %v3719_v24 = vsub.f32 %v3707_v55, %v3712_v23 }
0x18f1   :  { %v3722_v25 = vmul.f32 1.442695, %v3719_v24 }
0x18f2   :  { %v3715_v31 = vpop.xlane.xlu0 %3714 }
0x18f3   :  { %7257 = vpow2.f32 %v3722_v25  ;;  %v3720_v32 = vsub.f32 %v3708_v43, %v3715_v31 }
0x18f5   :  { %v3724_v35 = vmul.f32 1.442695, %v3720_v32 }
0x18f6   :  { %v3718_v36 = vpop.xlane.xlu1 %3717 }
0x18f7   :  { %7259 = vpow2.f32 %v3724_v35  ;;  %v3721_v41 = vsub.f32 %v3709_v13, %v3718_v36 }
0x18f9   :  { %v3726_v42 = vmul.f32 1.442695, %v3721_v41 }
0x18fa   :  { %v7127_v19 = vpop.permute.xlu1 %7126 }
0x18fb   :  { %7261 = vpow2.f32 %v3726_v42  ;;  %v7129_v54 = vunpack.i.h.bf16 %v7127_v19  ;;  %v7128_v27 = vunpack.i.l.bf16 %v7127_v19 }
0x18fd   :  { %v7258_v37 = vpop.eup %7257  ;;  %v7019_v34 = vpack.c.bf16 %v7129_v54, %v7128_v27 }
0x18fe   :  { %v3728_v45 = vsel %vm1556_vm5, %v7258_v37, 0.0 }
0x18ff   :  { %3729 = vadd.xlane.f32.xlu0 %v3728_v45 }
0x1901   :  { %v7260_v48 = vpop.eup %7259 }
0x1902   :  { %v3731_v49 = vsel %vm1556_vm5, %v7260_v48, 0.0 }
0x1903   :  { %3732 = vadd.xlane.f32.xlu1 %v3731_v49 }
0x1905   :  { %v7262_v51 = vpop.eup %7261 }
0x1906   :  { %v3734_v10 = vsel %vm1563_vm9, %v7262_v51, 0.0 }
0x1907   :  { %3735 = vadd.xlane.f32.xlu0 %v3734_v10 }
0x1914   :  { %3931 = vrot.lane.b32.xlu1 %v8017_v63, %s7412_s10 }
0x1918   :  { %3933 = vrot.lane.b32.xlu1 %v8026_v38, %s7412_s10 }
0x191d   :  { %3941 = vrot.lane.b32.xlu0 %v8013_v57, %s7412_s10 }
0x1921   :  { %3935 = vrot.lane.b32.xlu0 %v8037_v4, %s7412_s10 }
0x198c   :  { %v3730_v47 = vpop.xlane.xlu0 %3729 }
0x198d   :  { %7263 = vrcp.f32 %v3730_v47 }
0x1990   :  { %v3733_v29 = vpop.xlane.xlu1 %3732 }
0x1991   :  { %7265 = vrcp.f32 %v3733_v29 }
0x1994   :  { %v3736_v28 = vpop.xlane.xlu0 %3735  ;;  %v3932_v62 = vpop.permute.xlu1 %3931 }
0x1995   :  { %7267 = vrcp.f32 %v3736_v28 }
0x1997   :  { %v7264_v21 = vpop.eup %7263 }
0x1998   :  { %v3740_v56 = vmul.f32 %v7264_v21, %v7258_v37  ;;  %v3942_v61 = vpop.permute.xlu0 %3941  ;;  %v3934_v2 = vpop.permute.xlu1 %3933 }
0x199a   :  { %6590 = vmatmul.mubr.msk.f32.vlgmr.msra.gmra.mrb[84].mxu0 %vm1556_vm5, %v3740_v56 }
0x199b   :  { %v7266_v14 = vpop.eup %7265  ;;  %7021 = vmatpush3.bf16.xpose.msk.msra.mxu0 %vm7592_vm12, %v7019_v34  ;;  %6592 = vmatprep.mubr.msk.f32.mxu0 %vm7408_vm0, %v7409_v1 }
0x199c   :  { %v3741_v33 = vmul.f32 %v7266_v14, %v7260_v48  ;;  %6613 = vmatprep.subr.mxu0 %v7409_v1  ;;  %v3936_v39 = vpop.permute.xlu0 %3935 }
0x199e   :  { %6593 = vmatmul.mubr.msk.f32.gmra.mrb[86].mxu0 %vm1556_vm5, %v3741_v33 }
0x199f   :  { %v7268_v59 = vpop.eup %7267  ;;  %6595 = vmatprep.mubr.msk.f32.mxu0 %vm7408_vm0, %v7409_v1 }
0x19a0   :  { %v3742_v60 = vmul.f32 %v7268_v59, %v7262_v51 }
0x19a2   :  { %6596 = vmatmul.mubr.msk.f32.gmra.mrb[88].mxu0 %vm1556_vm5, %v3742_v60 }
0x19a3   :  { %6614 = vmatpush3.xpose.msk.msra.mxu0 %vm1451_vm11, %v3942_v61  ;;  %6615 = vmatprep.mubr.msk.f32.mxu0 %vm7408_vm0, %v7409_v1 }
0x19a4   :  { %6639 = vmatprep.subr.mxu0 %v7409_v1 }
0x19a6   :  { %6616 = vmatmul.mubr.msk.f32.vlgmr.msra.gmra.mrb[90].mxu0 %vm1451_vm11, %v3932_v62 }
0x19a7   :  { %6618 = vmatprep.mubr.msk.f32.mxu0 %vm7408_vm0, %v7409_v1 }
0x19aa   :  { %6619 = vmatmul.mubr.msk.f32.gmra.mrb[92].mxu0 %vm1451_vm11, %v3934_v2 }
0x19ab   :  { %6621 = vmatprep.mubr.msk.f32.mxu0 %vm7408_vm0, %v7409_v1 }
0x19ae   :  { %6622 = vmatmul.mubr.msk.f32.gmra.mrb[94].mxu0 %vm1451_vm11, %v3936_v39 }
0x19af   :  { %6641 = vmatprep.mubr.msk.f32.mxu0 %vm7408_vm0, %v7409_v1 }
0x1a6d   :  { %v3821_v5 = vpop.f32.mrb[84].mxu0 }
0x1a6e   :  { %v6591_v6 = vpop.f32.mrb[85].mxu0  ;;  %6601 = vmatmul.mubr.msk.f32.vlgmr.msra.gmra.mrb[76].mxu1 %vm1451_vm11, %v3821_v5 }
0x1a6f   :  { %6603 = vmatprep.mubr.msk.f32.mxu1 %vm7408_vm0, %v7409_v1 }
0x1a71   :  { %v3826_v7 = vpop.f32.mrb[86].mxu0 }
0x1a72   :  { %v6594_v55 = vpop.f32.mrb[87].mxu0  ;;  %6604 = vmatmul.mubr.msk.f32.gmra.mrb[78].mxu1 %vm1451_vm11, %v3826_v7 }
0x1a73   :  { %6606 = vmatprep.mubr.msk.f32.mxu1 %vm7408_vm0, %v7409_v1 }
0x1a75   :  { %v3831_v8 = vpop.f32.mrb[88].mxu0 }
0x1a76   :  { %v6597_v9 = vpop.f32.mrb[89].mxu0  ;;  %6607 = vmatmul.mubr.msk.f32.gmra.mrb[80].mxu1 %vm1451_vm11, %v3831_v8 }
0x1a77   :  { %6630 = vmatprep.mubr.msk.f32.mxu1 %vm7408_vm0, %v7409_v1 }
0x1a79   :  { %v4021_v40 = vpop.f32.mrb[90].mxu0 }
0x1a7a   :  { %v4035_v11 = vmul.f32 0.35355338, %v4021_v40  ;;  %v6617_v43 = vpop.f32.mrb[91].mxu0 }
0x1a7c   :  { %v4038_v15 = vadd.f32 %v4035_v11, %v7637_v50 }
0x1a7d   :  { %v4026_v16 = vpop.f32.mrb[92].mxu0 }
0x1a7e   :  { %v4036_v53 = vmul.f32 0.35355338, %v4026_v16  ;;  %v6620_v18 = vpop.f32.mrb[93].mxu0  ;;  %v4041_v13 = vsel %vm1556_vm5, %v4038_v15, -inf }
0x1a7f   :  { %4042 = vmax.xlane.f32.xlu1 %v4041_v13 }
0x1a80   :  { %v4039_v22 = vadd.f32 %v4036_v53, %v7641_v30 }
0x1a81   :  { %v4031_v23 = vpop.f32.mrb[94].mxu0 }
0x1a82   :  { %v4037_v24 = vmul.f32 0.35355338, %v4031_v23  ;;  %v6623_v25 = vpop.f32.mrb[95].mxu0  ;;  %v4044_v31 = vsel %vm1556_vm5, %v4039_v22, -inf }
0x1a83   :  { %4045 = vmax.xlane.f32.xlu0 %v4044_v31 }
0x1a84   :  { %v4040_v32 = vadd.f32 %v4037_v24, %v7646_v58  ;;  %v3341_v24 = vld [vmem:[#allocation4 + $0x32f] sm:$0xff] }
0x1a85   :  { %6640 = vmatpush3.msra.mxu0 %v3341_v24 }
0x1a86   :  { %v4047_v35 = vsel %vm1563_vm9, %v4040_v32, -inf  ;;  %7029 = vmatprep.subr.bf16.mxu0 %v7407_v0 }
0x1a87   :  { %4048 = vmax.xlane.f32.xlu0 %v4047_v35 }
0x1b0c   :  { %v4043_v36 = vpop.xlane.xlu1 %4042 }
0x1b0d   :  { %v4050_v41 = vsub.f32 %v4038_v15, %v4043_v36 }
0x1b0f   :  { %v4053_v42 = vmul.f32 1.442695, %v4050_v41 }
0x1b10   :  { %v4046_v37 = vpop.xlane.xlu0 %4045 }
0x1b11   :  { %7269 = vpow2.f32 %v4053_v42  ;;  %v4051_v45 = vsub.f32 %v4039_v22, %v4046_v37 }
0x1b13   :  { %v4055_v48 = vmul.f32 1.442695, %v4051_v45 }
0x1b14   :  { %v4049_v47 = vpop.xlane.xlu0 %4048 }
0x1b15   :  { %7271 = vpow2.f32 %v4055_v48  ;;  %v4052_v29 = vsub.f32 %v4040_v32, %v4049_v47 }
0x1b17   :  { %v4057_v27 = vmul.f32 1.442695, %v4052_v29 }
0x1b19   :  { %7273 = vpow2.f32 %v4057_v27 }
0x1b1b   :  { %v7270_v49 = vpop.eup %7269 }
0x1b1c   :  { %v4059_v51 = vsel %vm1556_vm5, %v7270_v49, 0.0 }
0x1b1d   :  { %4060 = vadd.xlane.f32.xlu1 %v4059_v51 }
0x1b1f   :  { %v7272_v10 = vpop.eup %7271 }
0x1b20   :  { %v4062_v19 = vsel %vm1556_vm5, %v7272_v10, 0.0 }
0x1b21   :  { %4063 = vadd.xlane.f32.xlu0 %v4062_v19 }
0x1b23   :  { %v7274_v33 = vpop.eup %7273 }
0x1b24   :  { %v4065_v59 = vsel %vm1563_vm9, %v7274_v33, 0.0 }
0x1b2e   :  { %4080 = vrot.lane.b32.xlu1 %v8029_v44, %s7412_s10 }
0x1b32   :  { %7136 = vrot.lane.b32.xlu1 %v8008_v52, %s7413_s11 }
0x1b37   :  { %7131 = vrot.lane.b32.xlu0 %v8020_v3, %s7412_s10  ;;  %s7358_s10 = scalar_lea.vmem %s5550_s8, 32 }
0x1b38   :  { %p7360_p10 = scmp.lt.s32.totalorder %s7358_s10, %s7354_s9 }
0x1b3a   :  { %p7361_p11 = por %p7360_p10, %p7359_p9 }
0x1b3b   :  { %4277 = vrot.lane.b32.xlu0 %v8013_v57, %s7413_s11 }
0x1b3c   :  { %p7362_p12 = pnand %p7361_p11, %p7355_p8 }
0x1b3f   :  { %4269 = vrot.lane.b32.xlu0 %v8026_v38, %s7413_s11 }
0x1b41   :  { %v8114_v28 = vpop.f32.mrb[76].mxu1 }
0x1b42   :  { %v6602_v54 = vpop.f32.mrb[77].mxu1 }
0x1b45   :  { %v8116_v21 = vpop.f32.mrb[78].mxu1 }
0x1b46   :  { %v6605_v56 = vpop.f32.mrb[79].mxu1 }
0x1b49   :  { %v8118_v34 = vpop.f32.mrb[80].mxu1 }
0x1b4a   :  { %v6608_v14 = vpop.f32.mrb[81].mxu1 }
0x1b56   :  { %4066 = vadd.xlane.f32.xlu1 %v4065_v59 }
0x1b67   :  { %4267 = vrot.lane.b32.xlu1 %v8017_v63, %s7413_s11 }
0x1b6b   :  { %4271 = vrot.lane.b32.xlu1 %v8037_v4, %s7413_s11 }
0x1baa   :  { %v4061_v60 = vpop.xlane.xlu1 %4060 }
0x1bab   :  { %7275 = vrcp.f32 %v4061_v60 }
0x1bae   :  { %v4064_v61 = vpop.xlane.xlu0 %4063  ;;  %v4081_v2 = vpop.permute.xlu1 %4080 }
0x1baf   :  { %7277 = vrcp.f32 %v4064_v61 }
0x1bb2   :  { %v7132_v62 = vpop.permute.xlu0 %7131  ;;  %v7137_v7 = vpop.permute.xlu1 %7136 }
0x1bb3   :  { %v7134_v39 = vunpack.i.h.bf16 %v7132_v62  ;;  %v7133_v46 = vunpack.i.l.bf16 %v7132_v62  ;;  %v7139_v9 = vunpack.i.h.bf16 %v7137_v7  ;;  %v7138_v40 = vunpack.i.l.bf16 %v7137_v7  ;;  %v5715_v62 = vld [vmem:[#allocation4 + $0x347] ss:$0 sm:$0xff] }
0x1bb4   :  { %v3930_v24 = vadd.f32 %v5715_v62, %v8118_v34 }
0x1bb5   :  { %v7023_v5 = vpack.c.bf16 %v7134_v39, %v7133_v46  ;;  %v7276_v6 = vpop.eup %7275  ;;  %v7026_v43 = vpack.c.bf16 %v7139_v9, %v7138_v40  ;;  %v3928_v46 = vadd.f32 %v5715_v62, %v8114_v28 }
0x1bb6   :  { %v4071_v55 = vmul.f32 %v7276_v6, %v7270_v49  ;;  %v4278_v15 = vpop.permute.xlu0 %4277 }
0x1bb7   :  { %7024 = vmatpush3.bf16.msra.mxu1 %v7023_v5 }
0x1bb8   :  { %6628 = vmatprep.subr.mxu1 %v7409_v1 }
0x1bb9   :  { %v7278_v8 = vpop.eup %7277 }
0x1bba   :  { %v4072_v11 = vmul.f32 %v7278_v8, %v7272_v10  ;;  %v4270_v22 = vpop.permute.xlu0 %4269 }
0x1bbb   :  { %6629 = vmatpush3.msk.msra.mxu1 %vm1600_vm13, %v4081_v2 }
0x1bbc   :  { %6631 = vmatmul.mubr.msk.f32.vlgmr.msra.gmra.mrb[82].mxu1 %vm1556_vm5, %v4071_v55  ;;  %7025 = vmatprep.subr.bf16.mxu1 %v7407_v0 }
0x1bbd   :  { %6633 = vmatprep.mubr.msk.f32.mxu1 %vm7408_vm0, %v7409_v1 }
0x1bc0   :  { %6634 = vmatmul.mubr.msk.f32.gmra.mrb[84].mxu1 %vm1556_vm5, %v4072_v11 }
0x1bc1   :  { %6636 = vmatprep.mubr.msk.f32.mxu1 %vm7408_vm0, %v7409_v1 }
0x1bc2   :  { %7028 = vmatpush3.bf16.xpose.msk.msra.mxu1 %vm7592_vm12, %v7026_v43 }
0x1bc3   :  { %6654 = vmatprep.subr.mxu1 %v7409_v1 }
0x1bca   :  { %6655 = vmatpush3.xpose.msk.msra.mxu1 %vm1451_vm11, %v4278_v15 }
0x1bcb   :  { %6680 = vmatprep.subr.mxu1 %v7409_v1 }
0x1be3   :  { %v4067_v16 = vpop.xlane.xlu1 %4066 }
0x1be4   :  { %7279 = vrcp.f32 %v4067_v16 }
0x1be7   :  { %v4268_v13 = vpop.permute.xlu1 %4267 }
0x1beb   :  { %v4272_v23 = vpop.permute.xlu1 %4271 }
0x1bee   :  { %v7280_v53 = vpop.eup %7279 }
0x1bef   :  { %v4073_v18 = vmul.f32 %v7280_v53, %v7274_v33 }
0x1bf1   :  { %6637 = vmatmul.mubr.msk.f32.gmra.mrb[86].mxu1 %vm1556_vm5, %v4073_v18 }
0x1bf2   :  { %6656 = vmatprep.mubr.msk.f32.mxu1 %vm7408_vm0, %v7409_v1 }
0x1bf5   :  { %6657 = vmatmul.mubr.msk.f32.vlgmr.msra.gmra.mrb[88].mxu1 %vm1451_vm11, %v4268_v13 }
0x1bf6   :  { %6659 = vmatprep.mubr.msk.f32.mxu1 %vm7408_vm0, %v7409_v1 }
0x1bf9   :  { %6660 = vmatmul.mubr.msk.f32.gmra.mrb[90].mxu1 %vm1451_vm11, %v4270_v22 }
0x1bfa   :  { %6662 = vmatprep.mubr.msk.f32.mxu1 %vm7408_vm0, %v7409_v1 }
0x1bfd   :  { %6663 = vmatmul.mubr.msk.f32.gmra.mrb[92].mxu1 %vm1451_vm11, %v4272_v23 }
0x1bfe   :  { %6682 = vmatprep.mubr.msk.f32.mxu1 %vm7408_vm0, %v7409_v1 }
0x1c8f   :  { %v4161_v25 = vpop.f32.mrb[82].mxu1 }
0x1c90   :  { %v6632_v31 = vpop.f32.mrb[83].mxu1  ;;  %6642 = vmatmul.mubr.msk.f32.vlgmr.msra.gmra.mrb[96].mxu0 %vm1451_vm11, %v4161_v25 }
0x1c91   :  { %6644 = vmatprep.mubr.msk.f32.mxu0 %vm7408_vm0, %v7409_v1 }
0x1c93   :  { %v4166_v32 = vpop.f32.mrb[84].mxu1 }
0x1c94   :  { %v6635_v35 = vpop.f32.mrb[85].mxu1  ;;  %6645 = vmatmul.mubr.msk.f32.gmra.mrb[98].mxu0 %vm1451_vm11, %v4166_v32 }
0x1c95   :  { %6647 = vmatprep.mubr.msk.f32.mxu0 %vm7408_vm0, %v7409_v1 }
0x1cc4   :  { %v4171_v36 = vpop.f32.mrb[86].mxu1 }
0x1cc5   :  { %v6638_v41 = vpop.f32.mrb[87].mxu1  ;;  %6648 = vmatmul.mubr.msk.f32.gmra.mrb[100].mxu0 %vm1451_vm11, %v4171_v36 }
0x1cc6   :  { %6671 = vmatprep.mubr.msk.f32.mxu0 %vm7408_vm0, %v7409_v1 }
0x1cc8   :  { %v4357_v42 = vpop.f32.mrb[88].mxu1 }
0x1cc9   :  { %v4371_v37 = vmul.f32 0.35355338, %v4357_v42  ;;  %v6658_v45 = vpop.f32.mrb[89].mxu1 }
0x1ccb   :  { %v4374_v48 = vadd.f32 %v4371_v37, %v7637_v50 }
0x1ccc   :  { %v4362_v49 = vpop.f32.mrb[90].mxu1 }
0x1ccd   :  { %v4372_v51 = vmul.f32 0.35355338, %v4362_v49  ;;  %v6661_v10 = vpop.f32.mrb[91].mxu1  ;;  %v4377_v19 = vsel %vm1556_vm5, %v4374_v48, -inf }
0x1cce   :  { %4378 = vmax.xlane.f32.xlu0 %v4377_v19 }
0x1ccf   :  { %v4375_v47 = vadd.f32 %v4372_v51, %v7641_v30 }
0x1cd0   :  { %v4367_v29 = vpop.f32.mrb[92].mxu1 }
0x1cd1   :  { %v4373_v54 = vmul.f32 0.35355338, %v4367_v29  ;;  %v6664_v27 = vpop.f32.mrb[93].mxu1  ;;  %v4380_v56 = vsel %vm1556_vm5, %v4375_v47, -inf }
0x1cd2   :  { %4381 = vmax.xlane.f32.xlu1 %v4380_v56  ;;  %v3342_v27 = vld [vmem:[#allocation4 + $0x337] sm:$0xff] }
0x1cd3   :  { %v4376_v14 = vadd.f32 %v4373_v54, %v7646_v58  ;;  %6681 = vmatpush3.msra.mxu1 %v3342_v27 }
0x1cd4   :  { %7036 = vmatprep.subr.bf16.mxu1 %v7407_v0 }
0x1cd5   :  { %v4383_v33 = vsel %vm1563_vm9, %v4376_v14, -inf }
0x1cd6   :  { %4384 = vmax.xlane.f32.xlu0 %v4383_v33 }
0x1ce3   :  { %7141 = vrot.lane.b32.xlu1 %v8020_v3, %s7413_s11 }
0x1ce7   :  { %7146 = vrot.lane.b32.xlu1 %v8008_v52, %s7414_s12  ;;  %v3929_v52 = vadd.f32 %v5715_v62, %v8116_v21 }
0x1d5b   :  { %v4379_v59 = vpop.xlane.xlu0 %4378 }
0x1d5c   :  { %v4386_v60 = vsub.f32 %v4374_v48, %v4379_v59 }
0x1d5e   :  { %v4389_v61 = vmul.f32 1.442695, %v4386_v60 }
0x1d5f   :  { %v4382_v2 = vpop.xlane.xlu1 %4381 }
0x1d60   :  { %7281 = vpow2.f32 %v4389_v61  ;;  %v4387_v39 = vsub.f32 %v4375_v47, %v4382_v2 }
0x1d62   :  { %v4391_v5 = vmul.f32 1.442695, %v4387_v39 }
0x1d63   :  { %v4250_v6 = vpop.f32.mrb[96].mxu0  ;;  %v7142_v7 = vpop.permute.xlu1 %7141 }
0x1d64   :  { %7283 = vpow2.f32 %v4391_v5  ;;  %v8172_v55 = vadd.f32 %v4250_v6, %v3928_v46  ;;  %v7144_v8 = vunpack.i.h.bf16 %v7142_v7  ;;  %v7143_v9 = vunpack.i.l.bf16 %v7142_v7  ;;  %v6643_v40 = vpop.f32.mrb[97].mxu0  ;;  %v4385_v21 = vpop.xlane.xlu0 %4384 }
0x1d65   :  { %v4388_v22 = vsub.f32 %v4376_v14, %v4385_v21 }
0x1d66   :  { %v7030_v11 = vpack.c.bf16 %v7144_v8, %v7143_v9 }
0x1d67   :  { %v4255_v43 = vpop.f32.mrb[98].mxu0  ;;  %v4393_v23 = vmul.f32 1.442695, %v4388_v22 }
0x1d68   :  { %v8175_v15 = vadd.f32 %v4255_v43, %v3929_v52  ;;  %v6646_v16 = vpop.f32.mrb[99].mxu0  ;;  %7031 = vmatpush3.bf16.msra.mxu0 %v7030_v11 }
0x1d69   :  { %6669 = vmatprep.subr.mxu0 %v7409_v1  ;;  %7285 = vpow2.f32 %v4393_v23 }
0x1d6a   :  { %v7282_v28 = vpop.eup %7281 }
0x1d6b   :  { %v4395_v53 = vsel %vm1556_vm5, %v7282_v28, 0.0 }
0x1d6c   :  { %4396 = vadd.xlane.f32.xlu0 %v4395_v53 }
0x1d6e   :  { %v7284_v18 = vpop.eup %7283 }
0x1d6f   :  { %v4398_v13 = vsel %vm1556_vm5, %v7284_v18, 0.0 }
0x1d70   :  { %4399 = vadd.xlane.f32.xlu1 %v4398_v13 }
0x1d73   :  { %v7286_v35 = vpop.eup %7285 }
0x1d74   :  { %v4401_v36 = vsel %vm1563_vm9, %v7286_v35, 0.0 }
0x1d81   :  { %4611 = vrot.lane.b32.xlu1 %v8013_v57, %s7414_s12  ;;  %v7147_v57 = vpop.permute.xlu1 %7146 }
0x1d82   :  { %4414 = vrot.lane.b32.xlu0 %v8029_v44, %s7413_s11  ;;  %v7149_v34 = vunpack.i.h.bf16 %v7147_v57  ;;  %v7148_v37 = vunpack.i.l.bf16 %v7147_v57 }
0x1d84   :  { %v7033_v49 = vpack.c.bf16 %v7149_v34, %v7148_v37 }
0x1d85   :  { %4603 = vrot.lane.b32.xlu1 %v8026_v38, %s7414_s12 }
0x1d98   :  { %v4260_v25 = vpop.f32.mrb[100].mxu0 }
0x1d99   :  { %v8187_v31 = vadd.f32 %v4260_v25, %v3930_v24  ;;  %v6649_v32 = vpop.f32.mrb[101].mxu0 }
0x1da1   :  { %4402 = vadd.xlane.f32.xlu0 %v4401_v36 }
0x1db7   :  { %4601 = vrot.lane.b32.xlu0 %v8017_v63, %s7414_s12 }
0x1dbb   :  { %4605 = vrot.lane.b32.xlu0 %v8037_v4, %s7414_s12 }
0x1df9   :  { %v4397_v38 = vpop.xlane.xlu0 %4396 }
0x1dfa   :  { %7287 = vrcp.f32 %v4397_v38 }
0x1dfd   :  { %v4400_v41 = vpop.xlane.xlu1 %4399  ;;  %v4415_v42 = vpop.permute.xlu0 %4414 }
0x1dfe   :  { %7289 = vrcp.f32 %v4400_v41  ;;  %6670 = vmatpush3.msk.msra.mxu0 %vm1600_vm13, %v4415_v42 }
0x1dff   :  { %7032 = vmatprep.subr.bf16.mxu0 %v7407_v0 }
0x1e01   :  { %v4612_v51 = vpop.permute.xlu1 %4611 }
0x1e04   :  { %v7288_v45 = vpop.eup %7287 }
0x1e05   :  { %v4407_v48 = vmul.f32 %v7288_v45, %v7282_v28  ;;  %v4604_v29 = vpop.permute.xlu1 %4603 }
0x1e07   :  { %6672 = vmatmul.mubr.msk.f32.vlgmr.msra.gmra.mrb[102].mxu0 %vm1556_vm5, %v4407_v48 }
0x1e08   :  { %v7290_v63 = vpop.eup %7289  ;;  %7035 = vmatpush3.bf16.xpose.msk.msra.mxu0 %vm7592_vm12, %v7033_v49  ;;  %6674 = vmatprep.mubr.msk.f32.mxu0 %vm7408_vm0, %v7409_v1  ;;  %vm8425_vm12 = vmmov %vm8414_vm2 }
0x1e09   :  { %v4408_v4 = vmul.f32 %v7290_v63, %v7284_v18  ;;  %6695 = vmatprep.subr.mxu0 %v7409_v1 }
0x1e0b   :  { %6675 = vmatmul.mubr.msk.f32.gmra.mrb[104].mxu0 %vm1556_vm5, %v4408_v4 }
0x1e0c   :  { %6677 = vmatprep.mubr.msk.f32.mxu0 %vm7408_vm0, %v7409_v1 }
0x1e10   :  { %6696 = vmatpush3.xpose.msk.msra.mxu0 %vm1451_vm11, %v4612_v51 }
0x1e11   :  { %6721 = vmatprep.subr.mxu0 %v7409_v1 }
0x1e2e   :  { %v4403_v10 = vpop.xlane.xlu0 %4402 }
0x1e2f   :  { %7291 = vrcp.f32 %v4403_v10 }
0x1e32   :  { %v4602_v47 = vpop.permute.xlu0 %4601 }
0x1e36   :  { %v4606_v54 = vpop.permute.xlu0 %4605 }
0x1e39   :  { %v7292_v20 = vpop.eup %7291 }
0x1e3a   :  { %v4409_v19 = vmul.f32 %v7292_v20, %v7286_v35 }
0x1e3c   :  { %6678 = vmatmul.mubr.msk.f32.gmra.mrb[106].mxu0 %vm1556_vm5, %v4409_v19 }
0x1e3d   :  { %6697 = vmatprep.mubr.msk.f32.mxu0 %vm7408_vm0, %v7409_v1 }
0x1e40   :  { %6698 = vmatmul.mubr.msk.f32.vlgmr.msra.gmra.mrb[108].mxu0 %vm1451_vm11, %v4602_v47 }
0x1e41   :  { %6700 = vmatprep.mubr.msk.f32.mxu0 %vm7408_vm0, %v7409_v1 }
0x1e44   :  { %6701 = vmatmul.mubr.msk.f32.gmra.mrb[110].mxu0 %vm1451_vm11, %v4604_v29 }
0x1e45   :  { %6703 = vmatprep.mubr.msk.f32.mxu0 %vm7408_vm0, %v7409_v1 }
0x1e48   :  { %6704 = vmatmul.mubr.msk.f32.gmra.mrb[112].mxu0 %vm1451_vm11, %v4606_v54 }
0x1e49   :  { %6723 = vmatprep.mubr.msk.f32.mxu0 %vm7408_vm0, %v7409_v1 }
0x1eda   :  { %v4495_v56 = vpop.f32.mrb[102].mxu0 }
0x1edb   :  { %v6673_v14 = vpop.f32.mrb[103].mxu0  ;;  %6683 = vmatmul.mubr.msk.f32.vlgmr.msra.gmra.mrb[94].mxu1 %vm1451_vm11, %v4495_v56 }
0x1edc   :  { %6685 = vmatprep.mubr.msk.f32.mxu1 %vm7408_vm0, %v7409_v1 }
0x1ede   :  { %v4500_v33 = vpop.f32.mrb[104].mxu0 }
0x1edf   :  { %v6676_v59 = vpop.f32.mrb[105].mxu0  ;;  %6686 = vmatmul.mubr.msk.f32.gmra.mrb[96].mxu1 %vm1451_vm11, %v4500_v33 }
0x1ee0   :  { %6688 = vmatprep.mubr.msk.f32.mxu1 %vm7408_vm0, %v7409_v1 }
0x1f0f   :  { %v4505_v60 = vpop.f32.mrb[106].mxu0 }
0x1f10   :  { %v6679_v61 = vpop.f32.mrb[107].mxu0  ;;  %6689 = vmatmul.mubr.msk.f32.gmra.mrb[98].mxu1 %vm1451_vm11, %v4505_v60 }
0x1f11   :  { %6712 = vmatprep.mubr.msk.f32.mxu1 %vm7408_vm0, %v7409_v1 }
0x1f13   :  { %v4691_v62 = vpop.f32.mrb[108].mxu0 }
0x1f14   :  { %v4705_v2 = vmul.f32 0.35355338, %v4691_v62  ;;  %v6699_v39 = vpop.f32.mrb[109].mxu0 }
0x1f16   :  { %v4708_v46 = vadd.f32 %v4705_v2, %v7637_v50 }
0x1f17   :  { %v4696_v5 = vpop.f32.mrb[110].mxu0 }
0x1f18   :  { %v4706_v6 = vmul.f32 0.35355338, %v4696_v5  ;;  %v6702_v7 = vpop.f32.mrb[111].mxu0  ;;  %v4711_v8 = vsel %vm1556_vm5, %v4708_v46, -inf }
0x1f19   :  { %4712 = vmax.xlane.f32.xlu1 %v4711_v8 }
0x1f1a   :  { %v4709_v9 = vadd.f32 %v4706_v6, %v7641_v30 }
0x1f1b   :  { %v4701_v40 = vpop.f32.mrb[112].mxu0 }
0x1f1c   :  { %v4707_v52 = vmul.f32 0.35355338, %v4701_v40  ;;  %v6705_v11 = vpop.f32.mrb[113].mxu0  ;;  %v4714_v43 = vsel %vm1556_vm5, %v4709_v9, -inf }
0x1f1d   :  { %4715 = vmax.xlane.f32.xlu0 %v4714_v43 }
0x1f1e   :  { %v4710_v16 = vadd.f32 %v4707_v52, %v7646_v58 }
0x1f20   :  { %v4717_v28 = vsel %vm1563_vm9, %v4710_v16, -inf }
0x1f21   :  { %4718 = vmax.xlane.f32.xlu0 %v4717_v28 }
0x1fa6   :  { %v4713_v50 = vpop.xlane.xlu1 %4712 }
0x1fa7   :  { %v4720_v53 = vsub.f32 %v4708_v46, %v4713_v50 }
0x1fa9   :  { %v4723_v18 = vmul.f32 1.442695, %v4720_v53 }
0x1faa   :  { %v4716_v13 = vpop.xlane.xlu0 %4715 }
0x1fab   :  { %7293 = vpow2.f32 %v4723_v18  ;;  %v4721_v21 = vsub.f32 %v4709_v9, %v4716_v13 }
0x1fad   :  { %v4725_v22 = vmul.f32 1.442695, %v4721_v21 }
0x1fae   :  { %v4719_v23 = vpop.xlane.xlu0 %4718  ;;  %v4584_v30 = vpop.f32.mrb[94].mxu1 }
0x1faf   :  { %7295 = vpow2.f32 %v4725_v22  ;;  %v4722_v24 = vsub.f32 %v4710_v16, %v4719_v23  ;;  %v8236_v25 = vadd.f32 %v4584_v30, %v8172_v55  ;;  %v6684_v32 = vpop.f32.mrb[95].mxu1 }
0x1fb1   :  { %v4727_v35 = vmul.f32 1.442695, %v4722_v24 }
0x1fb2   :  { %v4589_v58 = vpop.f32.mrb[96].mxu1 }
0x1fb3   :  { %7297 = vpow2.f32 %v4727_v35  ;;  %v8239_v36 = vadd.f32 %v4589_v58, %v8175_v15  ;;  %v6687_v57 = vpop.f32.mrb[97].mxu1  ;;  %v3343_v15 = vld [vmem:[#allocation4 + $0x33f] sm:$0xff] }
0x1fb4   :  { %6722 = vmatpush3.msra.mxu0 %v3343_v15  ;;  %v4994_v57 = vld [vmem:[%s8386_s2 + $0x29] sm:$0xff]  ;;  %v5111_v15 = vld [vmem:[#allocation4 + $0x35a] sm:$0xff] }
0x1fb5   :  { %v7294_v38 = vpop.eup %7293  ;;  %7045 = vmatprep.subr.bf16.mxu0 %v7407_v0 }
0x1fb6   :  { %v4729_v41 = vsel %vm1556_vm5, %v7294_v38, 0.0 }
0x1fb7   :  { %4730 = vadd.xlane.f32.xlu1 %v4729_v41  ;;  %v4995_v41 = vld [vmem:[%s8386_s2 + $0x31] sm:$0xff] }
0x1fb9   :  { %v7296_v42 = vpop.eup %7295 }
0x1fba   :  { %v4732_v34 = vsel %vm1556_vm5, %v7296_v42, 0.0 }
0x1fbb   :  { %4733 = vadd.xlane.f32.xlu0 %v4732_v34 }
0x1fbd   :  { %v7298_v37 = vpop.eup %7297 }
0x1fbe   :  { %v4735_v55 = vsel %vm1563_vm9, %v7298_v37, 0.0  ;;  %vm8427_vm9 = vmmov %vm8420_vm1 }
0x1fbf   :  { %4736 = vadd.xlane.f32.xlu0 %v4735_v55  ;;  %v5110_v55 = vld [vmem:[#allocation4 + $0x352] sm:$0xff] }
0x1fc8   :  { %7151 = vrot.lane.b32.xlu1 %v8020_v3, %s7414_s12 }
0x1fd5   :  { %4748 = vrot.lane.b32.xlu0 %v8029_v44, %s7414_s12 }
0x1fe3   :  { %v4594_v45 = vpop.f32.mrb[98].mxu1 }
0x1fe4   :  { %v4600_v48 = vadd.f32 %v4594_v45, %v8187_v31  ;;  %v6690_v49 = vpop.f32.mrb[99].mxu1 }
0x2044   :  { %v4731_v63 = vpop.xlane.xlu1 %4730 }
0x2045   :  { %7299 = vrcp.f32 %v4731_v63  ;;  %v5113_v63 = vld [vmem:[#allocation4 + $0x36a] sm:$0xff] }
0x2048   :  { %v7152_v4 = vpop.permute.xlu1 %7151  ;;  %v4734_v51 = vpop.xlane.xlu0 %4733 }
0x2049   :  { %v7154_v10 = vunpack.i.h.bf16 %v7152_v4  ;;  %v7153_v20 = vunpack.i.l.bf16 %v7152_v4  ;;  %7301 = vrcp.f32 %v4734_v51  ;;  %v5114_v4 = vld [vmem:[#allocation4 + $0x372] sm:$0xff] }
0x204a   :  { %v7052_v51 = vpack.c.bf16 %v5114_v4, %v5113_v63 }
0x204b   :  { %v7037_v19 = vpack.c.bf16 %v7154_v10, %v7153_v20 }
0x204c   :  { %v4737_v3 = vpop.xlane.xlu0 %4736 }
0x204d   :  { %7303 = vrcp.f32 %v4737_v3  ;;  %7038 = vmatpush3.bf16.msra.mxu1 %v7037_v19 }
0x204e   :  { %6710 = vmatprep.subr.mxu1 %v7409_v1 }
0x204f   :  { %v7300_v44 = vpop.eup %7299 }
0x2050   :  { %v4741_v47 = vmul.f32 %v7300_v44, %v7294_v38  ;;  %v4749_v29 = vpop.permute.xlu0 %4748 }
0x2051   :  { %6711 = vmatpush3.msk.msra.mxu1 %vm1600_vm13, %v4749_v29  ;;  %vm8426_vm13 = vmmov %vm8420_vm1 }
0x2052   :  { %6713 = vmatmul.mubr.msk.f32.vlgmr.msra.gmra.mrb[100].mxu1 %vm1556_vm5, %v4741_v47  ;;  %7039 = vmatprep.subr.bf16.mxu1 %v7407_v0 }
0x2053   :  { %v7302_v31 = vpop.eup %7301  ;;  %6715 = vmatprep.mubr.msk.f32.mxu1 %vm7408_vm0, %v7409_v1 }
0x2054   :  { %v4742_v54 = vmul.f32 %v7302_v31, %v7296_v42  ;;  %v4996_v42 = vld [vmem:[%s8386_s2 + $0x39] sm:$0xff] }
0x2055   :  { %v7043_v34 = vpack.c.bf16 %v4996_v42, %v4995_v41 }
0x2056   :  { %6716 = vmatmul.mubr.msk.f32.gmra.mrb[102].mxu1 %vm1556_vm5, %v4742_v54 }
0x2057   :  { %v7304_v27 = vpop.eup %7303  ;;  %6718 = vmatprep.mubr.msk.f32.mxu1 %vm7408_vm0, %v7409_v1 }
0x2058   :  { %v4743_v56 = vmul.f32 %v7304_v27, %v7298_v37  ;;  %v5109_v37 = vld [vmem:[#allocation4 + $0x34a] sm:$0xff] }
0x2059   :  { %v7046_v45 = vpack.c.bf16 %v5110_v55, %v5109_v37 }
0x205a   :  { %6719 = vmatmul.mubr.msk.f32.gmra.mrb[104].mxu1 %vm1556_vm5, %v4743_v56  ;;  %vm8423_vm5 = vmmov %vm8420_vm1  ;;  %v5755_v56 = vld [vmem:[#allocation4 + $0x348] ss:$0 sm:$0xff] }
0x205b   :  { %6740 = vmatprep.mubr.msk.f32.mxu1 %vm7408_vm0, %v7409_v1 }
0x2125   :  { %v4829_v14 = vpop.f32.mrb[100].mxu1 }
0x2126   :  { %v6714_v33 = vpop.f32.mrb[101].mxu1  ;;  %6724 = vmatmul.mubr.msk.f32.vlgmr.msra.gmra.mrb[114].mxu0 %vm1451_vm11, %v4829_v14 }
0x2127   :  { %6726 = vmatprep.mubr.msk.f32.mxu0 %vm7408_vm0, %v7409_v1  ;;  %7047 = vmatpush3.bf16.msra.mxu0 %v7046_v45  ;;  %v5756_v33 = vld [vmem:[#allocation4 + $0x349] ss:$0 sm:$0xff] }
0x2128   :  { %7048 = vmatprep.subr.bf16.mxu0 %v7407_v0 }
0x2129   :  { %v4834_v59 = vpop.f32.mrb[102].mxu1 }
0x212a   :  { %v6717_v60 = vpop.f32.mrb[103].mxu1  ;;  %6727 = vmatmul.mubr.msk.f32.gmra.mrb[116].mxu0 %vm1451_vm11, %v4834_v59 }
0x212b   :  { %6729 = vmatprep.mubr.msk.f32.mxu0 %vm7408_vm0, %v7409_v1 }
0x212d   :  { %v4839_v61 = vpop.f32.mrb[104].mxu1 }
0x212e   :  { %v6720_v62 = vpop.f32.mrb[105].mxu1  ;;  %6730 = vmatmul.mubr.msk.f32.gmra.mrb[118].mxu0 %vm1451_vm11, %v4839_v61  ;;  %vm8424_vm11 = vmmov %vm8420_vm1 }
0x212f   :  { %6781 = vmatprep.mubr.msk.f32.mxu0 %vm7408_vm0, %v7409_v1 }
0x21f9   :  { %v4918_v2 = vpop.f32.mrb[114].mxu0 }
0x21fa   :  { %v4932_v39 = vadd.f32 %v4918_v2, %v8236_v25  ;;  %v6725_v46 = vpop.f32.mrb[115].mxu0 }
0x21fc   :  { %v4935_v5 = vadd.f32 %v4932_v39, %v7964_v17 }
0x21fd   :  { %v4923_v6 = vpop.f32.mrb[116].mxu0 }
0x21fe   :  { %v4933_v7 = vadd.f32 %v4923_v6, %v8239_v36  ;;  %v6728_v8 = vpop.f32.mrb[117].mxu0  ;;  %v4940_v9 = vsel %vm8423_vm5, %v4935_v5, 0.0  ;;  %v4993_v36 = vld [vmem:[%s8386_s2 + $0x21] sm:$0xff]  ;;  %vm8433_vm5 = vmmov %vm8420_vm1 }
0x21ff   :  { %4941 = vadd.xlane.f32.xlu1 %v4940_v9  ;;  %v7040_v38 = vpack.c.bf16 %v4994_v57, %v4993_v36  ;;  %v5115_v8 = vld [vmem:[#allocation4 + $0x37a] sm:$0xff]  ;;  %v5116_v9 = vld [vmem:[#allocation4 + $0x382] sm:$0xff] }
0x2200   :  { %v4936_v40 = vadd.f32 %v4933_v7, %v7974_v26 }
0x2201   :  { %v4928_v52 = vpop.f32.mrb[118].mxu0  ;;  %7041 = vmatpush3.bf16.msra.mxu1 %v7040_v38 }
0x2202   :  { %v4934_v11 = vadd.f32 %v4928_v52, %v4600_v48  ;;  %v6731_v43 = vpop.f32.mrb[119].mxu0  ;;  %v4943_v16 = vsel %vm8424_vm11, %v4936_v40, 0.0  ;;  %7042 = vmatprep.subr.bf16.mxu1 %v7407_v0  ;;  %v5112_v48 = vld [vmem:[#allocation4 + $0x362] sm:$0xff]  ;;  %v5117_v52 = vld [vmem:[#allocation4 + $0x38a] sm:$0xff]  ;;  %vm8434_vm11 = vmmov %vm8420_vm1 }
0x2203   :  { %4944 = vadd.xlane.f32.xlu0 %v4943_v16  ;;  %v7049_v49 = vpack.c.bf16 %v5112_v48, %v5111_v15  ;;  %v5119_v16 = vld [vmem:[#allocation4 + $0x39a] sm:$0xff] }
0x2204   :  { %v4937_v28 = vadd.f32 %v4934_v11, %v7985_v12  ;;  %v5118_v11 = vld [vmem:[#allocation4 + $0x392] sm:$0xff] }
0x2205   :  { %7044 = vmatpush3.bf16.msra.mxu1 %v7043_v34  ;;  %7050 = vmatpush3.bf16.msra.mxu0 %v7049_v49  ;;  %v7058_v43 = vpack.c.bf16 %v5118_v11, %v5117_v52 }
0x2206   :  { %v4946_v50 = vsel %vm8425_vm12, %v4937_v28, 0.0  ;;  %7069 = vmatprep.subr.bf16.mxu1 %v7407_v0  ;;  %7051 = vmatprep.subr.bf16.mxu0 %v7407_v0  ;;  %vm8435_vm12 = vmmov %vm8420_vm1 }
0x2207   :  { %4947 = vadd.xlane.f32.xlu1 %v4946_v50 }
0x2209   :  { %7053 = vmatpush3.bf16.msra.mxu0 %v7052_v51 }
0x220a   :  { %7054 = vmatprep.subr.bf16.mxu0 %v7407_v0 }
0x228c   :  { %v4942_v17 = vpop.xlane.xlu1 %4941 }
0x228d   :  { %v4949_v53 = vmul.f32 0.03125, %v4942_v17  ;;  %v5121_v17 = vld [vmem:[#allocation4 + $0x3aa] sm:$0xff] }
0x228f   :  { %v4952_v18 = vsub.f32 %v4935_v5, %v4949_v53  ;;  %v5122_v53 = vld [vmem:[#allocation4 + $0x3b2] sm:$0xff] }
0x2290   :  { %v4945_v13 = vpop.xlane.xlu0 %4944 }
0x2291   :  { %v4950_v21 = vmul.f32 0.03125, %v4945_v13  ;;  %v4955_v22 = vmul.f32 %v4952_v18, %v4952_v18  ;;  %v5123_v13 = vld [vmem:[#allocation4 + $0x3ba] sm:$0xff] }
0x2293   :  { %v4953_v23 = vsub.f32 %v4936_v40, %v4950_v21  ;;  %v4958_v26 = vsel %vm8426_vm13, %v4955_v22, 0.0  ;;  %v7055_v40 = vpack.c.bf16 %v5116_v9, %v5115_v8  ;;  %v5124_v21 = vld [vmem:[#allocation4 + $0x3c2] sm:$0xff] }
0x2294   :  { %4959 = vadd.xlane.f32.xlu1 %v4958_v26  ;;  %v4948_v30 = vpop.xlane.xlu1 %4947  ;;  %v7067_v22 = vpack.c.bf16 %v5124_v21, %v5123_v13  ;;  %v5211_v26 = vld [vmem:[#allocation4 + $0x3d3] sm:$0xff] }
0x2295   :  { %v4951_v24 = vmul.f32 0.03125, %v4948_v30  ;;  %v4956_v25 = vmul.f32 %v4953_v23, %v4953_v23  ;;  %7056 = vmatpush3.bf16.msra.mxu0 %v7055_v40 }
0x2296   :  { %7057 = vmatprep.subr.bf16.mxu0 %v7407_v0 }
0x2297   :  { %v4954_v32 = vsub.f32 %v4937_v28, %v4951_v24  ;;  %v4961_v35 = vsel %vm8427_vm9, %v4956_v25, 0.0  ;;  %v5120_v28 = vld [vmem:[#allocation4 + $0x3a2] sm:$0xff] }
0x2298   :  { %4962 = vadd.xlane.f32.xlu0 %v4961_v35  ;;  %v7061_v50 = vpack.c.bf16 %v5120_v28, %v5119_v16  ;;  %v5757_v24 = vld [vmem:[%s8386_s2 + $0x41] ss:$0 sm:$0xff] }
0x2299   :  { %v4957_v12 = vmul.f32 %v4954_v32, %v4954_v32  ;;  %7059 = vmatpush3.bf16.msra.mxu0 %v7058_v43 }
0x229a   :  { %7060 = vmatprep.subr.bf16.mxu0 %v7407_v0 }
0x229b   :  { %v4964_v58 = vsel %vm8414_vm2, %v4957_v12, 0.0 }
0x229c   :  { %4965 = vadd.xlane.f32.xlu1 %v4964_v58 }
0x229d   :  { %7062 = vmatpush3.bf16.msra.mxu0 %v7061_v50 }
0x229e   :  { %7063 = vmatprep.subr.bf16.mxu0 %v7407_v0 }
0x2321   :  { %v4960_v10 = vpop.xlane.xlu1 %4959 }
0x2322   :  { %v4967_v20 = vmul.f32 0.03125, %v4960_v10 }
0x2324   :  { %v4970_v19 = vadd.f32 1e-05, %v4967_v20 }
0x2325   :  { %v4963_v3 = vpop.xlane.xlu0 %4962 }
0x2326   :  { %7305 = vrsqrt.f32 %v4970_v19  ;;  %v4968_v44 = vmul.f32 0.03125, %v4963_v3 }
0x2328   :  { %v4971_v47 = vadd.f32 1e-05, %v4968_v44  ;;  %v5212_v44 = vld [vmem:[#allocation4 + $0x3db] sm:$0xff] }
0x2329   :  { %v4966_v29 = vpop.xlane.xlu1 %4965 }
0x232a   :  { %7307 = vrsqrt.f32 %v4971_v47  ;;  %v4969_v31 = vmul.f32 0.03125, %v4966_v29  ;;  %v5213_v47 = vld [vmem:[#allocation4 + $0x3e3] sm:$0xff] }
0x232b   :  { %v7073_v29 = vpack.c.bf16 %v5213_v47, %v5212_v44 }
0x232c   :  { %v4972_v54 = vadd.f32 1e-05, %v4969_v31  ;;  %v5319_v31 = vld [vmem:[#allocation4 + $0x3ec] sm:$0xff] }
0x232e   :  { %7309 = vrsqrt.f32 %v4972_v54  ;;  %v5320_v54 = vld [vmem:[#allocation4 + $0x3f4] sm:$0xff] }
0x2330   :  { %v7306_v27 = vpop.eup %7305 }
0x2331   :  { %v4976_v14 = vmul.f32 %v7306_v27, %v4952_v18  ;;  %v7064_v18 = vpack.c.bf16 %v5122_v53, %v5121_v17  ;;  %v5764_v27 = vld [vmem:[#allocation4 + $0x3ca] ss:$0 sm:$0xff] }
0x2333   :  { %v4983_v59 = vmul.f32 %v5755_v56, %v4976_v14  ;;  %7065 = vmatpush3.bf16.msra.mxu0 %v7064_v18  ;;  %v7076_v14 = vpack.c.bf16 %v5320_v54, %v5319_v31 }
0x2334   :  { %v7308_v60 = vpop.eup %7307  ;;  %7066 = vmatprep.subr.bf16.mxu0 %v7407_v0 }
0x2335   :  { %v8299_v61 = vadd.f32 %v5756_v33, %v4983_v59  ;;  %v4977_v62 = vmul.f32 %v7308_v60, %v4953_v23  ;;  %v5210_v23 = vld [vmem:[#allocation4 + $0x3cb] sm:$0xff]  ;;  %v5321_v60 = vld [vmem:[#allocation4 + $0x3fc] sm:$0xff] }
0x2336   :  { %v7070_v30 = vpack.c.bf16 %v5211_v26, %v5210_v23 }
0x2337   :  { %6741 = vmatmul.mubr.msk.f32.vlgmr.msra.gmra.mrb[106].mxu1 %vm8428_vm3, %v8299_v61  ;;  %v4984_v2 = vmul.f32 %v5755_v56, %v4977_v62  ;;  %7068 = vmatpush3.bf16.msra.mxu0 %v7067_v22  ;;  %v5322_v62 = vld [vmem:[#allocation4 + $0x404] sm:$0xff]  ;;  %vm8440_vm3 = vcmask 253952  }
0x2338   :  { %v7310_v39 = vpop.eup %7309  ;;  %6743 = vmatprep.mubr.msk.f32.mxu1 %vm7408_vm0, %v7409_v1  ;;  %7071 = vmatpush3.bf16.msra.mxu1 %v7070_v30 }
0x2339   :  { %v8305_v46 = vadd.f32 %v5756_v33, %v4984_v2  ;;  %v4978_v5 = vmul.f32 %v7310_v39, %v4954_v32  ;;  %7072 = vmatprep.subr.bf16.mxu1 %v7407_v0  ;;  %v7079_v39 = vpack.c.bf16 %v5322_v62, %v5321_v60 }
0x233b   :  { %6744 = vmatmul.mubr.msk.f32.gmra.mrb[108].mxu1 %vm8429_vm4, %v8305_v46  ;;  %v4985_v6 = vmul.f32 %v5755_v56, %v4978_v5  ;;  %vm8441_vm4 = vcmask 254977  }
0x233c   :  { %6746 = vmatprep.mubr.msk.f32.mxu1 %vm7408_vm0, %v7409_v1  ;;  %7074 = vmatpush3.bf16.msra.mxu1 %v7073_v29 }
0x233d   :  { %v4992_v7 = vadd.f32 %v5756_v33, %v4985_v6  ;;  %7075 = vmatprep.subr.bf16.mxu1 %v7407_v0 }
0x233f   :  { %6747 = vmatmul.mubr.msk.f32.gmra.mrb[110].mxu1 %vm8430_vm6, %v4992_v7 }
0x2340   :  { %6798 = vmatprep.mubr.msk.f32.mxu1 %vm7408_vm0, %v7409_v1 }
0x240a   :  { %v5077_v25 = vpop.f32.mrb[106].mxu1 }
0x240b   :  { %v5078_v32 = vadd.f32 %v5757_v24, %v5077_v25  ;;  %v6742_v35 = vpop.f32.mrb[107].mxu1 }
0x240d   :  { %v5094_v12 = vmin.f32 %v5078_v32, 0.0  ;;  %vm5091_vm7 = vcmp.gt.f32.partialorder %v5078_v32, 0.0 }
0x240e   :  { %v5082_v58 = vpop.f32.mrb[108].mxu1 }
0x240f   :  { %v5097_v36 = vmul.f32 1.442695, %v5094_v12  ;;  %v5083_v57 = vadd.f32 %v5757_v24, %v5082_v58  ;;  %v6745_v38 = vpop.f32.mrb[109].mxu1  ;;  %v5769_v58 = vld [vmem:[#allocation4 + $0x40c] ss:$0 sm:$0xff] }
0x2411   :  { %7311 = vpow2.f32 %v5097_v36  ;;  %v5095_v41 = vmin.f32 %v5083_v57, 0.0  ;;  %vm5092_vm10 = vcmp.gt.f32.partialorder %v5083_v57, 0.0 }
0x2412   :  { %v5087_v42 = vpop.f32.mrb[110].mxu1 }
0x2413   :  { %v5099_v34 = vmul.f32 1.442695, %v5095_v41  ;;  %v5088_v37 = vadd.f32 %v5757_v24, %v5087_v42  ;;  %v6748_v55 = vpop.f32.mrb[111].mxu1 }
0x2415   :  { %7313 = vpow2.f32 %v5099_v34  ;;  %v5096_v15 = vmin.f32 %v5088_v37, 0.0  ;;  %vm5093_vm14 = vcmp.gt.f32.partialorder %v5088_v37, 0.0 }
0x2417   :  { %v5101_v45 = vmul.f32 1.442695, %v5096_v15 }
0x2419   :  { %7315 = vpow2.f32 %v5101_v45 }
0x241b   :  { %v7312_v48 = vpop.eup %7311 }
0x241c   :  { %v5761_v49 = vadd.f32 -1.0, %v7312_v48 }
0x241e   :  { %v5106_v63 = vsel %vm5091_vm7, %v5078_v32, %v5761_v49 }
0x241f   :  { %v7314_v4 = vpop.eup %7313  ;;  %6782 = vmatmul.mubr.f32.vlgmr.msra.gmra.mrb[120].mxu0 %v5106_v63 }
0x2420   :  { %6784 = vmatprep.mubr.msk.f32.mxu0 %vm7408_vm0, %v7409_v1  ;;  %v5762_v51 = vadd.f32 -1.0, %v7314_v4 }
0x2422   :  { %v5107_v10 = vsel %vm5092_vm10, %v5083_v57, %v5762_v51  ;;  %vm5532_vm10 = vcmask 8192  }
0x2423   :  { %v7316_v20 = vpop.eup %7315  ;;  %6785 = vmatmul.mubr.f32.gmra.mrb[122].mxu0 %v5107_v10 }
0x2424   :  { %6787 = vmatprep.mubr.msk.f32.mxu0 %vm7408_vm0, %v7409_v1  ;;  %v5763_v19 = vadd.f32 -1.0, %v7316_v20 }
0x2426   :  { %v5108_v3 = vsel %vm5093_vm14, %v5088_v37, %v5763_v19 }
0x2427   :  { %6788 = vmatmul.mubr.f32.gmra.mrb[124].mxu0 %v5108_v3 }
0x24f2   :  { %v5196_v56 = vpop.f32.mrb[120].mxu0 }
0x24f3   :  { %v5197_v33 = vadd.f32 %v5764_v27, %v5196_v56  ;;  %v6783_v59 = vpop.f32.mrb[121].mxu0  ;;  %v5773_v56 = vld [vmem:[#allocation4 + $0x40d] ss:$0 sm:$0xff] }
0x24f5   :  { %6799 = vmatmul.mubr.msk.f32.vlgmr.msra.gmra.mrb[112].mxu1 %vm8420_vm1, %v5197_v33 }
0x24f6   :  { %v5201_v2 = vpop.f32.mrb[122].mxu0  ;;  %6801 = vmatprep.mubr.msk.f32.mxu1 %vm7408_vm0, %v7409_v1  ;;  %7077 = vmatpush3.bf16.msra.mxu1 %v7076_v14 }
0x24f7   :  { %v5202_v5 = vadd.f32 %v5764_v27, %v5201_v2  ;;  %v6786_v6 = vpop.f32.mrb[123].mxu0  ;;  %7078 = vmatprep.subr.bf16.mxu1 %v7407_v0  ;;  %v5765_v0 = vld [vmem:[#allocation4 + $0x3eb] ss:$0 sm:$0xff] }
0x24f9   :  { %6802 = vmatmul.mubr.msk.f32.gmra.mrb[114].mxu1 %vm8431_vm8, %v5202_v5 }
0x24fa   :  { %v5206_v7 = vpop.f32.mrb[124].mxu0  ;;  %6804 = vmatprep.mubr.msk.f32.mxu1 %vm7408_vm0, %v7409_v1  ;;  %7080 = vmatpush3.bf16.msra.mxu1 %v7079_v39 }
0x24fb   :  { %v5207_v8 = vadd.f32 %v5764_v27, %v5206_v7  ;;  %v6789_v9 = vpop.f32.mrb[125].mxu0  ;;  %6824 = vmatprep.subr.mxu1 %v7409_v1  ;;  %v5454_v7 = vld [vmem:[#allocation4 + $0x40f] sm:$0x1] }
0x24fd   :  { %6805 = vmatmul.mubr.msk.f32.gmra.mrb[116].mxu1 %vm8432_vm15, %v5207_v8 }
0x24fe   :  { %6815 = vmatprep.mubr.msk.f32.mxu1 %vm7408_vm0, %v7409_v1 }
0x2501   :  { %6816 = vmatmul.mubr.msk.f32.vlgmr.msra.gmra.mrb[118].mxu1 %vm8433_vm5, %v5197_v33  ;;  %v5774_v33 = vld [vmem:[#allocation4 + $0x40e] ss:$0 sm:$0xff] }
0x2502   :  { %6818 = vmatprep.mubr.msk.f32.mxu1 %vm7408_vm0, %v7409_v1 }
0x2505   :  { %6819 = vmatmul.mubr.msk.f32.gmra.mrb[120].mxu1 %vm8434_vm11, %v5202_v5 }
0x2506   :  { %6821 = vmatprep.mubr.msk.f32.mxu1 %vm7408_vm0, %v7409_v1 }
0x2509   :  { %6822 = vmatmul.mubr.msk.f32.gmra.mrb[122].mxu1 %vm8435_vm12, %v5207_v8  ;;  %v5455_v8 = vld [vmem:[#allocation4 + $0x410] sm:$0x1] }
0x250a   :  { %6826 = vmatprep.mubr.msk.f32.mxu1 %vm7408_vm0, %v7409_v1  ;;  %vm8436_vm0 = vmmov %vm8420_vm1 }
0x250b   :  { %vm8437_vm13 = vmmov %vm8436_vm0 }
0x250c   :  { %vm8438_vm9 = vmmov %vm8436_vm0 }
0x250d   :  { %vm8439_vm2 = vmmov %vm8436_vm0 }
0x250e   :  { %vm8442_vm6 = vmmov %vm8436_vm0 }
0x250f   :  { %vm8443_vm7 = vmmov %vm8436_vm0 }
0x25c8   :  { %v5294_v40 = vpop.f32.mrb[112].mxu1 }
0x25c9   :  { %v5295_v52 = vadd.f32 %v5765_v0, %v5294_v40  ;;  %v6800_v11 = vpop.f32.mrb[113].mxu1 }
0x25cb   :  { %v5307_v43 = vsub.f32 0.0, %v5295_v52 }
0x25cc   :  { %v5299_v16 = vpop.f32.mrb[114].mxu1 }
0x25cd   :  { %v5309_v28 = vmul.f32 1.442695, %v5307_v43  ;;  %v5300_v50 = vadd.f32 %v5765_v0, %v5299_v16  ;;  %v6803_v17 = vpop.f32.mrb[115].mxu1  ;;  %v5534_v0 = vld [vmem:[%s8384_s0 + $0x14] sm:$0x1] }
0x25cf   :  { %7317 = vpow2.f32 %v5309_v28  ;;  %v5308_v53 = vsub.f32 0.0, %v5300_v50 }
0x25d0   :  { %v5304_v18 = vpop.f32.mrb[116].mxu1 }
0x25d1   :  { %v5311_v13 = vmul.f32 1.442695, %v5308_v53  ;;  %v6806_v21 = vpop.f32.mrb[117].mxu1 }
0x25d3   :  { %7319 = vpow2.f32 %v5311_v13 }
0x25d4   :  { %v5394_v22 = vpop.f32.mrb[118].mxu1 }
0x25d5   :  { %v6817_v23 = vpop.f32.mrb[119].mxu1  ;;  %v5395_v36 = vadd.f32 %v5769_v58, %v5394_v22 }
0x25d8   :  { %v5399_v26 = vpop.f32.mrb[120].mxu1 }
0x25d9   :  { %v7318_v30 = vpop.eup %7317  ;;  %v6820_v1 = vpop.f32.mrb[121].mxu1  ;;  %v5400_v41 = vadd.f32 %v5769_v58, %v5399_v26 }
0x25da   :  { %v5313_v24 = vadd.f32 1.0, %v7318_v30 }
0x25dc   :  { %7321 = vrcp.f32 %v5313_v24  ;;  %v5404_v25 = vpop.f32.mrb[122].mxu1 }
0x25dd   :  { %v7320_v32 = vpop.eup %7319  ;;  %v6823_v35 = vpop.f32.mrb[123].mxu1 }
0x25de   :  { %v5314_v12 = vadd.f32 1.0, %v7320_v32 }
0x25e0   :  { %7323 = vrcp.f32 %v5314_v12 }
0x25e6   :  { %v7322_v57 = vpop.eup %7321 }
0x25e7   :  { %v5407_v38 = vmul.f32 %v7322_v57, %v5395_v36 }
0x25e9   :  { %v5409_v42 = vadd.f32 %v5407_v38, %v8299_v61 }
0x25ea   :  { %v7324_v34 = vpop.eup %7323 }
0x25eb   :  { %v5408_v37 = vmul.f32 %v7324_v34, %v5400_v41  ;;  %v5413_v55 = vsel %vm8436_vm0, %v5409_v42, 0.0 }
0x25ec   :  { %5414 = vadd.xlane.f32.xlu0 %v5413_v55 }
0x25ed   :  { %v5410_v15 = vadd.f32 %v5408_v37, %v8305_v46 }
0x25ef   :  { %v5416_v45 = vsel %vm8437_vm13, %v5410_v15, 0.0 }
0x25f0   :  { %5417 = vadd.xlane.f32.xlu1 %v5416_v45 }
0x2679   :  { %v5415_v48 = vpop.xlane.xlu0 %5414 }
0x267a   :  { %v5419_v49 = vmul.f32 0.03125, %v5415_v48 }
0x267c   :  { %v5421_v63 = vsub.f32 %v5409_v42, %v5419_v49 }
0x267d   :  { %v5418_v4 = vpop.xlane.xlu1 %5417 }
0x267e   :  { %v5420_v51 = vmul.f32 0.03125, %v5418_v4  ;;  %v5423_v10 = vmul.f32 %v5421_v63, %v5421_v63 }
0x2680   :  { %v5422_v20 = vsub.f32 %v5410_v15, %v5420_v51  ;;  %v5425_v19 = vsel %vm8438_vm9, %v5423_v10, 0.0 }
0x2681   :  { %5426 = vadd.xlane.f32.xlu0 %v5425_v19 }
0x2682   :  { %v5424_v61 = vmul.f32 %v5422_v20, %v5422_v20 }
0x2684   :  { %v5428_v3 = vsel %vm8439_vm2, %v5424_v61, 0.0 }
0x2685   :  { %5429 = vadd.xlane.f32.xlu1 %v5428_v3 }
0x270e   :  { %v5427_v44 = vpop.xlane.xlu0 %5426 }
0x270f   :  { %v5431_v47 = vmul.f32 0.03125, %v5427_v44 }
0x2711   :  { %v5433_v46 = vadd.f32 1e-05, %v5431_v47 }
0x2712   :  { %v5430_v29 = vpop.xlane.xlu1 %5429 }
0x2713   :  { %7325 = vrsqrt.f32 %v5433_v46  ;;  %v5432_v31 = vmul.f32 0.03125, %v5430_v29 }
0x2715   :  { %v5434_v54 = vadd.f32 1e-05, %v5432_v31 }
0x2717   :  { %7327 = vrsqrt.f32 %v5434_v54 }
0x271d   :  { %v7326_v27 = vpop.eup %7325 }
0x271e   :  { %v5437_v14 = vmul.f32 %v7326_v27, %v5421_v63 }
0x2720   :  { %v5443_v59 = vmul.f32 %v5773_v56, %v5437_v14 }
0x2721   :  { %v7328_v60 = vpop.eup %7327 }
0x2722   :  { %v5449_v62 = vadd.f32 %v5774_v33, %v5443_v59  ;;  %v5438_v2 = vmul.f32 %v7328_v60, %v5422_v20 }
0x2724   :  { %5451 = vst.msk [vmem:[#allocation3] sm:$0x1] %vm8440_vm3, %v5449_v62  ;;  %v5444_v39 = vmul.f32 %v5773_v56, %v5438_v2 }
0x2726   :  { %v5450_v5 = vadd.f32 %v5774_v33, %v5444_v39 }
0x2728   :  { %5452 = vst.msk [vmem:[#allocation3] sm:$0x2] %vm8441_vm4, %v5450_v5 }
0x272f   :  { %v5453_v6 = vld [vmem:[#allocation3] sm:$0x3] }
0x2730   :  { %6825 = vmatpush3.xpose.msk.msra.mxu1 %vm8442_vm6, %v5453_v6 }
0x2733   :  { %6827 = vmatmul.mubr.msk.f32.vlgmr.msra.gmra.mrb[124].mxu1 %vm8443_vm7, %v5454_v7 }
0x2806   :  { %v5528_v9 = vpop.f32.mrb[124].mxu1 }
0x2807   :  { %v5529_v40 = vadd.f32 %v5528_v9, %v5455_v8  ;;  %v6828_v52 = vpop.f32.mrb[125].mxu1 }
0x2809   :  { %v5535_v11 = vsub.f32 %v5529_v40, %v5534_v0  ;;  %5533 = vst.msk [vmem:[#allocation7] sm:$0x1] %vm5532_vm10, %v5529_v40 }
0x280b   :  { %v5536_v43 = vmul.f32 %v5535_v11, %v5535_v11 }
0x280d   :  { %v5537_v16 = vsel %vm5532_vm10, %v5536_v43, 0.0 }
0x280e   :  { %5538 = vadd.xlane.f32.xlu0 %v5537_v16 }
0x280f   :  { %7365 = shalt.err (!%p7362_p12)
}
0x2810   :  { %s7366_s12 = scalar_lea.hbm %s8387_s3, 16 }
0x2811   :  { %p7367_p13 = scmp.ne.s32.totalorder %s8387_s3, %s7366_s12  ;;  %p7370_p0 = scmp.lt.u32.totalorder %s7366_s12, %s8387_s3 }
0x2813   :  { %p7372_p1 = pnand %p7370_p0, %p7367_p13 }
0x2815   :  { %7375 = shalt.err (!%p7372_p1)
}
0x2816   :  { %5552 = dma.vmem_to_hbm [thread:$0]  %s5550_s8, 16, %s8387_s3, [#allocation6]   ;;  %vm5541_vm14 = vcmask 0  }
0x2817   :  { %s7416_s19 = smov [#allocation8]  }
0x2818   :  { %s5559_s20 = sshll.u32 %s7416_s19, 4  ;;  %s5560_s20 = int_to_ptr.vmem [resolvable:$true] %s5559_s20 }
0x2819   :  { %s7376_s21 = scalar_lea.vmem %s5560_s20, 16  ;;  %s7380_s22 = scalar_lea.vmem %s5560_s20, 32 }
0x281a   :  { %p7377_p2 = scmp.ne.s32.totalorder %s5560_s20, %s7376_s21  ;;  %p7381_p3 = scmp.lt.s32.totalorder %s5560_s20, %s5560_s20 }
0x281b   :  { %p7382_p4 = scmp.lt.s32.totalorder %s7380_s22, %s7376_s21 }
0x281d   :  { %p7383_p5 = por %p7382_p4, %p7381_p3 }
0x281f   :  { %p7384_p6 = pnand %p7383_p5, %p7377_p2 }
0x289b   :  { %v5539_v28 = vpop.xlane.xlu0 %5538 }
0x289c   :  { %v5540_v50 = vmul.f32 0.5, %v5539_v28 }
0x289e   :  { %5542 = vst.msk [vmem:[#allocation8] sm:$0x1] %vm5541_vm14, %v5540_v50 }
0x289f   :  { %7387 = shalt.err (!%p7384_p6)
}
0x28a0   :  { %s7388_s25 = scalar_lea.hbm %s8388_s4, 16 }
0x28a1   :  { %p7389_p7 = scmp.ne.s32.totalorder %s8388_s4, %s7388_s25  ;;  %p7392_p8 = scmp.lt.u32.totalorder %s7388_s25, %s8388_s4 }
0x28a3   :  { %p7394_p9 = pnand %p7392_p8, %p7389_p7 }
0x28a5   :  { %7397 = shalt.err (!%p7394_p9)
}
0x28a6   :  { %5562 = dma.vmem_to_hbm [thread:$0]  %s5560_s20, 16, %s8388_s4, [#allocation9]  }
0x28a7   :  { %7400 = dma.done.wait [#allocation6], 16  }
0x28a8   :  { %7401 = vsyncadd [#allocation6], 4294967280 }
0x28a9   :  { %7402 = dma.done.wait [#allocation9], 16  }
0x28aa   :  { %7403 = vsyncadd [#allocation9], 4294967280 }
0x28ab   :  { %5569 = vsyncpa [#allocation5], 1 }
0x28ac   :  { %5570 = vsyncpa [#allocation6], 1 }
0x28ad   :  { %5571 = vsyncpa [#allocation9], 1 }

</bundles_post_ra>
